<compile_context>
chip_gen: v7x
topology: tpu7x:2x2x1
jax: 0.10.0
libtpu: 0.0.40
codegen_flags: <defaults>
</compile_context>

<pallas_src>
import functools

import jax
import jax.numpy as jnp
import numpy as np
from jax.experimental import pallas as pl
from jax.experimental.pallas import tpu as pltpu

_VMEM_LIMIT_BYTES = 32 * 1024 * 1024  # >= v5e default (16 MiB), <= v7x physical


def _vmem_capacity_bytes():
    try:
        cap = int(pltpu.get_tpu_info().vmem_capacity_bytes)
        if cap > 0:
            return cap
    except Exception:
        pass
    return 64 * 1024 * 1024  # v7x per-core capacity: safe lower bound for all gens


def _pick_tile(m, cap):
    """Largest tile <= cap that divides m (prefers multiples of 128)."""
    if m <= cap:
        return m
    t = (cap // 128) * 128
    while t >= 128:
        if m % t == 0:
            return t
        t -= 128
    return m


def _pick_cout_block(cout, cap=256):
    """Largest divisor of cout that is <= cap and a multiple of 8 (else cout)."""
    if cout <= cap:
        return cout
    for d in range(cap - cap % 8, 7, -8):
        if cout % d == 0:
            return d
    return cout


def _pick_row_block(Ht, Wt, cin_total, cout_blk, budget=12 * 1024 * 1024):
    """Pick output row-block size R so the per-step VMEM working set stays small."""
    Wp = Wt + 2
    per_row = 4 * Wp * (2 * cin_total + 3 * cout_blk)
    return int(max(1, min(Ht, 512, budget // max(per_row, 1))))


# ----------------------------------------------------------------------------
# Kernel 1: ConvTranspose2d(C, C, kernel=2, stride=2) as one channel matmul.
#   out[n, co, 2h+dy, 2w+dx] = sum_ci x[n, ci, h, w] * Wt[ci, co, dy, dx] + b[co]
# Computed lane-dense as Y[(dy,dx,co), h*W+w] = Wmat @ X[ci, h*W+w] + b.
# ----------------------------------------------------------------------------
def _deconv2x2_kernel(x_ref, w_ref, b_ref, o_ref):
    # x_ref: (C1, tm), w_ref: (4*C1, C1), b_ref: (4*C1, 1), o_ref: (4*C1, tm)
    y = jnp.dot(w_ref[...], x_ref[...], preferred_element_type=jnp.float32)
    o_ref[...] = (y + b_ref[...]).astype(o_ref.dtype)


def conv_transpose2x2_pallas(x, wt, bt, *, max_tm=None):
    """x: (N, C1, H, W); wt: (C1, C1, 2, 2); bt: (C1,) -> (N, C1, 2H, 2W)."""
    N, C1, H, W = x.shape
    M = H * W
    x3 = x.reshape(N, C1, M)  # free reshape of NCHW (spatial on lanes)

    # Wmat[(dy*2+dx)*C1 + co, ci] = wt[ci, co, dy, dx]
    wmat = jnp.transpose(wt, (2, 3, 1, 0)).reshape(4 * C1, C1)
    bvec = jnp.tile(bt, 4).reshape(4 * C1, 1)

    if max_tm is None:
        # Generation-aware tile cap: keep double-buffered in/out blocks well
        # inside scoped VMEM on every TPU generation.
        budget = _vmem_capacity_bytes() // 6
        per_lane = 4 * (2 * C1 + 3 * 4 * C1)
        max_tm = max(128, min(2048, (budget // per_lane) // 128 * 128))
    tm = _pick_tile(M, max_tm)
    grid = (N, M // tm)

    y = pl.pallas_call(
        _deconv2x2_kernel,
        out_shape=jax.ShapeDtypeStruct((N, 4 * C1, M), x.dtype),
        grid_spec=pltpu.PrefetchScalarGridSpec(
            num_scalar_prefetch=0,
            grid=grid,
            in_specs=[
                pl.BlockSpec((None, C1, tm), lambda n, j: (n, 0, j)),
                pl.BlockSpec((4 * C1, C1), lambda n, j: (0, 0)),
                pl.BlockSpec((4 * C1, 1), lambda n, j: (0, 0)),
            ],
            out_specs=pl.BlockSpec((None, 4 * C1, tm), lambda n, j: (n, 0, j)),
        ),
        compiler_params=pltpu.CompilerParams(
            dimension_semantics=("parallel", "parallel"),
            vmem_limit_bytes=_VMEM_LIMIT_BYTES),
        cost_estimate=pl.CostEstimate(
            flops=2 * N * M * C1 * 4 * C1,
            transcendentals=0,
            bytes_accessed=4 * (N * C1 * M + 4 * C1 * C1 + N * 4 * C1 * M)),
    )(x3, wmat, bvec)

    # Spatial interleave of the 4 (dy, dx) phases of the stride-2 deconv.
    y6 = y.reshape(N, 2, 2, C1, H, W)
    # TODO(synk): this phase->spatial interleave is one XLA transpose (one HBM
    # round trip); it could be folded into the overlapped row-block gather.
    return jnp.transpose(y6, (0, 3, 4, 1, 5, 2)).reshape(N, C1, 2 * H, 2 * W)


# ----------------------------------------------------------------------------
# Overlapped row-block activation layout for the 3x3 convolutions.
# ----------------------------------------------------------------------------
def _to_overlapped(x, Ht, Wt, R, halo, top=0, left=0):
    """NCHW -> overlapped row-block layout (N, C, n_rb, (R + 2*halo) * (Wt+2)).

    Block rb, local row u, local col c holds the zero-padded feature at valid
    row (rb*R + u - halo) and valid col (c - 1) of a (Ht, Wt) canvas on which x
    is placed at offset (top, left); out-of-range positions are 0.
    """
    N, C, H, W = x.shape
    n_rb = -(-Ht // R)
    Hv = n_rb * R
    Wp = Wt + 2
    xp = jnp.pad(x, ((0, 0), (0, 0),
                     (halo + top, Hv + halo - top - H),
                     (1 + left, Wt + 1 - left - W)))
    rows = np.arange(n_rb)[:, None] * R + np.arange(R + 2 * halo)[None, :]
    xb = xp[:, :, rows, :]  # (N, C, n_rb, R+2*halo, Wp) gather (with halo dup)
    return xb.reshape(N, C, n_rb, (R + 2 * halo) * Wp)  # free reshape


def _block_mask(Ht, Wt, R, n_rb, halo_out):
    """(n_rb, 1, P_out) f32 mask: 1 on real output positions, 0 on padding."""
    Wp = Wt + 2
    rows = R + 2 * halo_out
    vrow = (np.arange(n_rb)[:, None, None] * R
            + np.arange(rows)[None, :, None] - halo_out)
    col = np.arange(Wp)[None, None, :]
    m = (vrow >= 0) & (vrow < Ht) & (col >= 1) & (col <= Wt)
    return jnp.asarray(m.reshape(n_rb, 1, rows * Wp), dtype=jnp.float32)


# ----------------------------------------------------------------------------
# Kernel 2: fused Conv2d(3x3, pad=1) + BatchNorm(eval, folded) + ReLU on one
# overlapped row-block.  Each of the 9 taps is a static lane-shifted slice of
# the flat (Cin, L_in) block followed by a (Cout, Cin) @ (Cin, P) MXU matmul,
# accumulated into a VMEM scratch.  Padding rows/cols are zeroed via a
# precomputed mask so the output can chain directly into the next conv.
# ----------------------------------------------------------------------------
def _conv3x3_kernel(*refs, n_in, wp, p_out):
    xs = refs[:n_in]
    ws = refs[n_in:2 * n_in]
    s_ref, b_ref, m_ref = refs[2 * n_in:2 * n_in + 3]
    o_ref = refs[2 * n_in + 3]
    acc_ref = refs[2 * n_in + 4]

    acc_ref[...] = jnp.zeros_like(acc_ref)
    for x_ref, w_ref in zip(xs, ws):
        l_in = x_ref.shape[1]
        for t in range(9):  # statically unrolled taps
            dy, dx = t // 3, t % 3
            s = dy * wp + dx - 1
            w_t = w_ref[t]
            if s < 0:
                # Only output lane 0 (a masked padding column) misses this tap.
                acc_ref[:, 1:] += jnp.dot(
                    w_t, x_ref[:, 0:p_out - 1],
                    preferred_element_type=jnp.float32)
            elif s + p_out > l_in:
                # Only the last output lane (a masked padding column) misses it.
                n_ok = l_in - s
                acc_ref[:, :n_ok] += jnp.dot(
                    w_t, x_ref[:, s:s + n_ok],
                    preferred_element_type=jnp.float32)
            else:
                acc_ref[...] += jnp.dot(
                    w_t, x_ref[:, s:s + p_out],
                    preferred_element_type=jnp.float32)

    y = acc_ref[...] * s_ref[...] + b_ref[...]
    o_ref[...] = (jnp.maximum(y, 0.0) * m_ref[...]).astype(o_ref.dtype)


def conv3x3_bn_relu_blocks(xs, ws, scale, bias_eff, *, Ht, Wt, R, halo_out,
                           cout_block=None, mxu_dtype=None):
    """Fused conv3x3+BN+ReLU on overlapped row-block inputs.

    xs[i]: (N, Cin_i, n_rb, (R + 2*(halo_out+1)) * (Wt+2))  -- halo_in = halo_out+1
    ws[i]: (Cout, Cin_i, 3, 3)
    Returns (N, Cout, n_rb, (R + 2*halo_out) * (Wt+2)) in the same layout family.
    """
    N, _, n_rb, L_in = xs[0].shape
    Wp = Wt + 2
    h_in = halo_out + 1
    P_out = (R + 2 * halo_out) * Wp
    assert L_in == (R + 2 * h_in) * Wp, (L_in, R, h_in, Wp)
    Cout = ws[0].shape[0]
    cins = [x.shape[1] for x in xs]

    cb = _pick_cout_block(Cout) if cout_block is None else cout_block
    n_cb = Cout // cb
    out_dtype = xs[0].dtype

    # w9[dy*3+dx, co, ci] = w[co, ci, dy, dx]
    w9s = [jnp.transpose(w, (2, 3, 0, 1)).reshape(9, Cout, ci)
           for w, ci in zip(ws, cins)]
    if mxu_dtype is not None:  # optional bf16 MXU path (v6e/v7x)
        xs = [x.astype(mxu_dtype) for x in xs]
        w9s = [w.astype(mxu_dtype) for w in w9s]
    sc = scale.reshape(Cout, 1).astype(jnp.float32)
    bs = bias_eff.reshape(Cout, 1).astype(jnp.float32)
    mask = _block_mask(Ht, Wt, R, n_rb, halo_out)

    n_in = len(xs)
    kernel = functools.partial(_conv3x3_kernel, n_in=n_in, wp=Wp, p_out=P_out)

    x_specs = [pl.BlockSpec((None, ci, None, L_in), lambda n, rb, c: (n, 0, rb, 0))
               for ci in cins]
    w_specs = [pl.BlockSpec((9, cb, ci), lambda n, rb, c: (0, c, 0)) for ci in cins]
    other_specs = [pl.BlockSpec((cb, 1), lambda n, rb, c: (c, 0)),
                   pl.BlockSpec((cb, 1), lambda n, rb, c: (c, 0)),
                   pl.BlockSpec((None, 1, P_out), lambda n, rb, c: (rb, 0, 0))]

    out = pl.pallas_call(
        kernel,
        out_shape=jax.ShapeDtypeStruct((N, Cout, n_rb, P_out), out_dtype),
        grid_spec=pltpu.PrefetchScalarGridSpec(
            num_scalar_prefetch=0,
            grid=(N, n_rb, n_cb),
            in_specs=x_specs + w_specs + other_specs,
            out_specs=pl.BlockSpec((None, cb, None, P_out),
                                   lambda n, rb, c: (n, c, rb, 0)),
            scratch_shapes=[pltpu.VMEM((cb, P_out), jnp.float32)],
        ),
        compiler_params=pltpu.CompilerParams(
            dimension_semantics=("parallel", "parallel", "parallel"),
            vmem_limit_bytes=_VMEM_LIMIT_BYTES),
        cost_estimate=pl.CostEstimate(
            flops=2 * 9 * N * n_rb * sum(cins) * Cout * P_out,
            transcendentals=0,
            bytes_accessed=4 * (N * n_rb * sum(cins) * L_in
                                + 9 * Cout * sum(cins)
                                + N * Cout * n_rb * P_out)),
    )(*xs, *w9s, sc, bs, mask)
    return out


def _fold_bn(conv_bias, bn, eps=1e-5):
    """Fold eval-mode BatchNorm into per-channel (scale, bias)."""
    if bn is None:
        return jnp.ones_like(conv_bias), conv_bias
    gamma, beta, mean, var = bn
    scale = gamma / jnp.sqrt(var + eps)
    return scale, (conv_bias - mean) * scale + beta


# ----------------------------------------------------------------------------
# The `up` module.
# ----------------------------------------------------------------------------
class UpPallas:
    def __init__(self, in_ch, out_ch, batchnorm, method='conv', dropout=None,
                 key=None, mxu_dtype=None):
        if key is None:
            key = jax.random.PRNGKey(0)
        ks = jax.random.split(key, 14)
        C1 = in_ch // 2
        self.method = method
        self.mxu_dtype = mxu_dtype  # e.g. jnp.bfloat16 on v6e/v7x for MXU speed
        if method == 'conv':
            b = 1.0 / (C1 * 2 * 2) ** 0.5
            self.up_w = jax.random.uniform(ks[0], (C1, C1, 2, 2), jnp.float32, -b, b)
            self.up_b = jax.random.uniform(ks[1], (C1,), jnp.float32, -b, b)
        elif method == 'none':
            self.up_w = None
            self.up_b = None
        else:
            # TODO(synk): 'bilinear' / 'upconv' upsampling paths not implemented.
            raise NotImplementedError(method)

        b1 = 1.0 / (in_ch * 9) ** 0.5
        self.w1 = jax.random.uniform(ks[2], (out_ch, in_ch, 3, 3), jnp.float32, -b1, b1)
        self.b1 = jax.random.uniform(ks[3], (out_ch,), jnp.float32, -b1, b1)
        b2 = 1.0 / (out_ch * 9) ** 0.5
        self.w2 = jax.random.uniform(ks[4], (out_ch, out_ch, 3, 3), jnp.float32, -b2, b2)
        self.b2 = jax.random.uniform(ks[5], (out_ch,), jnp.float32, -b2, b2)

        if batchnorm:
            # TODO(synk): BatchNorm uses fixed running statistics (eval mode),
            # not per-batch statistics as in PyTorch training mode.
            self.bn1 = (jax.random.uniform(ks[6], (out_ch,), jnp.float32, 0.5, 1.5),
                        0.1 * jax.random.normal(ks[7], (out_ch,), jnp.float32),
                        0.1 * jax.random.normal(ks[8], (out_ch,), jnp.float32),
                        jax.random.uniform(ks[9], (out_ch,), jnp.float32, 0.5, 1.5))
            self.bn2 = (jax.random.uniform(ks[10], (out_ch,), jnp.float32, 0.5, 1.5),
                        0.1 * jax.random.normal(ks[11], (out_ch,), jnp.float32),
                        0.1 * jax.random.normal(ks[12], (out_ch,), jnp.float32),
                        jax.random.uniform(ks[13], (out_ch,), jnp.float32, 0.5, 1.5))
        else:
            self.bn1 = None
            self.bn2 = None

    def __call__(self, x1, x2):
        if self.method == 'conv':
            x1 = conv_transpose2x2_pallas(x1, self.up_w, self.up_b)
        # method == 'none': identity

        N, C2, Ht, Wt = x2.shape
        C1 = x1.shape[1]
        top = (Ht - x1.shape[2]) // 2
        left = (Wt - x1.shape[3]) // 2

        in_ch = C2 + C1
        c_mid = self.w1.shape[0]
        c_out = self.w2.shape[0]
        cb1 = _pick_cout_block(c_mid)
        cb2 = _pick_cout_block(c_out)
        R = _pick_row_block(Ht, Wt, max(in_ch, c_mid), max(cb1, cb2))

        # Fuse "pad x1 + concat([x2, x1])" into the first conv: both tensors go
        # in separately (w1 split along Cin), already in the overlapped
        # row-block layout used by the tiled conv kernels.
        xa = _to_overlapped(x2, Ht, Wt, R, halo=2)
        xb = _to_overlapped(x1, Ht, Wt, R, halo=2, top=top, left=left)

        s1, e1 = _fold_bn(self.b1, self.bn1)
        mid = conv3x3_bn_relu_blocks(
            [xa, xb], [self.w1[:, :C2], self.w1[:, C2:]], s1, e1,
            Ht=Ht, Wt=Wt, R=R, halo_out=1, cout_block=cb1,
            mxu_dtype=self.mxu_dtype)

        s2, e2 = _fold_bn(self.b2, self.bn2)
        y = conv3x3_bn_relu_blocks(
            [mid], [self.w2], s2, e2,
            Ht=Ht, Wt=Wt, R=R, halo_out=0, cout_block=cb2,
            mxu_dtype=self.mxu_dtype)

        n_rb = y.shape[2]
        Wp = Wt + 2
        y = y.reshape(N, c_out, n_rb * R, Wp)  # free reshape (blocks are disjoint)
        # TODO(synk): dropout omitted (identity at inference).
        return y[:, :, :Ht, 1:Wt + 1]


# ----------------------------------------------------------------------------
# Pure-JAX reference (XLA ops only, full-precision) for correctness checking.
# ----------------------------------------------------------------------------
def reference_up(m, x1, x2, eps=1e-5):
    hp = jax.lax.Precision.HIGHEST
    if m.method == 'conv':
        t = jnp.einsum('nihw,iopq->nohpwq', x1, m.up_w, precision=hp)
        t = t + m.up_b[None, :, None, None, None, None]
        N, C1, H1, _, W1, _ = t.shape
        x1 = t.reshape(N, C1, 2 * H1, 2 * W1)
    diffY = x2.shape[2] - x1.shape[2]
    diffX = x2.shape[3] - x1.shape[3]
    if diffY or diffX:
        x1 = jnp.pad(x1, ((0, 0), (0, 0),
                          (diffY // 2, diffY - diffY // 2),
                          (diffX // 2, diffX - diffX // 2)))
    x = jnp.concatenate([x2, x1], axis=1)

    def conv_bn_relu(x, w, b, bn):
        y = jax.lax.conv_general_dilated(
            x, w, (1, 1), ((1, 1), (1, 1)),
            dimension_numbers=('NCHW', 'OIHW', 'NCHW'), precision=hp)
        y = y + b[None, :, None, None]
        if bn is not None:
            g, be, mu, var = bn
            y = (y - mu[None, :, None, None]) / jnp.sqrt(var[None, :, None, None] + eps)
            y = y * g[None, :, None, None] + be[None, :, None, None]
        return jnp.maximum(y, 0.0)

    y = conv_bn_relu(x, m.w1, m.b1, m.bn1)
    y = conv_bn_relu(y, m.w2, m.b2, m.bn2)
    return y


if __name__ == "__main__":
    key = jax.random.PRNGKey(0)
    k1, k2, kp = jax.random.split(key, 3)

    # up(in_ch=4, out_ch=4): x1 is the low-res half (2 ch, 8x8), x2 the skip (2 ch, 16x16)
    N, in_ch, out_ch = 2, 4, 4
    C1 = in_ch // 2
    H1 = W1 = 8
    x1 = jax.random.normal(k1, (N, C1, H1, W1), jnp.float32)
    x2 = jax.random.normal(k2, (N, in_ch - C1, 2 * H1, 2 * W1), jnp.float32)

    mod = UpPallas(in_ch, out_ch, batchnorm=True, method='conv', dropout=None, key=kp)
    fwd = jax.jit(mod.__call__)
    y = jax.block_until_ready(fwd(x1, x2))

    ref = reference_up(mod, x1, x2)
    assert y.shape == (N, out_ch, 2 * H1, 2 * W1), y.shape
    err = float(jnp.max(jnp.abs(y - ref)))
    # Full-f32 MXU path end-to-end: only accumulation-order noise expected, so
    # the tolerance is tight enough to catch any tap/phase/bias ordering bug.
    assert jnp.allclose(y, ref, atol=2e-3, rtol=2e-3), err

    print("KERNEL_OK")
</pallas_src>

<mosaic_0001>
module attributes {stable_mosaic.version = 11 : i64} {
  func.func @_deconv2x2_kernel(%arg0: i32, %arg1: i32, %arg2: memref<1x2x64xf32, #tpu.memory_space<vmem>>, %arg3: memref<8x2xf32, #tpu.memory_space<vmem>>, %arg4: memref<8x1xf32, #tpu.memory_space<vmem>>, %arg5: memref<1x8x64xf32, #tpu.memory_space<vmem>>) attributes {dimension_semantics = [#tpu.dimension_semantics<parallel>, #tpu.dimension_semantics<parallel>], iteration_bounds = array<i64: 2, 1>, scalar_prefetch = 0 : i64, scratch_operands = 0 : i64, tpu.core_type = #tpu.core_type<tc>, window_params = [{transform_indices = @transform_0, window_bounds = array<i64: 1, 2, 64>}, {pipeline_mode = #tpu.pipeline_mode<synchronous>, transform_indices = @transform_1, window_bounds = array<i64: 8, 2>}, {pipeline_mode = #tpu.pipeline_mode<synchronous>, transform_indices = @transform_2, window_bounds = array<i64: 8, 1>}, {transform_indices = @transform_3, window_bounds = array<i64: 1, 8, 64>}]} {
    %c0 = arith.constant 0 : index
    %c0_0 = arith.constant 0 : index
    %0 = vector.load %arg3[%c0, %c0_0] : memref<8x2xf32, #tpu.memory_space<vmem>>, vector<8x2xf32>
    %c0_1 = arith.constant 0 : index
    %c0_2 = arith.constant 0 : index
    %c0_3 = arith.constant 0 : index
    %1 = vector.load %arg2[%c0_1, %c0_2, %c0_3] : memref<1x2x64xf32, #tpu.memory_space<vmem>>, vector<1x2x64xf32>
    %2 = vector.shape_cast %1 : vector<1x2x64xf32> to vector<2x64xf32>
    %cst = arith.constant dense<0.000000e+00> : vector<8x64xf32>
    %3 = tpu.matmul %0, %2, %cst {dimension_numbers = #tpu.dot_dimension_numbers<[1], [0], [0], [1], [0, 0, 1, 1], [], []>} : vector<8x2xf32>, vector<2x64xf32>, vector<8x64xf32> -> vector<8x64xf32>
    %c0_4 = arith.constant 0 : index
    %c0_5 = arith.constant 0 : index
    %4 = vector.load %arg4[%c0_4, %c0_5] : memref<8x1xf32, #tpu.memory_space<vmem>>, vector<8x1xf32>
    %5 = vector.broadcast %4 : vector<8x1xf32> to vector<8x64xf32>
    %6 = arith.addf %3, %5 : vector<8x64xf32>
    %c0_6 = arith.constant 0 : index
    %c0_7 = arith.constant 0 : index
    %c0_8 = arith.constant 0 : index
    %7 = vector.load %arg5[%c0_6, %c0_7, %c0_8] : memref<1x8x64xf32, #tpu.memory_space<vmem>>, vector<1x8x64xf32>
    %8 = vector.shape_cast %7 : vector<1x8x64xf32> to vector<8x64xf32>
    %9 = vector.shape_cast %6 : vector<8x64xf32> to vector<1x8x64xf32>
    tpu.vector_store %arg5[%c0_6, %c0_7, %c0_8], %9 {strides = array<i32>} : memref<1x8x64xf32, #tpu.memory_space<vmem>>, vector<1x8x64xf32>,
    return
  }
  func.func @transform_0(%arg0: i32, %arg1: i32) -> (i32, i32, i32) {
    %c0_i32 = arith.constant 0 : i32
    %c0_i32_0 = arith.constant 0 : i32
    return %arg0, %c0_i32, %arg1 : i32, i32, i32
  }
  func.func @transform_1(%arg0: i32, %arg1: i32) -> (i32, i32) {
    %c0_i32 = arith.constant 0 : i32
    %c0_i32_0 = arith.constant 0 : i32
    %c0_i32_1 = arith.constant 0 : i32
    return %c0_i32, %c0_i32_0 : i32, i32
  }
  func.func @transform_2(%arg0: i32, %arg1: i32) -> (i32, i32) {
    %c0_i32 = arith.constant 0 : i32
    %c0_i32_0 = arith.constant 0 : i32
    %c0_i32_1 = arith.constant 0 : i32
    return %c0_i32, %c0_i32_0 : i32, i32
  }
  func.func @transform_3(%arg0: i32, %arg1: i32) -> (i32, i32, i32) {
    %c0_i32 = arith.constant 0 : i32
    %c0_i32_0 = arith.constant 0 : i32
    return %arg0, %c0_i32, %arg1 : i32, i32, i32
  }
}

module attributes {stable_mosaic.version = 11 : i64} {
  func.func @_conv3x3_kernel(%arg0: i32, %arg1: i32, %arg2: i32, %arg3: memref<1x4x1x324xf32, #tpu.memory_space<vmem>>, %arg4: memref<9x4x4xf32, #tpu.memory_space<vmem>>, %arg5: memref<4x1xf32, #tpu.memory_space<vmem>>, %arg6: memref<4x1xf32, #tpu.memory_space<vmem>>, %arg7: memref<1x1x288xf32, #tpu.memory_space<vmem>>, %arg8: memref<1x4x1x288xf32, #tpu.memory_space<vmem>>, %arg9: memref<4x288xf32, #tpu.memory_space<vmem>>) attributes {dimension_semantics = [#tpu.dimension_semantics<parallel>, #tpu.dimension_semantics<parallel>, #tpu.dimension_semantics<parallel>], iteration_bounds = array<i64: 2, 1, 1>, scalar_prefetch = 0 : i64, scratch_operands = 1 : i64, tpu.core_type = #tpu.core_type<tc>, window_params = [{transform_indices = @transform_0, window_bounds = array<i64: 1, 4, 1, 324>}, {transform_indices = @transform_1, window_bounds = array<i64: 9, 4, 4>}, {transform_indices = @transform_2, window_bounds = array<i64: 4, 1>}, {transform_indices = @transform_3, window_bounds = array<i64: 4, 1>}, {transform_indices = @transform_4, window_bounds = array<i64: 1, 1, 288>}, {transform_indices = @transform_5, window_bounds = array<i64: 1, 4, 1, 288>}]} {
    %cst = arith.constant 0.000000e+00 : f32
    %0 = vector.broadcast %cst : f32 to vector<4x288xf32>
    %c0 = arith.constant 0 : index
    %c0_0 = arith.constant 0 : index
    %1 = vector.load %arg9[%c0, %c0_0] : memref<4x288xf32, #tpu.memory_space<vmem>>, vector<4x288xf32>
    tpu.vector_store %arg9[%c0, %c0_0], %0 {strides = array<i32>} : memref<4x288xf32, #tpu.memory_space<vmem>>, vector<4x288xf32>,
    %c0_1 = arith.constant 0 : index
    %c0_2 = arith.constant 0 : index
    %c0_3 = arith.constant 0 : index
    %2 = vector.load %arg4[%c0_1, %c0_2, %c0_3] : memref<9x4x4xf32, #tpu.memory_space<vmem>>, vector<1x4x4xf32>
    %3 = vector.shape_cast %2 : vector<1x4x4xf32> to vector<4x4xf32>
    %c0_4 = arith.constant 0 : index
    %c1 = arith.constant 1 : index
    %4 = vector.load %arg9[%c0_4, %c1] : memref<4x288xf32, #tpu.memory_space<vmem>>, vector<4x287xf32>
    %c0_5 = arith.constant 0 : index
    %c0_6 = arith.constant 0 : index
    %c0_7 = arith.constant 0 : index
    %c0_8 = arith.constant 0 : index
    %5 = vector.load %arg3[%c0_5, %c0_6, %c0_7, %c0_8] : memref<1x4x1x324xf32, #tpu.memory_space<vmem>>, vector<1x4x1x287xf32>
    %6 = vector.shape_cast %5 : vector<1x4x1x287xf32> to vector<4x287xf32>
    %cst_9 = arith.constant dense<0.000000e+00> : vector<4x287xf32>
    %7 = tpu.matmul %3, %6, %cst_9 {dimension_numbers = #tpu.dot_dimension_numbers<[1], [0], [0], [1], [0, 0, 1, 1], [], []>} : vector<4x4xf32>, vector<4x287xf32>, vector<4x287xf32> -> vector<4x287xf32>
    %8 = arith.addf %4, %7 : vector<4x287xf32>
    %c0_10 = arith.constant 0 : index
    %c1_11 = arith.constant 1 : index
    %9 = vector.load %arg9[%c0_10, %c1_11] : memref<4x288xf32, #tpu.memory_space<vmem>>, vector<4x287xf32>
    tpu.vector_store %arg9[%c0_10, %c1_11], %8 {strides = array<i32>} : memref<4x288xf32, #tpu.memory_space<vmem>>, vector<4x287xf32>,
    %c1_12 = arith.constant 1 : index
    %c0_13 = arith.constant 0 : index
    %c0_14 = arith.constant 0 : index
    %10 = vector.load %arg4[%c1_12, %c0_13, %c0_14] : memref<9x4x4xf32, #tpu.memory_space<vmem>>, vector<1x4x4xf32>
    %11 = vector.shape_cast %10 : vector<1x4x4xf32> to vector<4x4xf32>
    %c0_15 = arith.constant 0 : index
    %c0_16 = arith.constant 0 : index
    %12 = vector.load %arg9[%c0_15, %c0_16] : memref<4x288xf32, #tpu.memory_space<vmem>>, vector<4x288xf32>
    %c0_17 = arith.constant 0 : index
    %c0_18 = arith.constant 0 : index
    %c0_19 = arith.constant 0 : index
    %c0_20 = arith.constant 0 : index
    %13 = vector.load %arg3[%c0_17, %c0_18, %c0_19, %c0_20] : memref<1x4x1x324xf32, #tpu.memory_space<vmem>>, vector<1x4x1x288xf32>
    %14 = vector.shape_cast %13 : vector<1x4x1x288xf32> to vector<4x288xf32>
    %cst_21 = arith.constant dense<0.000000e+00> : vector<4x288xf32>
    %15 = tpu.matmul %11, %14, %cst_21 {dimension_numbers = #tpu.dot_dimension_numbers<[1], [0], [0], [1], [0, 0, 1, 1], [], []>} : vector<4x4xf32>, vector<4x288xf32>, vector<4x288xf32> -> vector<4x288xf32>
    %16 = arith.addf %12, %15 : vector<4x288xf32>
    %c0_22 = arith.constant 0 : index
    %c0_23 = arith.constant 0 : index
    %17 = vector.load %arg9[%c0_22, %c0_23] : memref<4x288xf32, #tpu.memory_space<vmem>>, vector<4x288xf32>
    tpu.vector_store %arg9[%c0_22, %c0_23], %16 {strides = array<i32>} : memref<4x288xf32, #tpu.memory_space<vmem>>, vector<4x288xf32>,
    %c2 = arith.constant 2 : index
    %c0_24 = arith.constant 0 : index
    %c0_25 = arith.constant 0 : index
    %18 = vector.load %arg4[%c2, %c0_24, %c0_25] : memref<9x4x4xf32, #tpu.memory_space<vmem>>, vector<1x4x4xf32>
    %19 = vector.shape_cast %18 : vector<1x4x4xf32> to vector<4x4xf32>
    %c0_26 = arith.constant 0 : index
    %c0_27 = arith.constant 0 : index
    %20 = vector.load %arg9[%c0_26, %c0_27] : memref<4x288xf32, #tpu.memory_space<vmem>>, vector<4x288xf32>
    %c0_28 = arith.constant 0 : index
    %c0_29 = arith.constant 0 : index
    %c0_30 = arith.constant 0 : index
    %c1_31 = arith.constant 1 : index
    %21 = vector.load %arg3[%c0_28, %c0_29, %c0_30, %c1_31] : memref<1x4x1x324xf32, #tpu.memory_space<vmem>>, vector<1x4x1x288xf32>
    %22 = vector.shape_cast %21 : vector<1x4x1x288xf32> to vector<4x288xf32>
    %cst_32 = arith.constant dense<0.000000e+00> : vector<4x288xf32>
    %23 = tpu.matmul %19, %22, %cst_32 {dimension_numbers = #tpu.dot_dimension_numbers<[1], [0], [0], [1], [0, 0, 1, 1], [], []>} : vector<4x4xf32>, vector<4x288xf32>, vector<4x288xf32> -> vector<4x288xf32>
    %24 = arith.addf %20, %23 : vector<4x288xf32>
    %c0_33 = arith.constant 0 : index
    %c0_34 = arith.constant 0 : index
    %25 = vector.load %arg9[%c0_33, %c0_34] : memref<4x288xf32, #tpu.memory_space<vmem>>, vector<4x288xf32>
    tpu.vector_store %arg9[%c0_33, %c0_34], %24 {strides = array<i32>} : memref<4x288xf32, #tpu.memory_space<vmem>>, vector<4x288xf32>,
    %c3 = arith.constant 3 : index
    %c0_35 = arith.constant 0 : index
    %c0_36 = arith.constant 0 : index
    %26 = vector.load %arg4[%c3, %c0_35, %c0_36] : memref<9x4x4xf32, #tpu.memory_space<vmem>>, vector<1x4x4xf32>
    %27 = vector.shape_cast %26 : vector<1x4x4xf32> to vector<4x4xf32>
    %c0_37 = arith.constant 0 : index
    %c0_38 = arith.constant 0 : index
    %28 = vector.load %arg9[%c0_37, %c0_38] : memref<4x288xf32, #tpu.memory_space<vmem>>, vector<4x288xf32>
    %c0_39 = arith.constant 0 : index
    %c0_40 = arith.constant 0 : index
    %c0_41 = arith.constant 0 : index
    %c17 = arith.constant 17 : index
    %29 = vector.load %arg3[%c0_39, %c0_40, %c0_41, %c17] : memref<1x4x1x324xf32, #tpu.memory_space<vmem>>, vector<1x4x1x288xf32>
    %30 = vector.shape_cast %29 : vector<1x4x1x288xf32> to vector<4x288xf32>
    %cst_42 = arith.constant dense<0.000000e+00> : vector<4x288xf32>
    %31 = tpu.matmul %27, %30, %cst_42 {dimension_numbers = #tpu.dot_dimension_numbers<[1], [0], [0], [1], [0, 0, 1, 1], [], []>} : vector<4x4xf32>, vector<4x288xf32>, vector<4x288xf32> -> vector<4x288xf32>
    %32 = arith.addf %28, %31 : vector<4x288xf32>
    %c0_43 = arith.constant 0 : index
    %c0_44 = arith.constant 0 : index
    %33 = vector.load %arg9[%c0_43, %c0_44] : memref<4x288xf32, #tpu.memory_space<vmem>>, vector<4x288xf32>
    tpu.vector_store %arg9[%c0_43, %c0_44], %32 {strides = array<i32>} : memref<4x288xf32, #tpu.memory_space<vmem>>, vector<4x288xf32>,
    %c4 = arith.constant 4 : index
    %c0_45 = arith.constant 0 : index
    %c0_46 = arith.constant 0 : index
    %34 = vector.load %arg4[%c4, %c0_45, %c0_46] : memref<9x4x4xf32, #tpu.memory_space<vmem>>, vector<1x4x4xf32>
    %35 = vector.shape_cast %34 : vector<1x4x4xf32> to vector<4x4xf32>
    %c0_47 = arith.constant 0 : index
    %c0_48 = arith.constant 0 : index
    %36 = vector.load %arg9[%c0_47, %c0_48] : memref<4x288xf32, #tpu.memory_space<vmem>>, vector<4x288xf32>
    %c0_49 = arith.constant 0 : index
    %c0_50 = arith.constant 0 : index
    %c0_51 = arith.constant 0 : index
    %c18 = arith.constant 18 : index
    %37 = vector.load %arg3[%c0_49, %c0_50, %c0_51, %c18] : memref<1x4x1x324xf32, #tpu.memory_space<vmem>>, vector<1x4x1x288xf32>
    %38 = vector.shape_cast %37 : vector<1x4x1x288xf32> to vector<4x288xf32>
    %cst_52 = arith.constant dense<0.000000e+00> : vector<4x288xf32>
    %39 = tpu.matmul %35, %38, %cst_52 {dimension_numbers = #tpu.dot_dimension_numbers<[1], [0], [0], [1], [0, 0, 1, 1], [], []>} : vector<4x4xf32>, vector<4x288xf32>, vector<4x288xf32> -> vector<4x288xf32>
    %40 = arith.addf %36, %39 : vector<4x288xf32>
    %c0_53 = arith.constant 0 : index
    %c0_54 = arith.constant 0 : index
    %41 = vector.load %arg9[%c0_53, %c0_54] : memref<4x288xf32, #tpu.memory_space<vmem>>, vector<4x288xf32>
    tpu.vector_store %arg9[%c0_53, %c0_54], %40 {strides = array<i32>} : memref<4x288xf32, #tpu.memory_space<vmem>>, vector<4x288xf32>,
    %c5 = arith.constant 5 : index
    %c0_55 = arith.constant 0 : index
    %c0_56 = arith.constant 0 : index
    %42 = vector.load %arg4[%c5, %c0_55, %c0_56] : memref<9x4x4xf32, #tpu.memory_space<vmem>>, vector<1x4x4xf32>
    %43 = vector.shape_cast %42 : vector<1x4x4xf32> to vector<4x4xf32>
    %c0_57 = arith.constant 0 : index
    %c0_58 = arith.constant 0 : index
    %44 = vector.load %arg9[%c0_57, %c0_58] : memref<4x288xf32, #tpu.memory_space<vmem>>, vector<4x288xf32>
    %c0_59 = arith.constant 0 : index
    %c0_60 = arith.constant 0 : index
    %c0_61 = arith.constant 0 : index
    %c19 = arith.constant 19 : index
    %45 = vector.load %arg3[%c0_59, %c0_60, %c0_61, %c19] : memref<1x4x1x324xf32, #tpu.memory_space<vmem>>, vector<1x4x1x288xf32>
    %46 = vector.shape_cast %45 : vector<1x4x1x288xf32> to vector<4x288xf32>
    %cst_62 = arith.constant dense<0.000000e+00> : vector<4x288xf32>
    %47 = tpu.matmul %43, %46, %cst_62 {dimension_numbers = #tpu.dot_dimension_numbers<[1], [0], [0], [1], [0, 0, 1, 1], [], []>} : vector<4x4xf32>, vector<4x288xf32>, vector<4x288xf32> -> vector<4x288xf32>
    %48 = arith.addf %44, %47 : vector<4x288xf32>
    %c0_63 = arith.constant 0 : index
    %c0_64 = arith.constant 0 : index
    %49 = vector.load %arg9[%c0_63, %c0_64] : memref<4x288xf32, #tpu.memory_space<vmem>>, vector<4x288xf32>
    tpu.vector_store %arg9[%c0_63, %c0_64], %48 {strides = array<i32>} : memref<4x288xf32, #tpu.memory_space<vmem>>, vector<4x288xf32>,
    %c6 = arith.constant 6 : index
    %c0_65 = arith.constant 0 : index
    %c0_66 = arith.constant 0 : index
    %50 = vector.load %arg4[%c6, %c0_65, %c0_66] : memref<9x4x4xf32, #tpu.memory_space<vmem>>, vector<1x4x4xf32>
    %51 = vector.shape_cast %50 : vector<1x4x4xf32> to vector<4x4xf32>
    %c0_67 = arith.constant 0 : index
    %c0_68 = arith.constant 0 : index
    %52 = vector.load %arg9[%c0_67, %c0_68] : memref<4x288xf32, #tpu.memory_space<vmem>>, vector<4x288xf32>
    %c0_69 = arith.constant 0 : index
    %c0_70 = arith.constant 0 : index
    %c0_71 = arith.constant 0 : index
    %c35 = arith.constant 35 : index
    %53 = vector.load %arg3[%c0_69, %c0_70, %c0_71, %c35] : memref<1x4x1x324xf32, #tpu.memory_space<vmem>>, vector<1x4x1x288xf32>
    %54 = vector.shape_cast %53 : vector<1x4x1x288xf32> to vector<4x288xf32>
    %cst_72 = arith.constant dense<0.000000e+00> : vector<4x288xf32>
    %55 = tpu.matmul %51, %54, %cst_72 {dimension_numbers = #tpu.dot_dimension_numbers<[1], [0], [0], [1], [0, 0, 1, 1], [], []>} : vector<4x4xf32>, vector<4x288xf32>, vector<4x288xf32> -> vector<4x288xf32>
    %56 = arith.addf %52, %55 : vector<4x288xf32>
    %c0_73 = arith.constant 0 : index
    %c0_74 = arith.constant 0 : index
    %57 = vector.load %arg9[%c0_73, %c0_74] : memref<4x288xf32, #tpu.memory_space<vmem>>, vector<4x288xf32>
    tpu.vector_store %arg9[%c0_73, %c0_74], %56 {strides = array<i32>} : memref<4x288xf32, #tpu.memory_space<vmem>>, vector<4x288xf32>,
    %c7 = arith.constant 7 : index
    %c0_75 = arith.constant 0 : index
    %c0_76 = arith.constant 0 : index
    %58 = vector.load %arg4[%c7, %c0_75, %c0_76] : memref<9x4x4xf32, #tpu.memory_space<vmem>>, vector<1x4x4xf32>
    %59 = vector.shape_cast %58 : vector<1x4x4xf32> to vector<4x4xf32>
    %c0_77 = arith.constant 0 : index
    %c0_78 = arith.constant 0 : index
    %60 = vector.load %arg9[%c0_77, %c0_78] : memref<4x288xf32, #tpu.memory_space<vmem>>, vector<4x288xf32>
    %c0_79 = arith.constant 0 : index
    %c0_80 = arith.constant 0 : index
    %c0_81 = arith.constant 0 : index
    %c36 = arith.constant 36 : index
    %61 = vector.load %arg3[%c0_79, %c0_80, %c0_81, %c36] : memref<1x4x1x324xf32, #tpu.memory_space<vmem>>, vector<1x4x1x288xf32>
    %62 = vector.shape_cast %61 : vector<1x4x1x288xf32> to vector<4x288xf32>
    %cst_82 = arith.constant dense<0.000000e+00> : vector<4x288xf32>
    %63 = tpu.matmul %59, %62, %cst_82 {dimension_numbers = #tpu.dot_dimension_numbers<[1], [0], [0], [1], [0, 0, 1, 1], [], []>} : vector<4x4xf32>, vector<4x288xf32>, vector<4x288xf32> -> vector<4x288xf32>
    %64 = arith.addf %60, %63 : vector<4x288xf32>
    %c0_83 = arith.constant 0 : index
    %c0_84 = arith.constant 0 : index
    %65 = vector.load %arg9[%c0_83, %c0_84] : memref<4x288xf32, #tpu.memory_space<vmem>>, vector<4x288xf32>
    tpu.vector_store %arg9[%c0_83, %c0_84], %64 {strides = array<i32>} : memref<4x288xf32, #tpu.memory_space<vmem>>, vector<4x288xf32>,
    %c8 = arith.constant 8 : index
    %c0_85 = arith.constant 0 : index
    %c0_86 = arith.constant 0 : index
    %66 = vector.load %arg4[%c8, %c0_85, %c0_86] : memref<9x4x4xf32, #tpu.memory_space<vmem>>, vector<1x4x4xf32>
    %67 = vector.shape_cast %66 : vector<1x4x4xf32> to vector<4x4xf32>
    %c0_87 = arith.constant 0 : index
    %c0_88 = arith.constant 0 : index
    %68 = vector.load %arg9[%c0_87, %c0_88] : memref<4x288xf32, #tpu.memory_space<vmem>>, vector<4x287xf32>
    %c0_89 = arith.constant 0 : index
    %c0_90 = arith.constant 0 : index
    %c0_91 = arith.constant 0 : index
    %c37 = arith.constant 37 : index
    %69 = vector.load %arg3[%c0_89, %c0_90, %c0_91, %c37] : memref<1x4x1x324xf32, #tpu.memory_space<vmem>>, vector<1x4x1x287xf32>
    %70 = vector.shape_cast %69 : vector<1x4x1x287xf32> to vector<4x287xf32>
    %cst_92 = arith.constant dense<0.000000e+00> : vector<4x287xf32>
    %71 = tpu.matmul %67, %70, %cst_92 {dimension_numbers = #tpu.dot_dimension_numbers<[1], [0], [0], [1], [0, 0, 1, 1], [], []>} : vector<4x4xf32>, vector<4x287xf32>, vector<4x287xf32> -> vector<4x287xf32>
    %72 = arith.addf %68, %71 : vector<4x287xf32>
    %c0_93 = arith.constant 0 : index
    %c0_94 = arith.constant 0 : index
    %73 = vector.load %arg9[%c0_93, %c0_94] : memref<4x288xf32, #tpu.memory_space<vmem>>, vector<4x287xf32>
    tpu.vector_store %arg9[%c0_93, %c0_94], %72 {strides = array<i32>} : memref<4x288xf32, #tpu.memory_space<vmem>>, vector<4x287xf32>,
    %c0_95 = arith.constant 0 : index
    %c0_96 = arith.constant 0 : index
    %74 = vector.load %arg9[%c0_95, %c0_96] : memref<4x288xf32, #tpu.memory_space<vmem>>, vector<4x288xf32>
    %c0_97 = arith.constant 0 : index
    %c0_98 = arith.constant 0 : index
    %75 = vector.load %arg5[%c0_97, %c0_98] : memref<4x1xf32, #tpu.memory_space<vmem>>, vector<4x1xf32>
    %76 = vector.broadcast %75 : vector<4x1xf32> to vector<4x288xf32>
    %77 = arith.mulf %74, %76 : vector<4x288xf32>
    %c0_99 = arith.constant 0 : index
    %c0_100 = arith.constant 0 : index
    %78 = vector.load %arg6[%c0_99, %c0_100] : memref<4x1xf32, #tpu.memory_space<vmem>>, vector<4x1xf32>
    %79 = vector.broadcast %78 : vector<4x1xf32> to vector<4x288xf32>
    %80 = arith.addf %77, %79 : vector<4x288xf32>
    %cst_101 = arith.constant 0.000000e+00 : f32
    %81 = vector.broadcast %cst_101 : f32 to vector<4x288xf32>
    %82 = arith.maximumf %80, %81 : vector<4x288xf32>
    %c0_102 = arith.constant 0 : index
    %c0_103 = arith.constant 0 : index
    %c0_104 = arith.constant 0 : index
    %83 = vector.load %arg7[%c0_102, %c0_103, %c0_104] : memref<1x1x288xf32, #tpu.memory_space<vmem>>, vector<1x1x288xf32>
    %84 = vector.shape_cast %83 : vector<1x1x288xf32> to vector<1x288xf32>
    %85 = vector.broadcast %84 : vector<1x288xf32> to vector<4x288xf32>
    %86 = arith.mulf %82, %85 : vector<4x288xf32>
    %c0_105 = arith.constant 0 : index
    %c0_106 = arith.constant 0 : index
    %c0_107 = arith.constant 0 : index
    %c0_108 = arith.constant 0 : index
    %87 = vector.load %arg8[%c0_105, %c0_106, %c0_107, %c0_108] : memref<1x4x1x288xf32, #tpu.memory_space<vmem>>, vector<1x4x1x288xf32>
    %88 = vector.shape_cast %87 : vector<1x4x1x288xf32> to vector<4x288xf32>
    %89 = vector.shape_cast %86 : vector<4x288xf32> to vector<1x4x1x288xf32>
    tpu.vector_store %arg8[%c0_105, %c0_106, %c0_107, %c0_108], %89 {strides = array<i32>} : memref<1x4x1x288xf32, #tpu.memory_space<vmem>>, vector<1x4x1x288xf32>,
    return
  }
  func.func @transform_0(%arg0: i32, %arg1: i32, %arg2: i32) -> (i32, i32, i32, i32) {
    %c0_i32 = arith.constant 0 : i32
    %c0_i32_0 = arith.constant 0 : i32
    %c0_i32_1 = arith.constant 0 : i32
    return %arg0, %c0_i32, %arg1, %c0_i32_0 : i32, i32, i32, i32
  }
  func.func @transform_1(%arg0: i32, %arg1: i32, %arg2: i32) -> (i32, i32, i32) {
    %c0_i32 = arith.constant 0 : i32
    %c0_i32_0 = arith.constant 0 : i32
    %c0_i32_1 = arith.constant 0 : i32
    return %c0_i32, %arg2, %c0_i32_0 : i32, i32, i32
  }
  func.func @transform_2(%arg0: i32, %arg1: i32, %arg2: i32) -> (i32, i32) {
    %c0_i32 = arith.constant 0 : i32
    %c0_i32_0 = arith.constant 0 : i32
    return %arg2, %c0_i32 : i32, i32
  }
  func.func @transform_3(%arg0: i32, %arg1: i32, %arg2: i32) -> (i32, i32) {
    %c0_i32 = arith.constant 0 : i32
    %c0_i32_0 = arith.constant 0 : i32
    return %arg2, %c0_i32 : i32, i32
  }
  func.func @transform_4(%arg0: i32, %arg1: i32, %arg2: i32) -> (i32, i32, i32) {
    %c0_i32 = arith.constant 0 : i32
    %c0_i32_0 = arith.constant 0 : i32
    %c0_i32_1 = arith.constant 0 : i32
    return %arg1, %c0_i32, %c0_i32_0 : i32, i32, i32
  }
  func.func @transform_5(%arg0: i32, %arg1: i32, %arg2: i32) -> (i32, i32, i32, i32) {
    %c0_i32 = arith.constant 0 : i32
    %c0_i32_0 = arith.constant 0 : i32
    return %arg0, %arg2, %arg1, %c0_i32 : i32, i32, i32, i32
  }
}

module attributes {stable_mosaic.version = 11 : i64} {
  func.func @_conv3x3_kernel(%arg0: i32, %arg1: i32, %arg2: i32, %arg3: memref<1x2x1x360xf32, #tpu.memory_space<vmem>>, %arg4: memref<1x2x1x360xf32, #tpu.memory_space<vmem>>, %arg5: memref<9x4x2xf32, #tpu.memory_space<vmem>>, %arg6: memref<9x4x2xf32, #tpu.memory_space<vmem>>, %arg7: memref<4x1xf32, #tpu.memory_space<vmem>>, %arg8: memref<4x1xf32, #tpu.memory_space<vmem>>, %arg9: memref<1x1x324xf32, #tpu.memory_space<vmem>>, %arg10: memref<1x4x1x324xf32, #tpu.memory_space<vmem>>, %arg11: memref<4x324xf32, #tpu.memory_space<vmem>>) attributes {dimension_semantics = [#tpu.dimension_semantics<parallel>, #tpu.dimension_semantics<parallel>, #tpu.dimension_semantics<parallel>], iteration_bounds = array<i64: 2, 1, 1>, scalar_prefetch = 0 : i64, scratch_operands = 1 : i64, tpu.core_type = #tpu.core_type<tc>, window_params = [{transform_indices = @transform_0, window_bounds = array<i64: 1, 2, 1, 360>}, {transform_indices = @transform_1, window_bounds = array<i64: 1, 2, 1, 360>}, {transform_indices = @transform_2, window_bounds = array<i64: 9, 4, 2>}, {transform_indices = @transform_3, window_bounds = array<i64: 9, 4, 2>}, {transform_indices = @transform_4, window_bounds = array<i64: 4, 1>}, {transform_indices = @transform_5, window_bounds = array<i64: 4, 1>}, {transform_indices = @transform_6, window_bounds = array<i64: 1, 1, 324>}, {transform_indices = @transform_7, window_bounds = array<i64: 1, 4, 1, 324>}]} {
    %cst = arith.constant 0.000000e+00 : f32
    %0 = vector.broadcast %cst : f32 to vector<4x324xf32>
    %c0 = arith.constant 0 : index
    %c0_0 = arith.constant 0 : index
    %1 = vector.load %arg11[%c0, %c0_0] : memref<4x324xf32, #tpu.memory_space<vmem>>, vector<4x324xf32>
    tpu.vector_store %arg11[%c0, %c0_0], %0 {strides = array<i32>} : memref<4x324xf32, #tpu.memory_space<vmem>>, vector<4x324xf32>,
    %c0_1 = arith.constant 0 : index
    %c0_2 = arith.constant 0 : index
    %c0_3 = arith.constant 0 : index
    %2 = vector.load %arg5[%c0_1, %c0_2, %c0_3] : memref<9x4x2xf32, #tpu.memory_space<vmem>>, vector<1x4x2xf32>
    %3 = vector.shape_cast %2 : vector<1x4x2xf32> to vector<4x2xf32>
    %c0_4 = arith.constant 0 : index
    %c1 = arith.constant 1 : index
    %4 = vector.load %arg11[%c0_4, %c1] : memref<4x324xf32, #tpu.memory_space<vmem>>, vector<4x323xf32>
    %c0_5 = arith.constant 0 : index
    %c0_6 = arith.constant 0 : index
    %c0_7 = arith.constant 0 : index
    %c0_8 = arith.constant 0 : index
    %5 = vector.load %arg3[%c0_5, %c0_6, %c0_7, %c0_8] : memref<1x2x1x360xf32, #tpu.memory_space<vmem>>, vector<1x2x1x323xf32>
    %6 = vector.shape_cast %5 : vector<1x2x1x323xf32> to vector<2x323xf32>
    %cst_9 = arith.constant dense<0.000000e+00> : vector<4x323xf32>
    %7 = tpu.matmul %3, %6, %cst_9 {dimension_numbers = #tpu.dot_dimension_numbers<[1], [0], [0], [1], [0, 0, 1, 1], [], []>} : vector<4x2xf32>, vector<2x323xf32>, vector<4x323xf32> -> vector<4x323xf32>
    %8 = arith.addf %4, %7 : vector<4x323xf32>
    %c0_10 = arith.constant 0 : index
    %c1_11 = arith.constant 1 : index
    %9 = vector.load %arg11[%c0_10, %c1_11] : memref<4x324xf32, #tpu.memory_space<vmem>>, vector<4x323xf32>
    tpu.vector_store %arg11[%c0_10, %c1_11], %8 {strides = array<i32>} : memref<4x324xf32, #tpu.memory_space<vmem>>, vector<4x323xf32>,
    %c1_12 = arith.constant 1 : index
    %c0_13 = arith.constant 0 : index
    %c0_14 = arith.constant 0 : index
    %10 = vector.load %arg5[%c1_12, %c0_13, %c0_14] : memref<9x4x2xf32, #tpu.memory_space<vmem>>, vector<1x4x2xf32>
    %11 = vector.shape_cast %10 : vector<1x4x2xf32> to vector<4x2xf32>
    %c0_15 = arith.constant 0 : index
    %c0_16 = arith.constant 0 : index
    %12 = vector.load %arg11[%c0_15, %c0_16] : memref<4x324xf32, #tpu.memory_space<vmem>>, vector<4x324xf32>
    %c0_17 = arith.constant 0 : index
    %c0_18 = arith.constant 0 : index
    %c0_19 = arith.constant 0 : index
    %c0_20 = arith.constant 0 : index
    %13 = vector.load %arg3[%c0_17, %c0_18, %c0_19, %c0_20] : memref<1x2x1x360xf32, #tpu.memory_space<vmem>>, vector<1x2x1x324xf32>
    %14 = vector.shape_cast %13 : vector<1x2x1x324xf32> to vector<2x324xf32>
    %cst_21 = arith.constant dense<0.000000e+00> : vector<4x324xf32>
    %15 = tpu.matmul %11, %14, %cst_21 {dimension_numbers = #tpu.dot_dimension_numbers<[1], [0], [0], [1], [0, 0, 1, 1], [], []>} : vector<4x2xf32>, vector<2x324xf32>, vector<4x324xf32> -> vector<4x324xf32>
    %16 = arith.addf %12, %15 : vector<4x324xf32>
    %c0_22 = arith.constant 0 : index
    %c0_23 = arith.constant 0 : index
    %17 = vector.load %arg11[%c0_22, %c0_23] : memref<4x324xf32, #tpu.memory_space<vmem>>, vector<4x324xf32>
    tpu.vector_store %arg11[%c0_22, %c0_23], %16 {strides = array<i32>} : memref<4x324xf32, #tpu.memory_space<vmem>>, vector<4x324xf32>,
    %c2 = arith.constant 2 : index
    %c0_24 = arith.constant 0 : index
    %c0_25 = arith.constant 0 : index
    %18 = vector.load %arg5[%c2, %c0_24, %c0_25] : memref<9x4x2xf32, #tpu.memory_space<vmem>>, vector<1x4x2xf32>
    %19 = vector.shape_cast %18 : vector<1x4x2xf32> to vector<4x2xf32>
    %c0_26 = arith.constant 0 : index
    %c0_27 = arith.constant 0 : index
    %20 = vector.load %arg11[%c0_26, %c0_27] : memref<4x324xf32, #tpu.memory_space<vmem>>, vector<4x324xf32>
    %c0_28 = arith.constant 0 : index
    %c0_29 = arith.constant 0 : index
    %c0_30 = arith.constant 0 : index
    %c1_31 = arith.constant 1 : index
    %21 = vector.load %arg3[%c0_28, %c0_29, %c0_30, %c1_31] : memref<1x2x1x360xf32, #tpu.memory_space<vmem>>, vector<1x2x1x324xf32>
    %22 = vector.shape_cast %21 : vector<1x2x1x324xf32> to vector<2x324xf32>
    %cst_32 = arith.constant dense<0.000000e+00> : vector<4x324xf32>
    %23 = tpu.matmul %19, %22, %cst_32 {dimension_numbers = #tpu.dot_dimension_numbers<[1], [0], [0], [1], [0, 0, 1, 1], [], []>} : vector<4x2xf32>, vector<2x324xf32>, vector<4x324xf32> -> vector<4x324xf32>
    %24 = arith.addf %20, %23 : vector<4x324xf32>
    %c0_33 = arith.constant 0 : index
    %c0_34 = arith.constant 0 : index
    %25 = vector.load %arg11[%c0_33, %c0_34] : memref<4x324xf32, #tpu.memory_space<vmem>>, vector<4x324xf32>
    tpu.vector_store %arg11[%c0_33, %c0_34], %24 {strides = array<i32>} : memref<4x324xf32, #tpu.memory_space<vmem>>, vector<4x324xf32>,
    %c3 = arith.constant 3 : index
    %c0_35 = arith.constant 0 : index
    %c0_36 = arith.constant 0 : index
    %26 = vector.load %arg5[%c3, %c0_35, %c0_36] : memref<9x4x2xf32, #tpu.memory_space<vmem>>, vector<1x4x2xf32>
    %27 = vector.shape_cast %26 : vector<1x4x2xf32> to vector<4x2xf32>
    %c0_37 = arith.constant 0 : index
    %c0_38 = arith.constant 0 : index
    %28 = vector.load %arg11[%c0_37, %c0_38] : memref<4x324xf32, #tpu.memory_space<vmem>>, vector<4x324xf32>
    %c0_39 = arith.constant 0 : index
    %c0_40 = arith.constant 0 : index
    %c0_41 = arith.constant 0 : index
    %c17 = arith.constant 17 : index
    %29 = vector.load %arg3[%c0_39, %c0_40, %c0_41, %c17] : memref<1x2x1x360xf32, #tpu.memory_space<vmem>>, vector<1x2x1x324xf32>
    %30 = vector.shape_cast %29 : vector<1x2x1x324xf32> to vector<2x324xf32>
    %cst_42 = arith.constant dense<0.000000e+00> : vector<4x324xf32>
    %31 = tpu.matmul %27, %30, %cst_42 {dimension_numbers = #tpu.dot_dimension_numbers<[1], [0], [0], [1], [0, 0, 1, 1], [], []>} : vector<4x2xf32>, vector<2x324xf32>, vector<4x324xf32> -> vector<4x324xf32>
    %32 = arith.addf %28, %31 : vector<4x324xf32>
    %c0_43 = arith.constant 0 : index
    %c0_44 = arith.constant 0 : index
    %33 = vector.load %arg11[%c0_43, %c0_44] : memref<4x324xf32, #tpu.memory_space<vmem>>, vector<4x324xf32>
    tpu.vector_store %arg11[%c0_43, %c0_44], %32 {strides = array<i32>} : memref<4x324xf32, #tpu.memory_space<vmem>>, vector<4x324xf32>,
    %c4 = arith.constant 4 : index
    %c0_45 = arith.constant 0 : index
    %c0_46 = arith.constant 0 : index
    %34 = vector.load %arg5[%c4, %c0_45, %c0_46] : memref<9x4x2xf32, #tpu.memory_space<vmem>>, vector<1x4x2xf32>
    %35 = vector.shape_cast %34 : vector<1x4x2xf32> to vector<4x2xf32>
    %c0_47 = arith.constant 0 : index
    %c0_48 = arith.constant 0 : index
    %36 = vector.load %arg11[%c0_47, %c0_48] : memref<4x324xf32, #tpu.memory_space<vmem>>, vector<4x324xf32>
    %c0_49 = arith.constant 0 : index
    %c0_50 = arith.constant 0 : index
    %c0_51 = arith.constant 0 : index
    %c18 = arith.constant 18 : index
    %37 = vector.load %arg3[%c0_49, %c0_50, %c0_51, %c18] : memref<1x2x1x360xf32, #tpu.memory_space<vmem>>, vector<1x2x1x324xf32>
    %38 = vector.shape_cast %37 : vector<1x2x1x324xf32> to vector<2x324xf32>
    %cst_52 = arith.constant dense<0.000000e+00> : vector<4x324xf32>
    %39 = tpu.matmul %35, %38, %cst_52 {dimension_numbers = #tpu.dot_dimension_numbers<[1], [0], [0], [1], [0, 0, 1, 1], [], []>} : vector<4x2xf32>, vector<2x324xf32>, vector<4x324xf32> -> vector<4x324xf32>
    %40 = arith.addf %36, %39 : vector<4x324xf32>
    %c0_53 = arith.constant 0 : index
    %c0_54 = arith.constant 0 : index
    %41 = vector.load %arg11[%c0_53, %c0_54] : memref<4x324xf32, #tpu.memory_space<vmem>>, vector<4x324xf32>
    tpu.vector_store %arg11[%c0_53, %c0_54], %40 {strides = array<i32>} : memref<4x324xf32, #tpu.memory_space<vmem>>, vector<4x324xf32>,
    %c5 = arith.constant 5 : index
    %c0_55 = arith.constant 0 : index
    %c0_56 = arith.constant 0 : index
    %42 = vector.load %arg5[%c5, %c0_55, %c0_56] : memref<9x4x2xf32, #tpu.memory_space<vmem>>, vector<1x4x2xf32>
    %43 = vector.shape_cast %42 : vector<1x4x2xf32> to vector<4x2xf32>
    %c0_57 = arith.constant 0 : index
    %c0_58 = arith.constant 0 : index
    %44 = vector.load %arg11[%c0_57, %c0_58] : memref<4x324xf32, #tpu.memory_space<vmem>>, vector<4x324xf32>
    %c0_59 = arith.constant 0 : index
    %c0_60 = arith.constant 0 : index
    %c0_61 = arith.constant 0 : index
    %c19 = arith.constant 19 : index
    %45 = vector.load %arg3[%c0_59, %c0_60, %c0_61, %c19] : memref<1x2x1x360xf32, #tpu.memory_space<vmem>>, vector<1x2x1x324xf32>
    %46 = vector.shape_cast %45 : vector<1x2x1x324xf32> to vector<2x324xf32>
    %cst_62 = arith.constant dense<0.000000e+00> : vector<4x324xf32>
    %47 = tpu.matmul %43, %46, %cst_62 {dimension_numbers = #tpu.dot_dimension_numbers<[1], [0], [0], [1], [0, 0, 1, 1], [], []>} : vector<4x2xf32>, vector<2x324xf32>, vector<4x324xf32> -> vector<4x324xf32>
    %48 = arith.addf %44, %47 : vector<4x324xf32>
    %c0_63 = arith.constant 0 : index
    %c0_64 = arith.constant 0 : index
    %49 = vector.load %arg11[%c0_63, %c0_64] : memref<4x324xf32, #tpu.memory_space<vmem>>, vector<4x324xf32>
    tpu.vector_store %arg11[%c0_63, %c0_64], %48 {strides = array<i32>} : memref<4x324xf32, #tpu.memory_space<vmem>>, vector<4x324xf32>,
    %c6 = arith.constant 6 : index
    %c0_65 = arith.constant 0 : index
    %c0_66 = arith.constant 0 : index
    %50 = vector.load %arg5[%c6, %c0_65, %c0_66] : memref<9x4x2xf32, #tpu.memory_space<vmem>>, vector<1x4x2xf32>
    %51 = vector.shape_cast %50 : vector<1x4x2xf32> to vector<4x2xf32>
    %c0_67 = arith.constant 0 : index
    %c0_68 = arith.constant 0 : index
    %52 = vector.load %arg11[%c0_67, %c0_68] : memref<4x324xf32, #tpu.memory_space<vmem>>, vector<4x324xf32>
    %c0_69 = arith.constant 0 : index
    %c0_70 = arith.constant 0 : index
    %c0_71 = arith.constant 0 : index
    %c35 = arith.constant 35 : index
    %53 = vector.load %arg3[%c0_69, %c0_70, %c0_71, %c35] : memref<1x2x1x360xf32, #tpu.memory_space<vmem>>, vector<1x2x1x324xf32>
    %54 = vector.shape_cast %53 : vector<1x2x1x324xf32> to vector<2x324xf32>
    %cst_72 = arith.constant dense<0.000000e+00> : vector<4x324xf32>
    %55 = tpu.matmul %51, %54, %cst_72 {dimension_numbers = #tpu.dot_dimension_numbers<[1], [0], [0], [1], [0, 0, 1, 1], [], []>} : vector<4x2xf32>, vector<2x324xf32>, vector<4x324xf32> -> vector<4x324xf32>
    %56 = arith.addf %52, %55 : vector<4x324xf32>
    %c0_73 = arith.constant 0 : index
    %c0_74 = arith.constant 0 : index
    %57 = vector.load %arg11[%c0_73, %c0_74] : memref<4x324xf32, #tpu.memory_space<vmem>>, vector<4x324xf32>
    tpu.vector_store %arg11[%c0_73, %c0_74], %56 {strides = array<i32>} : memref<4x324xf32, #tpu.memory_space<vmem>>, vector<4x324xf32>,
    %c7 = arith.constant 7 : index
    %c0_75 = arith.constant 0 : index
    %c0_76 = arith.constant 0 : index
    %58 = vector.load %arg5[%c7, %c0_75, %c0_76] : memref<9x4x2xf32, #tpu.memory_space<vmem>>, vector<1x4x2xf32>
    %59 = vector.shape_cast %58 : vector<1x4x2xf32> to vector<4x2xf32>
    %c0_77 = arith.constant 0 : index
    %c0_78 = arith.constant 0 : index
    %60 = vector.load %arg11[%c0_77, %c0_78] : memref<4x324xf32, #tpu.memory_space<vmem>>, vector<4x324xf32>
    %c0_79 = arith.constant 0 : index
    %c0_80 = arith.constant 0 : index
    %c0_81 = arith.constant 0 : index
    %c36 = arith.constant 36 : index
    %61 = vector.load %arg3[%c0_79, %c0_80, %c0_81, %c36] : memref<1x2x1x360xf32, #tpu.memory_space<vmem>>, vector<1x2x1x324xf32>
    %62 = vector.shape_cast %61 : vector<1x2x1x324xf32> to vector<2x324xf32>
    %cst_82 = arith.constant dense<0.000000e+00> : vector<4x324xf32>
    %63 = tpu.matmul %59, %62, %cst_82 {dimension_numbers = #tpu.dot_dimension_numbers<[1], [0], [0], [1], [0, 0, 1, 1], [], []>} : vector<4x2xf32>, vector<2x324xf32>, vector<4x324xf32> -> vector<4x324xf32>
    %64 = arith.addf %60, %63 : vector<4x324xf32>
    %c0_83 = arith.constant 0 : index
    %c0_84 = arith.constant 0 : index
    %65 = vector.load %arg11[%c0_83, %c0_84] : memref<4x324xf32, #tpu.memory_space<vmem>>, vector<4x324xf32>
    tpu.vector_store %arg11[%c0_83, %c0_84], %64 {strides = array<i32>} : memref<4x324xf32, #tpu.memory_space<vmem>>, vector<4x324xf32>,
    %c8 = arith.constant 8 : index
    %c0_85 = arith.constant 0 : index
    %c0_86 = arith.constant 0 : index
    %66 = vector.load %arg5[%c8, %c0_85, %c0_86] : memref<9x4x2xf32, #tpu.memory_space<vmem>>, vector<1x4x2xf32>
    %67 = vector.shape_cast %66 : vector<1x4x2xf32> to vector<4x2xf32>
    %c0_87 = arith.constant 0 : index
    %c0_88 = arith.constant 0 : index
    %68 = vector.load %arg11[%c0_87, %c0_88] : memref<4x324xf32, #tpu.memory_space<vmem>>, vector<4x323xf32>
    %c0_89 = arith.constant 0 : index
    %c0_90 = arith.constant 0 : index
    %c0_91 = arith.constant 0 : index
    %c37 = arith.constant 37 : index
    %69 = vector.load %arg3[%c0_89, %c0_90, %c0_91, %c37] : memref<1x2x1x360xf32, #tpu.memory_space<vmem>>, vector<1x2x1x323xf32>
    %70 = vector.shape_cast %69 : vector<1x2x1x323xf32> to vector<2x323xf32>
    %cst_92 = arith.constant dense<0.000000e+00> : vector<4x323xf32>
    %71 = tpu.matmul %67, %70, %cst_92 {dimension_numbers = #tpu.dot_dimension_numbers<[1], [0], [0], [1], [0, 0, 1, 1], [], []>} : vector<4x2xf32>, vector<2x323xf32>, vector<4x323xf32> -> vector<4x323xf32>
    %72 = arith.addf %68, %71 : vector<4x323xf32>
    %c0_93 = arith.constant 0 : index
    %c0_94 = arith.constant 0 : index
    %73 = vector.load %arg11[%c0_93, %c0_94] : memref<4x324xf32, #tpu.memory_space<vmem>>, vector<4x323xf32>
    tpu.vector_store %arg11[%c0_93, %c0_94], %72 {strides = array<i32>} : memref<4x324xf32, #tpu.memory_space<vmem>>, vector<4x323xf32>,
    %c0_95 = arith.constant 0 : index
    %c0_96 = arith.constant 0 : index
    %c0_97 = arith.constant 0 : index
    %74 = vector.load %arg6[%c0_95, %c0_96, %c0_97] : memref<9x4x2xf32, #tpu.memory_space<vmem>>, vector<1x4x2xf32>
    %75 = vector.shape_cast %74 : vector<1x4x2xf32> to vector<4x2xf32>
    %c0_98 = arith.constant 0 : index
    %c1_99 = arith.constant 1 : index
    %76 = vector.load %arg11[%c0_98, %c1_99] : memref<4x324xf32, #tpu.memory_space<vmem>>, vector<4x323xf32>
    %c0_100 = arith.constant 0 : index
    %c0_101 = arith.constant 0 : index
    %c0_102 = arith.constant 0 : index
    %c0_103 = arith.constant 0 : index
    %77 = vector.load %arg4[%c0_100, %c0_101, %c0_102, %c0_103] : memref<1x2x1x360xf32, #tpu.memory_space<vmem>>, vector<1x2x1x323xf32>
    %78 = vector.shape_cast %77 : vector<1x2x1x323xf32> to vector<2x323xf32>
    %cst_104 = arith.constant dense<0.000000e+00> : vector<4x323xf32>
    %79 = tpu.matmul %75, %78, %cst_104 {dimension_numbers = #tpu.dot_dimension_numbers<[1], [0], [0], [1], [0, 0, 1, 1], [], []>} : vector<4x2xf32>, vector<2x323xf32>, vector<4x323xf32> -> vector<4x323xf32>
    %80 = arith.addf %76, %79 : vector<4x323xf32>
    %c0_105 = arith.constant 0 : index
    %c1_106 = arith.constant 1 : index
    %81 = vector.load %arg11[%c0_105, %c1_106] : memref<4x324xf32, #tpu.memory_space<vmem>>, vector<4x323xf32>
    tpu.vector_store %arg11[%c0_105, %c1_106], %80 {strides = array<i32>} : memref<4x324xf32, #tpu.memory_space<vmem>>, vector<4x323xf32>,
    %c1_107 = arith.constant 1 : index
    %c0_108 = arith.constant 0 : index
    %c0_109 = arith.constant 0 : index
    %82 = vector.load %arg6[%c1_107, %c0_108, %c0_109] : memref<9x4x2xf32, #tpu.memory_space<vmem>>, vector<1x4x2xf32>
    %83 = vector.shape_cast %82 : vector<1x4x2xf32> to vector<4x2xf32>
    %c0_110 = arith.constant 0 : index
    %c0_111 = arith.constant 0 : index
    %84 = vector.load %arg11[%c0_110, %c0_111] : memref<4x324xf32, #tpu.memory_space<vmem>>, vector<4x324xf32>
    %c0_112 = arith.constant 0 : index
    %c0_113 = arith.constant 0 : index
    %c0_114 = arith.constant 0 : index
    %c0_115 = arith.constant 0 : index
    %85 = vector.load %arg4[%c0_112, %c0_113, %c0_114, %c0_115] : memref<1x2x1x360xf32, #tpu.memory_space<vmem>>, vector<1x2x1x324xf32>
    %86 = vector.shape_cast %85 : vector<1x2x1x324xf32> to vector<2x324xf32>
    %cst_116 = arith.constant dense<0.000000e+00> : vector<4x324xf32>
    %87 = tpu.matmul %83, %86, %cst_116 {dimension_numbers = #tpu.dot_dimension_numbers<[1], [0], [0], [1], [0, 0, 1, 1], [], []>} : vector<4x2xf32>, vector<2x324xf32>, vector<4x324xf32> -> vector<4x324xf32>
    %88 = arith.addf %84, %87 : vector<4x324xf32>
    %c0_117 = arith.constant 0 : index
    %c0_118 = arith.constant 0 : index
    %89 = vector.load %arg11[%c0_117, %c0_118] : memref<4x324xf32, #tpu.memory_space<vmem>>, vector<4x324xf32>
    tpu.vector_store %arg11[%c0_117, %c0_118], %88 {strides = array<i32>} : memref<4x324xf32, #tpu.memory_space<vmem>>, vector<4x324xf32>,
    %c2_119 = arith.constant 2 : index
    %c0_120 = arith.constant 0 : index
    %c0_121 = arith.constant 0 : index
    %90 = vector.load %arg6[%c2_119, %c0_120, %c0_121] : memref<9x4x2xf32, #tpu.memory_space<vmem>>, vector<1x4x2xf32>
    %91 = vector.shape_cast %90 : vector<1x4x2xf32> to vector<4x2xf32>
    %c0_122 = arith.constant 0 : index
    %c0_123 = arith.constant 0 : index
    %92 = vector.load %arg11[%c0_122, %c0_123] : memref<4x324xf32, #tpu.memory_space<vmem>>, vector<4x324xf32>
    %c0_124 = arith.constant 0 : index
    %c0_125 = arith.constant 0 : index
    %c0_126 = arith.constant 0 : index
    %c1_127 = arith.constant 1 : index
    %93 = vector.load %arg4[%c0_124, %c0_125, %c0_126, %c1_127] : memref<1x2x1x360xf32, #tpu.memory_space<vmem>>, vector<1x2x1x324xf32>
    %94 = vector.shape_cast %93 : vector<1x2x1x324xf32> to vector<2x324xf32>
    %cst_128 = arith.constant dense<0.000000e+00> : vector<4x324xf32>
    %95 = tpu.matmul %91, %94, %cst_128 {dimension_numbers = #tpu.dot_dimension_numbers<[1], [0], [0], [1], [0, 0, 1, 1], [], []>} : vector<4x2xf32>, vector<2x324xf32>, vector<4x324xf32> -> vector<4x324xf32>
    %96 = arith.addf %92, %95 : vector<4x324xf32>
    %c0_129 = arith.constant 0 : index
    %c0_130 = arith.constant 0 : index
    %97 = vector.load %arg11[%c0_129, %c0_130] : memref<4x324xf32, #tpu.memory_space<vmem>>, vector<4x324xf32>
    tpu.vector_store %arg11[%c0_129, %c0_130], %96 {strides = array<i32>} : memref<4x324xf32, #tpu.memory_space<vmem>>, vector<4x324xf32>,
    %c3_131 = arith.constant 3 : index
    %c0_132 = arith.constant 0 : index
    %c0_133 = arith.constant 0 : index
    %98 = vector.load %arg6[%c3_131, %c0_132, %c0_133] : memref<9x4x2xf32, #tpu.memory_space<vmem>>, vector<1x4x2xf32>
    %99 = vector.shape_cast %98 : vector<1x4x2xf32> to vector<4x2xf32>
    %c0_134 = arith.constant 0 : index
    %c0_135 = arith.constant 0 : index
    %100 = vector.load %arg11[%c0_134, %c0_135] : memref<4x324xf32, #tpu.memory_space<vmem>>, vector<4x324xf32>
    %c0_136 = arith.constant 0 : index
    %c0_137 = arith.constant 0 : index
    %c0_138 = arith.constant 0 : index
    %c17_139 = arith.constant 17 : index
    %101 = vector.load %arg4[%c0_136, %c0_137, %c0_138, %c17_139] : memref<1x2x1x360xf32, #tpu.memory_space<vmem>>, vector<1x2x1x324xf32>
    %102 = vector.shape_cast %101 : vector<1x2x1x324xf32> to vector<2x324xf32>
    %cst_140 = arith.constant dense<0.000000e+00> : vector<4x324xf32>
    %103 = tpu.matmul %99, %102, %cst_140 {dimension_numbers = #tpu.dot_dimension_numbers<[1], [0], [0], [1], [0, 0, 1, 1], [], []>} : vector<4x2xf32>, vector<2x324xf32>, vector<4x324xf32> -> vector<4x324xf32>
    %104 = arith.addf %100, %103 : vector<4x324xf32>
    %c0_141 = arith.constant 0 : index
    %c0_142 = arith.constant 0 : index
    %105 = vector.load %arg11[%c0_141, %c0_142] : memref<4x324xf32, #tpu.memory_space<vmem>>, vector<4x324xf32>
    tpu.vector_store %arg11[%c0_141, %c0_142], %104 {strides = array<i32>} : memref<4x324xf32, #tpu.memory_space<vmem>>, vector<4x324xf32>,
    %c4_143 = arith.constant 4 : index
    %c0_144 = arith.constant 0 : index
    %c0_145 = arith.constant 0 : index
    %106 = vector.load %arg6[%c4_143, %c0_144, %c0_145] : memref<9x4x2xf32, #tpu.memory_space<vmem>>, vector<1x4x2xf32>
    %107 = vector.shape_cast %106 : vector<1x4x2xf32> to vector<4x2xf32>
    %c0_146 = arith.constant 0 : index
    %c0_147 = arith.constant 0 : index
    %108 = vector.load %arg11[%c0_146, %c0_147] : memref<4x324xf32, #tpu.memory_space<vmem>>, vector<4x324xf32>
    %c0_148 = arith.constant 0 : index
    %c0_149 = arith.constant 0 : index
    %c0_150 = arith.constant 0 : index
    %c18_151 = arith.constant 18 : index
    %109 = vector.load %arg4[%c0_148, %c0_149, %c0_150, %c18_151] : memref<1x2x1x360xf32, #tpu.memory_space<vmem>>, vector<1x2x1x324xf32>
    %110 = vector.shape_cast %109 : vector<1x2x1x324xf32> to vector<2x324xf32>
    %cst_152 = arith.constant dense<0.000000e+00> : vector<4x324xf32>
    %111 = tpu.matmul %107, %110, %cst_152 {dimension_numbers = #tpu.dot_dimension_numbers<[1], [0], [0], [1], [0, 0, 1, 1], [], []>} : vector<4x2xf32>, vector<2x324xf32>, vector<4x324xf32> -> vector<4x324xf32>
    %112 = arith.addf %108, %111 : vector<4x324xf32>
    %c0_153 = arith.constant 0 : index
    %c0_154 = arith.constant 0 : index
    %113 = vector.load %arg11[%c0_153, %c0_154] : memref<4x324xf32, #tpu.memory_space<vmem>>, vector<4x324xf32>
    tpu.vector_store %arg11[%c0_153, %c0_154], %112 {strides = array<i32>} : memref<4x324xf32, #tpu.memory_space<vmem>>, vector<4x324xf32>,
    %c5_155 = arith.constant 5 : index
    %c0_156 = arith.constant 0 : index
    %c0_157 = arith.constant 0 : index
    %114 = vector.load %arg6[%c5_155, %c0_156, %c0_157] : memref<9x4x2xf32, #tpu.memory_space<vmem>>, vector<1x4x2xf32>
    %115 = vector.shape_cast %114 : vector<1x4x2xf32> to vector<4x2xf32>
    %c0_158 = arith.constant 0 : index
    %c0_159 = arith.constant 0 : index
    %116 = vector.load %arg11[%c0_158, %c0_159] : memref<4x324xf32, #tpu.memory_space<vmem>>, vector<4x324xf32>
    %c0_160 = arith.constant 0 : index
    %c0_161 = arith.constant 0 : index
    %c0_162 = arith.constant 0 : index
    %c19_163 = arith.constant 19 : index
    %117 = vector.load %arg4[%c0_160, %c0_161, %c0_162, %c19_163] : memref<1x2x1x360xf32, #tpu.memory_space<vmem>>, vector<1x2x1x324xf32>
    %118 = vector.shape_cast %117 : vector<1x2x1x324xf32> to vector<2x324xf32>
    %cst_164 = arith.constant dense<0.000000e+00> : vector<4x324xf32>
    %119 = tpu.matmul %115, %118, %cst_164 {dimension_numbers = #tpu.dot_dimension_numbers<[1], [0], [0], [1], [0, 0, 1, 1], [], []>} : vector<4x2xf32>, vector<2x324xf32>, vector<4x324xf32> -> vector<4x324xf32>
    %120 = arith.addf %116, %119 : vector<4x324xf32>
    %c0_165 = arith.constant 0 : index
    %c0_166 = arith.constant 0 : index
    %121 = vector.load %arg11[%c0_165, %c0_166] : memref<4x324xf32, #tpu.memory_space<vmem>>, vector<4x324xf32>
    tpu.vector_store %arg11[%c0_165, %c0_166], %120 {strides = array<i32>} : memref<4x324xf32, #tpu.memory_space<vmem>>, vector<4x324xf32>,
    %c6_167 = arith.constant 6 : index
    %c0_168 = arith.constant 0 : index
    %c0_169 = arith.constant 0 : index
    %122 = vector.load %arg6[%c6_167, %c0_168, %c0_169] : memref<9x4x2xf32, #tpu.memory_space<vmem>>, vector<1x4x2xf32>
    %123 = vector.shape_cast %122 : vector<1x4x2xf32> to vector<4x2xf32>
    %c0_170 = arith.constant 0 : index
    %c0_171 = arith.constant 0 : index
    %124 = vector.load %arg11[%c0_170, %c0_171] : memref<4x324xf32, #tpu.memory_space<vmem>>, vector<4x324xf32>
    %c0_172 = arith.constant 0 : index
    %c0_173 = arith.constant 0 : index
    %c0_174 = arith.constant 0 : index
    %c35_175 = arith.constant 35 : index
    %125 = vector.load %arg4[%c0_172, %c0_173, %c0_174, %c35_175] : memref<1x2x1x360xf32, #tpu.memory_space<vmem>>, vector<1x2x1x324xf32>
    %126 = vector.shape_cast %125 : vector<1x2x1x324xf32> to vector<2x324xf32>
    %cst_176 = arith.constant dense<0.000000e+00> : vector<4x324xf32>
    %127 = tpu.matmul %123, %126, %cst_176 {dimension_numbers = #tpu.dot_dimension_numbers<[1], [0], [0], [1], [0, 0, 1, 1], [], []>} : vector<4x2xf32>, vector<2x324xf32>, vector<4x324xf32> -> vector<4x324xf32>
    %128 = arith.addf %124, %127 : vector<4x324xf32>
    %c0_177 = arith.constant 0 : index
    %c0_178 = arith.constant 0 : index
    %129 = vector.load %arg11[%c0_177, %c0_178] : memref<4x324xf32, #tpu.memory_space<vmem>>, vector<4x324xf32>
    tpu.vector_store %arg11[%c0_177, %c0_178], %128 {strides = array<i32>} : memref<4x324xf32, #tpu.memory_space<vmem>>, vector<4x324xf32>,
    %c7_179 = arith.constant 7 : index
    %c0_180 = arith.constant 0 : index
    %c0_181 = arith.constant 0 : index
    %130 = vector.load %arg6[%c7_179, %c0_180, %c0_181] : memref<9x4x2xf32, #tpu.memory_space<vmem>>, vector<1x4x2xf32>
    %131 = vector.shape_cast %130 : vector<1x4x2xf32> to vector<4x2xf32>
    %c0_182 = arith.constant 0 : index
    %c0_183 = arith.constant 0 : index
    %132 = vector.load %arg11[%c0_182, %c0_183] : memref<4x324xf32, #tpu.memory_space<vmem>>, vector<4x324xf32>
    %c0_184 = arith.constant 0 : index
    %c0_185 = arith.constant 0 : index
    %c0_186 = arith.constant 0 : index
    %c36_187 = arith.constant 36 : index
    %133 = vector.load %arg4[%c0_184, %c0_185, %c0_186, %c36_187] : memref<1x2x1x360xf32, #tpu.memory_space<vmem>>, vector<1x2x1x324xf32>
    %134 = vector.shape_cast %133 : vector<1x2x1x324xf32> to vector<2x324xf32>
    %cst_188 = arith.constant dense<0.000000e+00> : vector<4x324xf32>
    %135 = tpu.matmul %131, %134, %cst_188 {dimension_numbers = #tpu.dot_dimension_numbers<[1], [0], [0], [1], [0, 0, 1, 1], [], []>} : vector<4x2xf32>, vector<2x324xf32>, vector<4x324xf32> -> vector<4x324xf32>
    %136 = arith.addf %132, %135 : vector<4x324xf32>
    %c0_189 = arith.constant 0 : index
    %c0_190 = arith.constant 0 : index
    %137 = vector.load %arg11[%c0_189, %c0_190] : memref<4x324xf32, #tpu.memory_space<vmem>>, vector<4x324xf32>
    tpu.vector_store %arg11[%c0_189, %c0_190], %136 {strides = array<i32>} : memref<4x324xf32, #tpu.memory_space<vmem>>, vector<4x324xf32>,
    %c8_191 = arith.constant 8 : index
    %c0_192 = arith.constant 0 : index
    %c0_193 = arith.constant 0 : index
    %138 = vector.load %arg6[%c8_191, %c0_192, %c0_193] : memref<9x4x2xf32, #tpu.memory_space<vmem>>, vector<1x4x2xf32>
    %139 = vector.shape_cast %138 : vector<1x4x2xf32> to vector<4x2xf32>
    %c0_194 = arith.constant 0 : index
    %c0_195 = arith.constant 0 : index
    %140 = vector.load %arg11[%c0_194, %c0_195] : memref<4x324xf32, #tpu.memory_space<vmem>>, vector<4x323xf32>
    %c0_196 = arith.constant 0 : index
    %c0_197 = arith.constant 0 : index
    %c0_198 = arith.constant 0 : index
    %c37_199 = arith.constant 37 : index
    %141 = vector.load %arg4[%c0_196, %c0_197, %c0_198, %c37_199] : memref<1x2x1x360xf32, #tpu.memory_space<vmem>>, vector<1x2x1x323xf32>
    %142 = vector.shape_cast %141 : vector<1x2x1x323xf32> to vector<2x323xf32>
    %cst_200 = arith.constant dense<0.000000e+00> : vector<4x323xf32>
    %143 = tpu.matmul %139, %142, %cst_200 {dimension_numbers = #tpu.dot_dimension_numbers<[1], [0], [0], [1], [0, 0, 1, 1], [], []>} : vector<4x2xf32>, vector<2x323xf32>, vector<4x323xf32> -> vector<4x323xf32>
    %144 = arith.addf %140, %143 : vector<4x323xf32>
    %c0_201 = arith.constant 0 : index
    %c0_202 = arith.constant 0 : index
    %145 = vector.load %arg11[%c0_201, %c0_202] : memref<4x324xf32, #tpu.memory_space<vmem>>, vector<4x323xf32>
    tpu.vector_store %arg11[%c0_201, %c0_202], %144 {strides = array<i32>} : memref<4x324xf32, #tpu.memory_space<vmem>>, vector<4x323xf32>,
    %c0_203 = arith.constant 0 : index
    %c0_204 = arith.constant 0 : index
    %146 = vector.load %arg11[%c0_203, %c0_204] : memref<4x324xf32, #tpu.memory_space<vmem>>, vector<4x324xf32>
    %c0_205 = arith.constant 0 : index
    %c0_206 = arith.constant 0 : index
    %147 = vector.load %arg7[%c0_205, %c0_206] : memref<4x1xf32, #tpu.memory_space<vmem>>, vector<4x1xf32>
    %148 = vector.broadcast %147 : vector<4x1xf32> to vector<4x324xf32>
    %149 = arith.mulf %146, %148 : vector<4x324xf32>
    %c0_207 = arith.constant 0 : index
    %c0_208 = arith.constant 0 : index
    %150 = vector.load %arg8[%c0_207, %c0_208] : memref<4x1xf32, #tpu.memory_space<vmem>>, vector<4x1xf32>
    %151 = vector.broadcast %150 : vector<4x1xf32> to vector<4x324xf32>
    %152 = arith.addf %149, %151 : vector<4x324xf32>
    %cst_209 = arith.constant 0.000000e+00 : f32
    %153 = vector.broadcast %cst_209 : f32 to vector<4x324xf32>
    %154 = arith.maximumf %152, %153 : vector<4x324xf32>
    %c0_210 = arith.constant 0 : index
    %c0_211 = arith.constant 0 : index
    %c0_212 = arith.constant 0 : index
    %155 = vector.load %arg9[%c0_210, %c0_211, %c0_212] : memref<1x1x324xf32, #tpu.memory_space<vmem>>, vector<1x1x324xf32>
    %156 = vector.shape_cast %155 : vector<1x1x324xf32> to vector<1x324xf32>
    %157 = vector.broadcast %156 : vector<1x324xf32> to vector<4x324xf32>
    %158 = arith.mulf %154, %157 : vector<4x324xf32>
    %c0_213 = arith.constant 0 : index
    %c0_214 = arith.constant 0 : index
    %c0_215 = arith.constant 0 : index
    %c0_216 = arith.constant 0 : index
    %159 = vector.load %arg10[%c0_213, %c0_214, %c0_215, %c0_216] : memref<1x4x1x324xf32, #tpu.memory_space<vmem>>, vector<1x4x1x324xf32>
    %160 = vector.shape_cast %159 : vector<1x4x1x324xf32> to vector<4x324xf32>
    %161 = vector.shape_cast %158 : vector<4x324xf32> to vector<1x4x1x324xf32>
    tpu.vector_store %arg10[%c0_213, %c0_214, %c0_215, %c0_216], %161 {strides = array<i32>} : memref<1x4x1x324xf32, #tpu.memory_space<vmem>>, vector<1x4x1x324xf32>,
    return
  }
  func.func @transform_0(%arg0: i32, %arg1: i32, %arg2: i32) -> (i32, i32, i32, i32) {
    %c0_i32 = arith.constant 0 : i32
    %c0_i32_0 = arith.constant 0 : i32
    %c0_i32_1 = arith.constant 0 : i32
    return %arg0, %c0_i32, %arg1, %c0_i32_0 : i32, i32, i32, i32
  }
  func.func @transform_1(%arg0: i32, %arg1: i32, %arg2: i32) -> (i32, i32, i32, i32) {
    %c0_i32 = arith.constant 0 : i32
    %c0_i32_0 = arith.constant 0 : i32
    %c0_i32_1 = arith.constant 0 : i32
    return %arg0, %c0_i32, %arg1, %c0_i32_0 : i32, i32, i32, i32
  }
  func.func @transform_2(%arg0: i32, %arg1: i32, %arg2: i32) -> (i32, i32, i32) {
    %c0_i32 = arith.constant 0 : i32
    %c0_i32_0 = arith.constant 0 : i32
    %c0_i32_1 = arith.constant 0 : i32
    return %c0_i32, %arg2, %c0_i32_0 : i32, i32, i32
  }
  func.func @transform_3(%arg0: i32, %arg1: i32, %arg2: i32) -> (i32, i32, i32) {
    %c0_i32 = arith.constant 0 : i32
    %c0_i32_0 = arith.constant 0 : i32
    %c0_i32_1 = arith.constant 0 : i32
    return %c0_i32, %arg2, %c0_i32_0 : i32, i32, i32
  }
  func.func @transform_4(%arg0: i32, %arg1: i32, %arg2: i32) -> (i32, i32) {
    %c0_i32 = arith.constant 0 : i32
    %c0_i32_0 = arith.constant 0 : i32
    return %arg2, %c0_i32 : i32, i32
  }
  func.func @transform_5(%arg0: i32, %arg1: i32, %arg2: i32) -> (i32, i32) {
    %c0_i32 = arith.constant 0 : i32
    %c0_i32_0 = arith.constant 0 : i32
    return %arg2, %c0_i32 : i32, i32
  }
  func.func @transform_6(%arg0: i32, %arg1: i32, %arg2: i32) -> (i32, i32, i32) {
    %c0_i32 = arith.constant 0 : i32
    %c0_i32_0 = arith.constant 0 : i32
    %c0_i32_1 = arith.constant 0 : i32
    return %arg1, %c0_i32, %c0_i32_0 : i32, i32, i32
  }
  func.func @transform_7(%arg0: i32, %arg1: i32, %arg2: i32) -> (i32, i32, i32, i32) {
    %c0_i32 = arith.constant 0 : i32
    %c0_i32_0 = arith.constant 0 : i32
    return %arg0, %arg2, %arg1, %c0_i32 : i32, i32, i32, i32
  }
}

</mosaic_0001>

<bundles_post_ra>
// kernel: tile.6
= control target key start
LH: loop header
LB: loop body
LE: loop exit
PB: predicated region body
PF: predicated region fallthrough
CT: control target
= control target key end

     0   :  { %s22_s0 = inlined_call_operand.vmem [shape: f32[2], index: 0, kind: input, shape index: {}]   ;;  %s23_s1 = inlined_call_operand.vmem [shape: f32[4,2], index: 1, kind: output, shape index: {}]  }
   0x1   :  { %v4_v0 = vld [vmem:[%s22_s0] ss:$0 sm:$0xff] }
   0x2   :  { %5 = vst [vmem:[%s23_s1] sm:$0xf] %v4_v0 }

// kernel: tile.0
= control target key start
LH: loop header
LB: loop body
LE: loop exit
PB: predicated region body
PF: predicated region fallthrough
CT: control target
= control target key end

     0   :  { %vm7_vm0 = vcmask 7168   ;;  %s37_s0 = inlined_call_operand.vmem [shape: f32[4,2], index: 0, kind: input, shape index: {}]   ;;  %s38_s1 = inlined_call_operand.vmem [shape: f32[8,1], index: 1, kind: output, shape index: {}]  }
   0x1   :  { %v4_v0 = vld [vmem:[%s37_s0] sm:$0xf]  ;;  %s17_s0 = smov 127  }
   0x2   :  { %5 = vst [vmem:[#allocation0] sm:$0xf] %v4_v0 }
   0x9   :  { %v9_v1 = vld [vmem:[#allocation0] sm:$0xf]  }
   0xa   :  { %v6_v2 = vld [vmem:[#allocation0] sm:$0xf]   ;;  %10 = vrot.lane.b32.xlu0 %v9_v1, %s17_s0 }
   0xb   :  { %8 = vst.msk [vmem:[%s38_s1] ss:$2 sm:$0xf] %vm7_vm0, %v6_v2  }
  0x7c   :  { %v11_v3 = vpop.permute.xlu0 %10  }
  0x7d   :  { %15 = vst.msk [vmem:[%s38_s1 + $0x1] ss:$2 sm:$0xf] %vm7_vm0, %v11_v3  }

// kernel: a_call__.3
= control target key start
LH: loop header
LB: loop body
LE: loop exit
PB: predicated region body
PF: predicated region fallthrough
CT: control target
= control target key end

     0   :  { %s452_s12 = smov 0   ;;  %s454_s13 = smov 0   ;;  %s491_s0 = inlined_call_operand.vmem [shape: f32[2,2,64], index: 0, kind: input, shape index: {}]   ;;  %s492_s1 = inlined_call_operand.vmem [shape: f32[8,2], index: 1, kind: input, shape index: {}]   ;;  %s493_s2 = inlined_call_operand.vmem [shape: f32[8,1], index: 2, kind: input, shape index: {}]   ;;  %s494_s3 = inlined_call_operand.vmem [shape: f32[2,8,64], index: 3, kind: output, shape index: {}]  }
   0x1   :  { %s456_s14 = smov 0  }
   0x2 LB: > { %s25_s15 = sadd.s32 1, %s423_s13  ;;  %p363_p0 = scmp.ge.s32.totalorder %s427_s14, 1  ;;  %s427_s14 = sphi %s456_s14, %s13_s14   ;;  %s423_s13 = sphi %s454_s13, %s496_s13   ;;  %s419_s12 = sphi %s452_s12, %s495_s12  }
   0x3   : > { %p27_p1 = scmp.ge.s32.totalorder %s25_s15, 2  ;;  %p155_p2 = scmp.lt.s32.totalorder %s427_s14, 3 }
   0x5   : > { %s498_s15 = smov (%p27_p1, %s25_s15), 0  ;;  %p156_p3 = pnand %p363_p0, %p155_p2 }
   0x6   : > { %p183_p4 = scmp.lt.s32.totalorder (!%p156_p3), %s419_s12, 1  ;;  %v429_v0 = vmov (!%p156_p3), 0.0   ;;  %vm430_vm0 = vmmov (!%p156_p3), 0   ;;  %v199_v1 = vld [vmem:[%s493_s2] sm:$0xff] (!%p156_p3)  ;;  %v431_v2 = vmov (!%p156_p3), 0   ;;  %vm209_vm1 = vcmask (!%p156_p3), 1041408  }
   0x7   : > { %159 = sbr.rel (%p156_p3) target bundleno = 234 (0xea), region = 32  ;;  %372 = vmatprep.subr.mxu0 (!%p156_p3), %v429_v0  ;;  %374 = vmatprep.mubr.msk.f32.mxu0 (!%p156_p3), %vm430_vm0, %v429_v0  ;;  %v197_v3 = vld [vmem:[%s492_s1] sm:$0xff] (!%p156_p3)  ;;  %vm205_vm2 = vcmask (!%p156_p3), 15360   ;;  %vm283_vm3 = vcmask (!%p156_p3), 523264  }
   0x8   : > { %404 = vset.pattern.permute.xlu0 (!%p156_p3), %v431_v2 }
   0x9   : > { %202 = vperm.xlu0 (!%p156_p3), %404, %v199_v1  }
   0xe   : > { %s500_s12 = smov (!%p183_p4, %s419_s12), 1 }
   0xf   : > { %s364_s18 = sshll.u32 %s500_s12, 1  ;;  %s365_s24 = sshll.u32 %s500_s12, 3 }
  0x10   : > { %s189_s21 = scalar_lea.vmem %s491_s0, %s364_s18  ;;  %s196_s27 = scalar_lea.vmem %s494_s3, %s365_s24 }
  0x11   : > { %v198_v4 = vld [vmem:[%s189_s21] sm:$0x3] }
  0x12   : > { %373 = vmatpush3.msk.msra.mxu0 %vm209_vm1, %v198_v4 }
  0x13   : > { %375 = vmatmul.mubr.msk.f32.vlgmr.msra.gmra.mrb[0].mxu0 %vm205_vm2, %v197_v3 }
  0x88   : > { %v203_v5 = vpop.permute.xlu0 %202 }
  0xe6   : > { %v279_v6 = vpop.f32.mrb[0].mxu0 }
  0xe7   : > { %v280_v7 = vadd.f32 %v279_v6, %v203_v5  ;;  %v376_v8 = vpop.f32.mrb[1].mxu0 }
  0xe9   : > { %284 = vst.msk [vmem:[%s196_s27] sm:$0xff] %vm283_vm3, %v280_v7 }
  0xea PF: > { %s13_s14 = sadd.s32 1, %s427_s14   ;;  %s495_s12 = smov %s423_s13 }
  0xeb   : > { %p10_p5 = scmp.ge.s32.totalorder %s13_s14, 4   ;;  %s496_s13 = smov %s498_s15 }
  0xed   :  { %12 = sbr.rel (!%p10_p5) target bundleno = 2 (0x2), region = 62 }

// kernel: a_call__.5
= control target key start
LH: loop header
LB: loop body
LE: loop exit
PB: predicated region body
PF: predicated region fallthrough
CT: control target
= control target key end

     0   :  { %s2751_s18 = smov 0   ;;  %s2753_s19 = smov 0   ;;  %s3008_s0 = inlined_call_operand.vmem [shape: f32[2,4,1,324], index: 0, kind: input, shape index: {}]   ;;  %s3009_s1 = inlined_call_operand.vmem [shape: f32[9,4,4], index: 1, kind: input, shape index: {}]   ;;  %s3010_s2 = inlined_call_operand.vmem [shape: f32[4,1], index: 2, kind: input, shape index: {}]   ;;  %s3011_s3 = inlined_call_operand.vmem [shape: f32[4,1], index: 3, kind: input, shape index: {}]   ;;  %s3012_s4 = inlined_call_operand.vmem [shape: f32[1,1,288], index: 4, kind: input, shape index: {}]   ;;  %s3013_s5 = inlined_call_operand.vmem [shape: f32[2,4,1,288], index: 5, kind: output, shape index: {}]  }
   0x1   :  { %s2755_s20 = smov 0  }
   0x2 LB: > { %s34_s21 = sadd.s32 1, %s2702_s19  ;;  %p2525_p0 = scmp.ge.s32.totalorder %s2706_s20, 1  ;;  %s2706_s20 = sphi %s2755_s20, %s15_s20   ;;  %s2702_s19 = sphi %s2753_s19, %s3015_s19   ;;  %s2698_s18 = sphi %s2751_s18, %s3014_s18  }
   0x3   : > { %p36_p1 = scmp.ge.s32.totalorder %s34_s21, 2  ;;  %p251_p2 = scmp.lt.s32.totalorder %s2706_s20, 3 }
   0x5   : > { %s3017_s21 = smov (%p36_p1, %s34_s21), 0  ;;  %p252_p3 = pnand %p2525_p0, %p251_p2 }
   0x6   : > { %p306_p4 = scmp.lt.s32.totalorder (!%p252_p3), %s2698_s18, 1  ;;  %v363_v0 = vlaneseq (!%p252_p3)  ;;  %v2708_v1 = vmov (!%p252_p3), 1966171168   ;;  %v2709_v3 = vmov (!%p252_p3), 0.0   ;;  %vm2710_vm0 = vmmov (!%p252_p3), 0   ;;  %s2711_s28 = smov (!%p252_p3), 127  }
   0x7   : > { %255 = sbr.rel (%p252_p3) target bundleno = 470 (0x1d6), region = 40  ;;  %v361_v2 = vunpack.c.l.s4 (!%p252_p3), %v2708_v1  ;;  %466 = vmatprep.mubr.f32.mxu0 (!%p252_p3), %v2709_v3  ;;  %344 = vst [vmem:[#allocation2] sm:$0xff] (!%p252_p3), %v2709_v3  ;;  %2599 = vmatprep.subr.mxu1 (!%p252_p3), %v2709_v3  ;;  %vm395_vm1 = vcmask (!%p252_p3), 1043456   ;;  %vm391_vm2 = vcmask (!%p252_p3), 31744   ;;  %v347_v49 = vld [vmem:[%s3009_s1] sm:$0xf] (!%p252_p3) }
   0x8   : > { %v2775_v4 = vshrl.u32 (!%p252_p3), %v363_v0, 7  ;;  %2601 = vmatprep.mubr.msk.f32.mxu1 (!%p252_p3), %vm2710_vm0, %v2709_v3  ;;  %s2712_s29 = smov (!%p252_p3), 111   ;;  %s2713_s30 = smov (!%p252_p3), 110   ;;  %vm818_vm3 = vcmask (!%p252_p3), 1039360   ;;  %vm1030_vm4 = vcmask (!%p252_p3), 908288   ;;  %vm1242_vm5 = vcmask (!%p252_p3), 900096  }
   0x9   : > { %v362_v5 = vunpack.c.0.s8 (!%p252_p3), %v361_v2  ;;  %s2714_s8 = smov (!%p252_p3), 109   ;;  %s2715_s9 = smov (!%p252_p3), 93   ;;  %vm1454_vm6 = vcmask (!%p252_p3), 891904   ;;  %vm1666_vm7 = vcmask (!%p252_p3), 760832   ;;  %vm1878_vm8 = vcmask (!%p252_p3), 752640  }
   0xa   : > { %s2716_s10 = smov (!%p252_p3), 92   ;;  %s2717_s11 = smov (!%p252_p3), 91   ;;  %vm2090_vm9 = vcmask (!%p252_p3), 744448   ;;  %vm345_vm10 = vcmask (!%p252_p3), 257024   ;;  %vm552_vm11 = vcmask (!%p252_p3), 7168   ;;  %vm559_vm12 = vcmask (!%p252_p3), 1043464  }
   0xb   : > { %v2788_v6 = vsub.s32 (!%p252_p3), %v362_v5, %v2775_v4  ;;  %346 = vst.msk [vmem:[#allocation2 + $0x8] sm:$0xf] (!%p252_p3), %vm345_vm10, %v2709_v3  ;;  %s2719_s6 = smov (!%p252_p3), 1   ;;  %vm560_vm13 = vcmask (!%p252_p3), 1047556   ;;  %vm2250_vm15 = vcmask (!%p252_p3), 248832  }
   0xc   : > { %vm561_vm14 = vmor (!%p252_p3), %vm560_vm13, %vm559_vm12 }
   0xe   : > { %s3019_s18 = smov (!%p306_p4, %s2698_s18), 1 }
   0xf   : > { %s2644_s22 = smul.u32 12, %s3019_s18 }
  0x11   : > { %s2785_s25 = scalar_lea.vmem %s3008_s0, %s2644_s22  ;;  %s342_s15 = scalar_lea.vmem %s3013_s5, %s2644_s22 }
  0x12   : > { %v350_v7 = vld [vmem:[%s2785_s25] sm:$0x7]  ;;  %v351_v8 = vld [vmem:[%s2785_s25 + $0x3] sm:$0x7]  ;;  %v352_v9 = vld [vmem:[%s2785_s25 + $0x6] sm:$0x7] }
  0x13   : > { %v353_v10 = vld [vmem:[%s2785_s25 + $0x9] sm:$0x7]  ;;  %v358_v11 = vcombine.low %v350_v7, %v351_v8  ;;  %v771_v12 = vld [vmem:[%s2785_s25] sm:$0x7]  ;;  %v772_v13 = vld [vmem:[%s2785_s25 + $0x3] sm:$0x7] }
  0x14   : > { %v359_v14 = vcombine.low %v352_v9, %v353_v10  ;;  %v773_v15 = vld [vmem:[%s2785_s25 + $0x6] sm:$0x7]  ;;  %v774_v16 = vld [vmem:[%s2785_s25 + $0x9] sm:$0x7]  ;;  %v779_v17 = vcombine.low %v771_v12, %v772_v13  ;;  %v983_v18 = vld [vmem:[%s2785_s25] sm:$0x7] }
  0x15   : > { %v366_v19 = vrot.slane %v358_v11, %v2788_v6  ;;  %v780_v20 = vcombine.low %v773_v15, %v774_v16  ;;  %v984_v21 = vld [vmem:[%s2785_s25 + $0x3] sm:$0x7]  ;;  %v985_v22 = vld [vmem:[%s2785_s25 + $0x6] sm:$0x7]  ;;  %v986_v23 = vld [vmem:[%s2785_s25 + $0x9] sm:$0x7] }
  0x16   : > { %v373_v24 = vrot.slane %v359_v14, %v2788_v6  ;;  %v787_v25 = vrot.slane %v779_v17, %v2788_v6  ;;  %v991_v26 = vcombine.low %v983_v18, %v984_v21  ;;  %v992_v27 = vcombine.low %v985_v22, %v986_v23  ;;  %v1195_v28 = vld [vmem:[%s2785_s25] sm:$0x7]  ;;  %v1196_v29 = vld [vmem:[%s2785_s25 + $0x3] sm:$0x7]  ;;  %v1197_v30 = vld [vmem:[%s2785_s25 + $0x6] sm:$0x7] }
  0x17   : > { %v794_v31 = vrot.slane %v780_v20, %v2788_v6  ;;  %v1198_v32 = vld [vmem:[%s2785_s25 + $0x9] sm:$0x7]  ;;  %v1203_v33 = vcombine.low %v1195_v28, %v1196_v29  ;;  %v1407_v41 = vld [vmem:[%s2785_s25] sm:$0x7]  ;;  %v1408_v42 = vld [vmem:[%s2785_s25 + $0x3] sm:$0x7] }
  0x18   : > { %v375_v34 = vcombine.high %v366_v19, %v373_v24  ;;  %v374_v35 = vcombine.low %v366_v19, %v373_v24  ;;  %v999_v36 = vrot.slane %v991_v26, %v2788_v6  ;;  %v1006_v37 = vrot.slane %v992_v27, %v2788_v6  ;;  %v1409_v47 = vld [vmem:[%s2785_s25 + $0x6] sm:$0x7]  ;;  %v1410_v48 = vld [vmem:[%s2785_s25 + $0x9] sm:$0x7]  ;;  %v1619_v61 = vld [vmem:[%s2785_s25] sm:$0x7] }
  0x19   : > { %v796_v38 = vcombine.high %v787_v25, %v794_v31  ;;  %v795_v39 = vcombine.low %v787_v25, %v794_v31  ;;  %v1204_v40 = vcombine.low %v1197_v30, %v1198_v32  ;;  %v1211_v46 = vrot.slane %v1203_v33, %v2788_v6  ;;  %v1620_v62 = vld [vmem:[%s2785_s25 + $0x3] sm:$0x7]  ;;  %v1621_v63 = vld [vmem:[%s2785_s25 + $0x6] sm:$0x7]  ;;  %v1622_v1 = vld [vmem:[%s2785_s25 + $0x9] sm:$0x7] }
  0x1a   : > { %v389_v43 = vrot.slane %v375_v34, %v2788_v6  ;;  %v382_v44 = vrot.slane %v374_v35, %v2788_v6  ;;  %v1007_v45 = vcombine.low %v999_v36, %v1006_v37  ;;  %v1008_v52 = vcombine.high %v999_v36, %v1006_v37  ;;  %v568_v2 = vld [vmem:[%s2785_s25] sm:$0x7]  ;;  %v569_v5 = vld [vmem:[%s2785_s25 + $0x3] sm:$0x7]  ;;  %v570_v11 = vld [vmem:[%s2785_s25 + $0x6] sm:$0x7] }
  0x1b   : > { %v810_v50 = vrot.slane %v796_v38, %v2788_v6  ;;  %v803_v51 = vrot.slane %v795_v39, %v2788_v6  ;;  %v1218_v53 = vrot.slane %v1204_v40, %v2788_v6  ;;  %v1415_v55 = vcombine.low %v1407_v41, %v1408_v42  ;;  %v571_v12 = vld [vmem:[%s2785_s25 + $0x9] sm:$0x7]  ;;  %v1831_v20 = vld [vmem:[%s2785_s25] sm:$0x7]  ;;  %v1832_v21 = vld [vmem:[%s2785_s25 + $0x3] sm:$0x7] }
  0x1c   : > { %2526 = vmatprep.subr.msk.mxu0 %vm395_vm1, %v389_v43  ;;  %v390_v54 = vcombine.high %v382_v44, %v382_v44  ;;  %v1015_v57 = vrot.slane %v1007_v45, %v2788_v6  ;;  %v1416_v58 = vcombine.low %v1409_v47, %v1410_v48  ;;  %v1022_v59 = vrot.slane %v1008_v52, %v2788_v6  ;;  %v1833_v23 = vld [vmem:[%s2785_s25 + $0x6] sm:$0x7]  ;;  %v1834_v24 = vld [vmem:[%s2785_s25 + $0x9] sm:$0x7]  ;;  %v2043_v39 = vld [vmem:[%s2785_s25] sm:$0x7] }
  0x1d   : > { %2527 = vmatpush1.msk.msra.mxu0 %vm395_vm1, %v382_v44  ;;  %814 = vrot.lane.b32.xlu0 %v810_v50, %s2711_s28  ;;  %v811_v56 = vcombine.high %v803_v51, %v803_v51  ;;  %v1219_v60 = vcombine.low %v1211_v46, %v1218_v53  ;;  %v1220_v8 = vcombine.high %v1211_v46, %v1218_v53  ;;  %v2531_v40 = vld [vmem:[%s3009_s1 + $0x4] sm:$0xf]  ;;  %v2046_v44 = vld [vmem:[%s2785_s25 + $0x9] sm:$0x7] }
  0x1e   : > { %2528 = vmatmul.mubr.msk.f32.vlgmr.msra.gmra.mrb[0].mxu0 %vm391_vm2, %v347_v49  ;;  %2600 = vmatpush3.msk.msra.mxu1 %vm395_vm1, %v390_v54  ;;  %v1023_v7 = vcombine.high %v1015_v57, %v1015_v57  ;;  %v1423_v9 = vrot.slane %v1415_v55, %v2788_v6  ;;  %v1430_v10 = vrot.slane %v1416_v58, %v2788_v6  ;;  %v2044_v42 = vld [vmem:[%s2785_s25 + $0x3] sm:$0x7]  ;;  %v2045_v43 = vld [vmem:[%s2785_s25 + $0x6] sm:$0x7] }
  0x1f   : > { %2602 = vmatmul.mubr.msk.f32.vlgmr.msra.gmra.mrb[0].mxu1 %vm391_vm2, %v347_v49  ;;  %812 = vrot.lane.b32.xlu1 %v803_v51, %s2711_s28  ;;  %v1227_v13 = vrot.slane %v1219_v60, %v2788_v6  ;;  %v1627_v14 = vcombine.low %v1619_v61, %v1620_v62  ;;  %v1628_v15 = vcombine.low %v1621_v63, %v1622_v1 }
  0x20   : > { %682 = vmatprep.mubr.f32.mxu0 %v2709_v3  ;;  %2604 = vmatprep.subr.mxu1 %v2709_v3  ;;  %v576_v16 = vcombine.low %v568_v2, %v569_v5  ;;  %v577_v17 = vcombine.low %v570_v11, %v571_v12  ;;  %v1234_v18 = vrot.slane %v1220_v8, %v2788_v6  ;;  %v2718_v5 = vmov 0   ;;  %v2537_v12 = vld [vmem:[%s3009_s1 + $0x8] sm:$0xf] }
  0x21   : > { %816 = vrot.lane.b32.xlu0 %v811_v56, %s2711_s28  ;;  %2606 = vmatprep.mubr.msk.f32.mxu1 %vm2710_vm0, %v2709_v3  ;;  %v1431_v19 = vcombine.low %v1423_v9, %v1430_v10  ;;  %v1235_v26 = vcombine.high %v1227_v13, %v1227_v13  ;;  %v1432_v27 = vcombine.high %v1423_v9, %v1430_v10 }
  0x22   : > { %v584_v22 = vrot.slane %v576_v16, %v2788_v6  ;;  %v591_v25 = vrot.slane %v577_v17, %v2788_v6  ;;  %v1635_v28 = vrot.slane %v1627_v14, %v2788_v6  ;;  %v1642_v29 = vrot.slane %v1628_v15, %v2788_v6  ;;  %2682 = vset.pattern.permute.xlu1 %v2718_v5  ;;  %v2543_v16 = vld [vmem:[%s3009_s1 + $0xc] sm:$0xf] }
  0x23   : > { %1026 = vrot.lane.b32.xlu1 %v1022_v59, %s2712_s29  ;;  %v1839_v30 = vcombine.low %v1831_v20, %v1832_v21  ;;  %v1439_v33 = vrot.slane %v1431_v19, %v2788_v6  ;;  %v1840_v34 = vcombine.low %v1833_v23, %v1834_v24  ;;  %v1446_v37 = vrot.slane %v1432_v27, %v2788_v6 }
  0x24   : > { %v592_v31 = vcombine.low %v584_v22, %v591_v25  ;;  %v593_v32 = vcombine.high %v584_v22, %v591_v25  ;;  %v1643_v38 = vcombine.low %v1635_v28, %v1642_v29  ;;  %v1644_v47 = vcombine.high %v1635_v28, %v1642_v29  ;;  %2683 = vset.pattern.permute.xlu0 %v2718_v5  ;;  %v2549_v22 = vld [vmem:[%s3009_s1 + $0x10] sm:$0xf]  ;;  %v2555_v28 = vld [vmem:[%s3009_s1 + $0x14] sm:$0xf] }
  0x25   : > { %1028 = vrot.lane.b32.xlu0 %v1023_v7, %s2712_s29  ;;  %v1847_v41 = vrot.slane %v1839_v30, %v2788_v6  ;;  %v1447_v46 = vcombine.high %v1439_v33, %v1439_v33  ;;  %v1854_v48 = vrot.slane %v1840_v34, %v2788_v6  ;;  %v2051_v50 = vcombine.low %v2043_v39, %v2044_v42  ;;  %v2561_v34 = vld [vmem:[%s3009_s1 + $0x18] sm:$0xf] }
  0x26   : > { %v607_v35 = vrot.slane %v593_v32, %v2788_v6  ;;  %v600_v36 = vrot.slane %v592_v31, %v2788_v6  ;;  %v1651_v49 = vrot.slane %v1643_v38, %v2788_v6  ;;  %v2052_v51 = vcombine.low %v2045_v43, %v2046_v44 }
  0x27   : > { %1024 = vrot.lane.b32.xlu1 %v1015_v57, %s2712_s29  ;;  %v1658_v52 = vrot.slane %v1644_v47, %v2788_v6  ;;  %v1855_v53 = vcombine.low %v1847_v41, %v1854_v48  ;;  %v1856_v55 = vcombine.high %v1847_v41, %v1854_v48  ;;  %v2059_v56 = vrot.slane %v2051_v50, %v2788_v6 }
  0x28   : > { %2532 = vmatprep.subr.msk.mxu0 %vm395_vm1, %v607_v35  ;;  %v608_v45 = vcombine.high %v600_v36, %v600_v36  ;;  %v1659_v54 = vcombine.high %v1651_v49, %v1651_v49  ;;  %v2066_v57 = vrot.slane %v2052_v51, %v2788_v6 }
  0x29   : > { %1238 = vrot.lane.b32.xlu0 %v1234_v18, %s2713_s30  ;;  %2533 = vmatpush1.msk.msra.mxu0 %vm395_vm1, %v600_v36  ;;  %v1863_v58 = vrot.slane %v1855_v53, %v2788_v6  ;;  %v1870_v59 = vrot.slane %v1856_v55, %v2788_v6  ;;  %v2254_v55 = vld [vmem:[%s3010_s2] sm:$0xf] }
  0x2a   : > { %2534 = vmatmul.mubr.msk.f32.vlgmr.msra.gmra.mrb[2].mxu0 %vm391_vm2, %v2531_v40  ;;  %2605 = vmatpush3.msk.msra.mxu1 %vm395_vm1, %v608_v45  ;;  %v2067_v60 = vcombine.low %v2059_v56, %v2066_v57  ;;  %v2068_v62 = vcombine.high %v2059_v56, %v2066_v57 }
  0x2b   : > { %1240 = vrot.lane.b32.xlu1 %v1235_v26, %s2713_s30  ;;  %2607 = vmatmul.mubr.msk.f32.vlgmr.msra.gmra.mrb[2].mxu1 %vm391_vm2, %v2531_v40  ;;  %v1871_v61 = vcombine.high %v1863_v58, %v1863_v58  ;;  %v2567_v40 = vld [vmem:[%s3009_s1 + $0x1c] sm:$0xf] }
  0x2c   : > { %2609 = vmatprep.subr.mxu1 %v2709_v3  ;;  %894 = vmatprep.mubr.f32.mxu0 %v2709_v3  ;;  %v2075_v63 = vrot.slane %v2067_v60, %v2788_v6  ;;  %v2082_v1 = vrot.slane %v2068_v62, %v2788_v6 }
  0x2d   : > { %1236 = vrot.lane.b32.xlu0 %v1227_v13, %s2713_s30  ;;  %2611 = vmatprep.mubr.msk.f32.mxu1 %vm2710_vm0, %v2709_v3 }
  0x2e   : > { %v2083_v2 = vcombine.high %v2075_v63, %v2075_v63 }
  0x2f   : > { %1450 = vrot.lane.b32.xlu1 %v1446_v37, %s2714_s8 }
  0x31   : > { %1452 = vrot.lane.b32.xlu0 %v1447_v46, %s2714_s8  ;;  %v2573_v46 = vld [vmem:[%s3009_s1 + $0x20] sm:$0xf] }
  0x33   : > { %1448 = vrot.lane.b32.xlu1 %v1439_v33, %s2714_s8 }
  0x35   : > { %1662 = vrot.lane.b32.xlu0 %v1658_v52, %s2715_s9 }
  0x37   : > { %1664 = vrot.lane.b32.xlu1 %v1659_v54, %s2715_s9  ;;  %v2269_v54 = vld [vmem:[%s3011_s3] sm:$0xf] }
  0x39   : > { %1660 = vrot.lane.b32.xlu0 %v1651_v49, %s2715_s9 }
  0x3b   : > { %1874 = vrot.lane.b32.xlu1 %v1870_v59, %s2716_s10 }
  0x3d   : > { %1876 = vrot.lane.b32.xlu0 %v1871_v61, %s2716_s10 }
  0x3f   : > { %1872 = vrot.lane.b32.xlu1 %v1863_v58, %s2716_s10 }
  0x41   : > { %2086 = vrot.lane.b32.xlu0 %v2082_v1, %s2717_s11 }
  0x43   : > { %2088 = vrot.lane.b32.xlu1 %v2083_v2, %s2717_s11 }
  0x45   : > { %2084 = vrot.lane.b32.xlu0 %v2075_v63, %s2717_s11  ;;  %v349_v63 = vld [vmem:[#allocation2 + $0x8] sm:$0xf] }
  0x8f   : > { %v815_v7 = vpop.permute.xlu0 %814 }
  0x91   : > { %v813_v8 = vpop.permute.xlu1 %812 }
  0x92   : > { %v819_v10 = vsel %vm818_vm3, %v813_v8, %v815_v7 }
  0x93   : > { %v817_v9 = vpop.permute.xlu0 %816 }
  0x94   : > { %v820_v11 = vsel %vm818_vm3, %v815_v7, %v817_v9  ;;  %2610 = vmatpush3.msk.msra.mxu1 %vm395_vm1, %v817_v9 }
  0x95   : > { %2538 = vmatprep.subr.msk.mxu0 %vm395_vm1, %v820_v11  ;;  %v1027_v13 = vpop.permute.xlu1 %1026  ;;  %2612 = vmatmul.mubr.msk.f32.vlgmr.msra.gmra.mrb[4].mxu1 %vm391_vm2, %v2537_v12 }
  0x96   : > { %2539 = vmatpush1.msk.msra.mxu0 %vm395_vm1, %v819_v10  ;;  %2614 = vmatprep.subr.mxu1 %v2709_v3 }
  0x97   : > { %v1029_v14 = vpop.permute.xlu0 %1028  ;;  %2540 = vmatmul.mubr.msk.f32.vlgmr.msra.gmra.mrb[4].mxu0 %vm391_vm2, %v2537_v12  ;;  %2616 = vmatprep.mubr.msk.f32.mxu1 %vm2710_vm0, %v2709_v3 }
  0x98   : > { %v1032_v15 = vsel %vm1030_vm4, %v1027_v13, %v1029_v14  ;;  %2615 = vmatpush3.msk.msra.mxu1 %vm395_vm1, %v1029_v14  ;;  %1106 = vmatprep.mubr.f32.mxu0 %v2709_v3 }
  0x99   : > { %v1025_v17 = vpop.permute.xlu1 %1024  ;;  %2544 = vmatprep.subr.msk.mxu0 %vm395_vm1, %v1032_v15  ;;  %2617 = vmatmul.mubr.msk.f32.vlgmr.msra.gmra.mrb[6].mxu1 %vm391_vm2, %v2543_v16 }
  0x9a   : > { %v1031_v18 = vsel %vm1030_vm4, %v1025_v17, %v1027_v13  ;;  %2619 = vmatprep.subr.mxu1 %v2709_v3  ;;  %2621 = vmatprep.mubr.msk.f32.mxu1 %vm2710_vm0, %v2709_v3 }
  0x9b   : > { %2545 = vmatpush1.msk.msra.mxu0 %vm395_vm1, %v1031_v18  ;;  %v1239_v19 = vpop.permute.xlu0 %1238 }
  0x9c   : > { %2546 = vmatmul.mubr.msk.f32.vlgmr.msra.gmra.mrb[6].mxu0 %vm391_vm2, %v2543_v16 }
  0x9d   : > { %v1241_v20 = vpop.permute.xlu1 %1240  ;;  %1318 = vmatprep.mubr.f32.mxu0 %v2709_v3 }
  0x9e   : > { %v1244_v21 = vsel %vm1242_vm5, %v1239_v19, %v1241_v20  ;;  %2620 = vmatpush3.msk.msra.mxu1 %vm395_vm1, %v1241_v20 }
  0x9f   : > { %v1237_v23 = vpop.permute.xlu0 %1236  ;;  %2550 = vmatprep.subr.msk.mxu0 %vm395_vm1, %v1244_v21  ;;  %2622 = vmatmul.mubr.msk.f32.vlgmr.msra.gmra.mrb[8].mxu1 %vm391_vm2, %v2549_v22 }
  0xa0   : > { %v1243_v24 = vsel %vm1242_vm5, %v1237_v23, %v1239_v19  ;;  %2624 = vmatprep.subr.mxu1 %v2709_v3  ;;  %2626 = vmatprep.mubr.msk.f32.mxu1 %vm2710_vm0, %v2709_v3 }
  0xa1   : > { %2551 = vmatpush1.msk.msra.mxu0 %vm395_vm1, %v1243_v24  ;;  %v1451_v25 = vpop.permute.xlu1 %1450 }
  0xa2   : > { %2552 = vmatmul.mubr.msk.f32.vlgmr.msra.gmra.mrb[8].mxu0 %vm391_vm2, %v2549_v22 }
  0xa3   : > { %v1453_v26 = vpop.permute.xlu0 %1452  ;;  %1530 = vmatprep.mubr.f32.mxu0 %v2709_v3 }
  0xa4   : > { %v1456_v27 = vsel %vm1454_vm6, %v1451_v25, %v1453_v26  ;;  %2625 = vmatpush3.msk.msra.mxu1 %vm395_vm1, %v1453_v26 }
  0xa5   : > { %v1449_v29 = vpop.permute.xlu1 %1448  ;;  %2556 = vmatprep.subr.msk.mxu0 %vm395_vm1, %v1456_v27  ;;  %2627 = vmatmul.mubr.msk.f32.vlgmr.msra.gmra.mrb[10].mxu1 %vm391_vm2, %v2555_v28 }
  0xa6   : > { %v1455_v30 = vsel %vm1454_vm6, %v1449_v29, %v1451_v25  ;;  %2629 = vmatprep.subr.mxu1 %v2709_v3  ;;  %2631 = vmatprep.mubr.msk.f32.mxu1 %vm2710_vm0, %v2709_v3 }
  0xa7   : > { %2557 = vmatpush1.msk.msra.mxu0 %vm395_vm1, %v1455_v30  ;;  %v1663_v31 = vpop.permute.xlu0 %1662 }
  0xa8   : > { %2558 = vmatmul.mubr.msk.f32.vlgmr.msra.gmra.mrb[10].mxu0 %vm391_vm2, %v2555_v28 }
  0xa9   : > { %v1665_v32 = vpop.permute.xlu1 %1664  ;;  %1742 = vmatprep.mubr.f32.mxu0 %v2709_v3 }
  0xaa   : > { %v1668_v33 = vsel %vm1666_vm7, %v1663_v31, %v1665_v32  ;;  %2630 = vmatpush3.msk.msra.mxu1 %vm395_vm1, %v1665_v32 }
  0xab   : > { %v1661_v35 = vpop.permute.xlu0 %1660  ;;  %2562 = vmatprep.subr.msk.mxu0 %vm395_vm1, %v1668_v33  ;;  %2632 = vmatmul.mubr.msk.f32.vlgmr.msra.gmra.mrb[12].mxu1 %vm391_vm2, %v2561_v34 }
  0xac   : > { %v1667_v36 = vsel %vm1666_vm7, %v1661_v35, %v1663_v31  ;;  %2634 = vmatprep.subr.mxu1 %v2709_v3  ;;  %2636 = vmatprep.mubr.msk.f32.mxu1 %vm2710_vm0, %v2709_v3 }
  0xad   : > { %2563 = vmatpush1.msk.msra.mxu0 %vm395_vm1, %v1667_v36  ;;  %v1875_v37 = vpop.permute.xlu1 %1874 }
  0xae   : > { %2564 = vmatmul.mubr.msk.f32.vlgmr.msra.gmra.mrb[12].mxu0 %vm391_vm2, %v2561_v34 }
  0xaf   : > { %v1877_v38 = vpop.permute.xlu0 %1876  ;;  %1954 = vmatprep.mubr.f32.mxu0 %v2709_v3 }
  0xb0   : > { %v1880_v39 = vsel %vm1878_vm8, %v1875_v37, %v1877_v38  ;;  %2635 = vmatpush3.msk.msra.mxu1 %vm395_vm1, %v1877_v38 }
  0xb1   : > { %v1873_v41 = vpop.permute.xlu1 %1872  ;;  %2568 = vmatprep.subr.msk.mxu0 %vm395_vm1, %v1880_v39  ;;  %2637 = vmatmul.mubr.msk.f32.vlgmr.msra.gmra.mrb[14].mxu1 %vm391_vm2, %v2567_v40 }
  0xb2   : > { %v1879_v42 = vsel %vm1878_vm8, %v1873_v41, %v1875_v37  ;;  %2639 = vmatprep.subr.mxu1 %v2709_v3  ;;  %2641 = vmatprep.mubr.msk.f32.mxu1 %vm2710_vm0, %v2709_v3  ;;  %vm2345_vm0 = vcmp.lt.s32.totalorder %v363_v0, 288 }
  0xb3   : > { %2569 = vmatpush1.msk.msra.mxu0 %vm395_vm1, %v1879_v42  ;;  %v2087_v43 = vpop.permute.xlu0 %2086 }
  0xb4   : > { %2570 = vmatmul.mubr.msk.f32.vlgmr.msra.gmra.mrb[14].mxu0 %vm391_vm2, %v2567_v40 }
  0xb5   : > { %v2089_v44 = vpop.permute.xlu1 %2088  ;;  %2166 = vmatprep.mubr.f32.mxu0 %v2709_v3 }
  0xb6   : > { %v2092_v45 = vsel %vm2090_vm9, %v2087_v43, %v2089_v44  ;;  %2640 = vmatpush3.msk.msra.mxu1 %vm395_vm1, %v2089_v44 }
  0xb7   : > { %v2085_v47 = vpop.permute.xlu0 %2084  ;;  %2574 = vmatprep.subr.msk.mxu0 %vm395_vm1, %v2092_v45  ;;  %2642 = vmatmul.mubr.msk.f32.vlgmr.msra.gmra.mrb[16].mxu1 %vm391_vm2, %v2573_v46 }
  0xb8   : > { %v2091_v48 = vsel %vm2090_vm9, %v2085_v47, %v2087_v43 }
  0xb9   : > { %2575 = vmatpush1.msk.msra.mxu0 %vm395_vm1, %v2091_v48 }
  0xba   : > { %2576 = vmatmul.mubr.msk.f32.vlgmr.msra.gmra.mrb[16].mxu0 %vm391_vm2, %v2573_v46 }
  0xf1   : > { %v468_v49 = vpop.f32.mrb[0].mxu0 }
  0xf2   : > { %v470_v50 = vpop.f32.mrb[1].mxu0  ;;  %v539_v51 = vpop.f32.mrb[0].mxu1 }
  0xf3   : > { %v546_v52 = vcombine.low %v468_v49, %v470_v50  ;;  %v2603_v53 = vpop.f32.mrb[1].mxu1  ;;  %549 = vrot.lane.b32.xlu0 %v539_v51, %s2719_s6 }
  0xf5   : > { %547 = vrot.lane.b32.xlu1 %v546_v52, %s2719_s6 }
  0xf7   : > { %2272 = vperm.xlu0 %2683, %v2269_v54  }
  0xf9   : > { %2257 = vperm.xlu1 %2682, %v2254_v55  }
  0xfd   : > { %v684_v56 = vpop.f32.mrb[2].mxu0 }
  0xfe   : > { %v686_v3 = vpop.f32.mrb[3].mxu0  ;;  %v755_v57 = vpop.f32.mrb[2].mxu1 }
  0xff   : > { %v761_v58 = vcombine.low %v684_v56, %v686_v3  ;;  %v2608_v59 = vpop.f32.mrb[3].mxu1 }
 0x165   : > { %v550_v61 = vpop.permute.xlu0 %549 }
 0x167   : > { %v548_v60 = vpop.permute.xlu1 %547 }
 0x168   : > { %v551_v62 = vrot.slane %v548_v60, 4  ;;  %v967_v1 = vpop.f32.mrb[4].mxu1 }
 0x169   : > { %v2613_v2 = vpop.f32.mrb[5].mxu1 }
 0x16a   : > { %v553_v5 = vsel %vm552_vm11, %v551_v62, %v548_v60  ;;  %v554_v7 = vsel %vm552_vm11, %v551_v62, %v550_v61  ;;  %v896_v8 = vpop.f32.mrb[4].mxu0  ;;  %v2720_v62 = vmov 839922192  }
 0x16b   : > { %v558_v9 = vadd.f32 %v554_v7, %v349_v63  ;;  %v898_v10 = vpop.f32.mrb[5].mxu0  ;;  %562 = vst.msk [vmem:[#allocation2] sm:$0xff] %vm561_vm14, %v553_v5  ;;  %v2260_v63 = vunpack.c.l.s4 %v2720_v62 }
 0x16c   : > { %v973_v11 = vcombine.low %v896_v8, %v898_v10  ;;  %v1179_v12 = vpop.f32.mrb[6].mxu1 }
 0x16d   : > { %563 = vst.msk [vmem:[#allocation2 + $0x8] sm:$0xf] %vm345_vm10, %v558_v9  ;;  %v2618_v13 = vpop.f32.mrb[7].mxu1  ;;  %v2261_v5 = vunpack.c.0.s8 %v2260_v63 }
 0x16f   : > { %v1108_v14 = vpop.f32.mrb[6].mxu0  ;;  %v2264_v7 = vsub.s32 %v2261_v5, %v2775_v4 }
 0x170   : > { %v1110_v15 = vpop.f32.mrb[7].mxu0 }
 0x171   : > { %v1185_v16 = vcombine.low %v1108_v14, %v1110_v15  ;;  %v2290_v14 = vsub.s32 0, %v2775_v4  ;;  %v2294_v15 = vsub.s32 1, %v2775_v4 }
 0x172   : > { %v1391_v17 = vpop.f32.mrb[8].mxu1  ;;  %v566_v19 = vld [vmem:[#allocation2] sm:$0xff] }
 0x173   : > { %v2623_v18 = vpop.f32.mrb[9].mxu1  ;;  %v763_v21 = vadd.f32 %v761_v58, %v566_v19 }
 0x174   : > { %v567_v20 = vld [vmem:[#allocation2 + $0x8] sm:$0xf] }
 0x175   : > { %v764_v22 = vadd.f32 %v755_v57, %v567_v20  ;;  %v1320_v23 = vpop.f32.mrb[8].mxu0  ;;  %v975_v25 = vadd.f32 %v973_v11, %v763_v21  ;;  %v2298_v21 = vsub.s32 2, %v2775_v4 }
 0x176   : > { %v1322_v24 = vpop.f32.mrb[9].mxu0  ;;  %v2273_v11 = vpop.permute.xlu0 %2272 }
 0x177   : > { %766 = vst.msk [vmem:[#allocation2 + $0x8] sm:$0xf] %vm345_vm10, %v764_v22  ;;  %v1397_v26 = vcombine.low %v1320_v23, %v1322_v24  ;;  %v1187_v28 = vadd.f32 %v1185_v16, %v975_v25  ;;  %v2280_v16 = vrot.slane %v2273_v11, %v2264_v7 }
 0x178   : > { %v1603_v27 = vpop.f32.mrb[10].mxu1  ;;  %v2258_v8 = vpop.permute.xlu1 %2257 }
 0x179   : > { %v2628_v29 = vpop.f32.mrb[11].mxu1  ;;  %v1399_v30 = vadd.f32 %v1397_v26, %v1187_v28  ;;  %v2265_v9 = vrot.slane %v2258_v8, %v2264_v7 }
 0x17b   : > { %v1532_v31 = vpop.f32.mrb[10].mxu0 }
 0x17c   : > { %v1534_v32 = vpop.f32.mrb[11].mxu0 }
 0x17d   : > { %v1609_v33 = vcombine.low %v1532_v31, %v1534_v32 }
 0x17e   : > { %v770_v34 = vld [vmem:[#allocation2 + $0x8] sm:$0xf]  ;;  %v1815_v35 = vpop.f32.mrb[12].mxu1 }
 0x17f   : > { %v976_v36 = vadd.f32 %v967_v1, %v770_v34  ;;  %v1611_v37 = vadd.f32 %v1609_v33, %v1399_v30  ;;  %v2633_v38 = vpop.f32.mrb[13].mxu1 }
 0x181   : > { %978 = vst.msk [vmem:[#allocation2 + $0x8] sm:$0xf] %vm345_vm10, %v976_v36  ;;  %v1744_v39 = vpop.f32.mrb[12].mxu0 }
 0x182   : > { %v1746_v40 = vpop.f32.mrb[13].mxu0 }
 0x183   : > { %v1821_v41 = vcombine.low %v1744_v39, %v1746_v40 }
 0x184   : > { %v2027_v42 = vpop.f32.mrb[14].mxu1 }
 0x185   : > { %v1823_v43 = vadd.f32 %v1821_v41, %v1611_v37  ;;  %v2638_v44 = vpop.f32.mrb[15].mxu1 }
 0x187   : > { %v1956_v45 = vpop.f32.mrb[14].mxu0 }
 0x188   : > { %v982_v46 = vld [vmem:[#allocation2 + $0x8] sm:$0xf]  ;;  %v1958_v47 = vpop.f32.mrb[15].mxu0 }
 0x189   : > { %v1188_v48 = vadd.f32 %v1179_v12, %v982_v46  ;;  %v2033_v49 = vcombine.low %v1956_v45, %v1958_v47 }
 0x18a   : > { %v2239_v50 = vpop.f32.mrb[16].mxu1 }
 0x18b   : > { %1190 = vst.msk [vmem:[#allocation2 + $0x8] sm:$0xf] %vm345_vm10, %v1188_v48  ;;  %v2035_v51 = vadd.f32 %v2033_v49, %v1823_v43  ;;  %v2643_v52 = vpop.f32.mrb[17].mxu1 }
 0x18d   : > { %v2168_v53 = vpop.f32.mrb[16].mxu0 }
 0x18e   : > { %v2170_v54 = vpop.f32.mrb[17].mxu0 }
 0x18f   : > { %v2245_v55 = vcombine.low %v2168_v53, %v2170_v54 }
 0x191   : > { %v2247_v56 = vadd.f32 %v2245_v55, %v2035_v51 }
 0x192   : > { %v1194_v3 = vld [vmem:[#allocation2 + $0x8] sm:$0xf] }
 0x193   : > { %v1400_v57 = vadd.f32 %v1391_v17, %v1194_v3  ;;  %2249 = vst [vmem:[#allocation2] sm:$0xff] %v2247_v56  ;;  %v2267_v13 = vmul.f32 %v2265_v9, %v2247_v56  ;;  %v2286_v17 = vld [vmem:[%s3012_s4] sm:$0x7] }
 0x194   : > { %v2291_v18 = vrot.slane %v2286_v17, %v2290_v14  ;;  %v2295_v19 = vrot.slane %v2286_v17, %v2294_v15  ;;  %v2299_v26 = vrot.slane %v2286_v17, %v2298_v21 }
 0x195   : > { %1402 = vst.msk [vmem:[#allocation2 + $0x8] sm:$0xf] %vm345_vm10, %v1400_v57  ;;  %v2282_v20 = vadd.f32 %v2280_v16, %v2267_v13 }
 0x196   : > { %v2301_v24 = vcombine.low %v2291_v18, %v2295_v19 }
 0x197   : > { %v2284_v25 = vmax.f32 %v2282_v20, 0.0 }
 0x199   : > { %v2303_v29 = vmul.f32 %v2301_v24, %v2284_v25 }
 0x19b   : > { %v2313_v31 = vrot.slane %v2303_v29, %v2788_v6 }
 0x19c   : > { %v1406_v58 = vld [vmem:[#allocation2 + $0x8] sm:$0xf] }
 0x19d   : > { %v1612_v59 = vadd.f32 %v1603_v27, %v1406_v58 }
 0x19f   : > { %1614 = vst.msk [vmem:[#allocation2 + $0x8] sm:$0xf] %vm345_vm10, %v1612_v59 }
 0x1a6   : > { %v1618_v60 = vld [vmem:[#allocation2 + $0x8] sm:$0xf] }
 0x1a7   : > { %v1824_v61 = vadd.f32 %v1815_v35, %v1618_v60 }
 0x1a9   : > { %1826 = vst.msk [vmem:[#allocation2 + $0x8] sm:$0xf] %vm345_vm10, %v1824_v61 }
 0x1b0   : > { %v1830_v1 = vld [vmem:[#allocation2 + $0x8] sm:$0xf] }
 0x1b1   : > { %v2036_v2 = vadd.f32 %v2027_v42, %v1830_v1 }
 0x1b3   : > { %2038 = vst.msk [vmem:[#allocation2 + $0x8] sm:$0xf] %vm345_vm10, %v2036_v2 }
 0x1ba   : > { %v2042_v10 = vld [vmem:[#allocation2 + $0x8] sm:$0xf] }
 0x1bb   : > { %v2248_v12 = vadd.f32 %v2239_v50, %v2042_v10 }
 0x1bd   : > { %2251 = vst.msk [vmem:[#allocation2 + $0x8] sm:$0xf] %vm2250_vm15, %v2248_v12 }
 0x1c4   : > { %v2253_v22 = vld [vmem:[#allocation2 + $0x8] sm:$0xf] }
 0x1c5   : > { %v2268_v23 = vmul.f32 %v2265_v9, %v2253_v22 }
 0x1c7   : > { %v2283_v27 = vadd.f32 %v2280_v16, %v2268_v23 }
 0x1c9   : > { %v2285_v28 = vmax.f32 %v2283_v27, 0.0 }
 0x1cb   : > { %v2304_v30 = vmul.f32 %v2299_v26, %v2285_v28 }
 0x1cd   : > { %v2320_v32 = vrot.slane %v2304_v30, %v2788_v6 }
 0x1cf   : > { %v2321_v33 = vcombine.low %v2313_v31, %v2320_v32  ;;  %v2322_v34 = vcombine.high %v2313_v31, %v2320_v32 }
 0x1d1   : > { %v2329_v4 = vrot.slane %v2321_v33, %v2788_v6  ;;  %v2336_v35 = vrot.slane %v2322_v34, %v2788_v6 }
 0x1d3   : > { %v2337_v36 = vcombine.high %v2329_v4, %v2329_v4  ;;  %v2338_v37 = vcombine.high %v2336_v35, %v2336_v35  ;;  %2347 = vst.msk [vmem:[%s342_s15] sm:$0x7] %vm2345_vm0, %v2329_v4  ;;  %2348 = vst.msk [vmem:[%s342_s15 + $0x3] sm:$0x7] %vm2345_vm0, %v2336_v35 }
 0x1d5   : > { %2349 = vst.msk [vmem:[%s342_s15 + $0x6] sm:$0x7] %vm2345_vm0, %v2337_v36  ;;  %2350 = vst.msk [vmem:[%s342_s15 + $0x9] sm:$0x7] %vm2345_vm0, %v2338_v37 }
 0x1d6 PF: > { %s15_s20 = sadd.s32 1, %s2706_s20   ;;  %s3014_s18 = smov %s2702_s19 }
 0x1d7   : > { %p12_p5 = scmp.ge.s32.totalorder %s15_s20, 4   ;;  %s3015_s19 = smov %s3017_s21 }
 0x1d9   :  { %14 = sbr.rel (!%p12_p5) target bundleno = 2 (0x2), region = 90 }

// kernel: a_call__.4
= control target key start
LH: loop header
LB: loop body
LE: loop exit
PB: predicated region body
PF: predicated region fallthrough
CT: control target
= control target key end

     0   :  { %s4671_s24 = smov 0   ;;  %s4673_s25 = smov 0   ;;  %s5193_s0 = inlined_call_operand.vmem [shape: f32[2,2,1,360], index: 0, kind: input, shape index: {}]   ;;  %s5194_s1 = inlined_call_operand.vmem [shape: f32[2,2,1,360], index: 1, kind: input, shape index: {}]   ;;  %s5195_s2 = inlined_call_operand.vmem [shape: f32[9,4,2], index: 2, kind: input, shape index: {}]   ;;  %s5196_s3 = inlined_call_operand.vmem [shape: f32[9,4,2], index: 3, kind: input, shape index: {}]   ;;  %s5197_s4 = inlined_call_operand.vmem [shape: f32[4,1], index: 4, kind: input, shape index: {}]   ;;  %s5198_s5 = inlined_call_operand.vmem [shape: f32[4,1], index: 5, kind: input, shape index: {}]   ;;  %s5199_s6 = inlined_call_operand.vmem [shape: f32[1,1,324], index: 6, kind: input, shape index: {}]   ;;  %s5200_s7 = inlined_call_operand.vmem [shape: f32[2,4,1,324], index: 7, kind: output, shape index: {}]  }
   0x1   :  { %s4675_s26 = smov 0  }
   0x2 LB: > { %s36_s27 = sadd.s32 1, %s4612_s25  ;;  %p4318_p0 = scmp.ge.s32.totalorder %s4616_s26, 1  ;;  %s4616_s26 = sphi %s4675_s26, %s17_s26   ;;  %s4612_s25 = sphi %s4673_s25, %s5204_s25   ;;  %s4608_s24 = sphi %s4671_s24, %s5203_s24  }
   0x3   : > { %p38_p1 = scmp.ge.s32.totalorder %s36_s27, 2  ;;  %p325_p2 = scmp.lt.s32.totalorder %s4616_s26, 3 }
   0x5   : > { %s5206_s27 = smov (%p38_p1, %s36_s27), 0  ;;  %p326_p3 = pnand %p4318_p0, %p325_p2 }
   0x6   : > { %p396_p4 = scmp.lt.s32.totalorder (!%p326_p3), %s4608_s24, 1  ;;  %v460_v0 = vlaneseq (!%p326_p3)  ;;  %v4618_v1 = vmov (!%p326_p3), 1966171168   ;;  %v4619_v3 = vmov (!%p326_p3), 0.0   ;;  %vm4620_vm0 = vmmov (!%p326_p3), 0   ;;  %s4621_s9 = smov (!%p326_p3), 110  }
   0x7   : > { %329 = sbr.rel (%p326_p3) target bundleno = 628 (0x274), region = 48  ;;  %v458_v2 = vunpack.c.l.s4 (!%p326_p3), %v4618_v1  ;;  %555 = vmatprep.mubr.f32.mxu0 (!%p326_p3), %v4619_v3  ;;  %446 = vst [vmem:[#allocation2] sm:$0xff] (!%p326_p3), %v4619_v3  ;;  %4463 = vmatprep.subr.mxu1 (!%p326_p3), %v4619_v3  ;;  %vm484_vm1 = vcmask (!%p326_p3), 1041408   ;;  %s4622_s10 = smov (!%p326_p3), 127   ;;  %v449_v38 = vld [vmem:[%s5195_s2] sm:$0xf] (!%p326_p3) }
   0x8   : > { %v4695_v4 = vshrl.u32 (!%p326_p3), %v460_v0, 7  ;;  %4465 = vmatprep.mubr.msk.f32.mxu1 (!%p326_p3), %vm4620_vm0, %v4619_v3  ;;  %vm480_vm2 = vcmask (!%p326_p3), 15360   ;;  %s4623_s13 = smov (!%p326_p3), 111   ;;  %v4324_v57 = vld [vmem:[%s5195_s2 + $0x4] sm:$0xf] (!%p326_p3)  ;;  %s4624_s16 = smov (!%p326_p3), 109  }
   0x9   : > { %v459_v5 = vunpack.c.0.s8 (!%p326_p3), %v458_v2  ;;  %s4625_s20 = smov (!%p326_p3), 93   ;;  %s4626_s21 = smov (!%p326_p3), 92   ;;  %vm881_vm3 = vcmask (!%p326_p3), 1039360   ;;  %vm1080_vm4 = vcmask (!%p326_p3), 908288   ;;  %vm1279_vm5 = vcmask (!%p326_p3), 900096  }
   0xa   : > { %s4627_s22 = smov (!%p326_p3), 91   ;;  %vm1478_vm6 = vcmask (!%p326_p3), 891904   ;;  %vm1677_vm7 = vcmask (!%p326_p3), 760832   ;;  %vm1876_vm8 = vcmask (!%p326_p3), 752640   ;;  %vm2075_vm9 = vcmask (!%p326_p3), 744448   ;;  %s4628_s17 = smov (!%p326_p3), 1  }
   0xb   : > { %v4708_v6 = vsub.s32 (!%p326_p3), %v459_v5, %v4695_v4  ;;  %vm447_vm10 = vcmask (!%p326_p3), 551936   ;;  %vm641_vm11 = vcmask (!%p326_p3), 7168   ;;  %vm648_vm12 = vcmask (!%p326_p3), 1043464  }
   0xc   : > { %448 = vst.msk [vmem:[#allocation2 + $0x8] sm:$0xf] (!%p326_p3), %vm447_vm10, %v4619_v3  ;;  %vm649_vm13 = vcmask (!%p326_p3), 1047556   ;;  %vm2235_vm15 = vcmask (!%p326_p3), 543744  }
   0xd   : > { %vm5093_vm14 = vmor (!%p326_p3), %vm649_vm13, %vm648_vm12 }
   0xe   : > { %s5208_s24 = smov (!%p396_p4, %s4608_s24), 1 }
   0xf   : > { %s4553_s28 = smul.u32 6, %s5208_s24 }
  0x11   : > { %s4705_s8 = scalar_lea.vmem %s5193_s0, %s4553_s28  ;;  %s4788_s19 = scalar_lea.vmem %s5194_s1, %s4553_s28 }
  0x12   : > { %v1245_v7 = vld [vmem:[%s4705_s8] sm:$0x7]  ;;  %v1246_v8 = vld [vmem:[%s4705_s8 + $0x3] sm:$0x7]  ;;  %s4554_s28 = smul.u32 12, %s5208_s24 }
  0x13   : > { %v847_v9 = vld [vmem:[%s4705_s8] sm:$0x7]  ;;  %v1249_v10 = vcombine.low %v1245_v7, %v1246_v8  ;;  %v848_v11 = vld [vmem:[%s4705_s8 + $0x3] sm:$0x7] }
  0x14   : > { %v452_v12 = vld [vmem:[%s4705_s8] sm:$0x7]  ;;  %v453_v13 = vld [vmem:[%s4705_s8 + $0x3] sm:$0x7]  ;;  %v851_v14 = vcombine.low %v847_v9, %v848_v11 }
  0x15   : > { %v456_v15 = vcombine.low %v452_v12, %v453_v13  ;;  %v1046_v16 = vld [vmem:[%s4705_s8] sm:$0x7]  ;;  %v1047_v17 = vld [vmem:[%s4705_s8 + $0x3] sm:$0x7]  ;;  %v1256_v18 = vrot.slane %v1249_v10, %v4708_v6 }
  0x16   : > { %v1050_v19 = vcombine.low %v1046_v16, %v1047_v17  ;;  %v858_v20 = vrot.slane %v851_v14, %v4708_v6  ;;  %v1444_v22 = vld [vmem:[%s4705_s8] sm:$0x7]  ;;  %v1445_v23 = vld [vmem:[%s4705_s8 + $0x3] sm:$0x7] }
  0x17   : > { %v463_v21 = vrot.slane %v456_v15, %v4708_v6  ;;  %v1264_v24 = vrot.slane %v1256_v18, %v4708_v6  ;;  %v1448_v31 = vcombine.low %v1444_v22, %v1445_v23  ;;  %v657_v36 = vld [vmem:[%s4705_s8] sm:$0x7]  ;;  %v658_v37 = vld [vmem:[%s4705_s8 + $0x3] sm:$0x7]  ;;  %v1257_v46 = vcombine.high %v1256_v18, %v1256_v18 }
  0x18   : > { %v1057_v25 = vrot.slane %v1050_v19, %v4708_v6  ;;  %v866_v26 = vrot.slane %v858_v20, %v4708_v6  ;;  %v859_v27 = vcombine.high %v858_v20, %v858_v20  ;;  %v661_v40 = vcombine.low %v657_v36, %v658_v37  ;;  %v1643_v43 = vld [vmem:[%s4705_s8] sm:$0x7]  ;;  %v1644_v44 = vld [vmem:[%s4705_s8 + $0x3] sm:$0x7] }
  0x19   : > { %v464_v28 = vcombine.high %v463_v21, %v463_v21  ;;  %v471_v29 = vrot.slane %v463_v21, %v4708_v6  ;;  %1273 = vrot.lane.b32.xlu0 %v1264_v24, %s4621_s9  ;;  %v1455_v42 = vrot.slane %v1448_v31, %v4708_v6  ;;  %v1647_v48 = vcombine.low %v1643_v43, %v1644_v44  ;;  %v1842_v53 = vld [vmem:[%s4705_s8] sm:$0x7]  ;;  %v1843_v54 = vld [vmem:[%s4705_s8 + $0x3] sm:$0x7] }
  0x1a   : > { %v1065_v30 = vrot.slane %v1057_v25, %v4708_v6  ;;  %875 = vrot.lane.b32.xlu1 %v866_v26, %s4622_s10  ;;  %v873_v33 = vrot.slane %v859_v27, %v4708_v6  ;;  %v1058_v34 = vcombine.high %v1057_v25, %v1057_v25  ;;  %v874_v39 = vcombine.high %v866_v26, %v866_v26  ;;  %v2041_v7 = vld [vmem:[%s4705_s8] sm:$0x7]  ;;  %v2042_v8 = vld [vmem:[%s4705_s8 + $0x3] sm:$0x7]  ;;  %s444_s8 = scalar_lea.vmem %s5200_s7, %s4554_s28 }
  0x1b   : > { %v478_v32 = vrot.slane %v464_v28, %v4708_v6  ;;  %v479_v35 = vcombine.high %v471_v29, %v471_v29  ;;  %v668_v45 = vrot.slane %v661_v40, %v4708_v6  ;;  %v1272_v49 = vcombine.high %v1264_v24, %v1264_v24  ;;  %v2629_v13 = vld [vmem:[%s4788_s19] sm:$0x7]  ;;  %v2630_v14 = vld [vmem:[%s4788_s19 + $0x3] sm:$0x7] }
  0x1c   : > { %v1072_v41 = vrot.slane %v1058_v34, %v4708_v6  ;;  %v1073_v47 = vcombine.high %v1065_v30, %v1065_v30  ;;  %v1456_v50 = vcombine.high %v1455_v42, %v1455_v42  ;;  %v1271_v58 = vrot.slane %v1257_v46, %v4708_v6  ;;  %v2827_v23 = vld [vmem:[%s4788_s19] sm:$0x7]  ;;  %v2828_v24 = vld [vmem:[%s4788_s19 + $0x3] sm:$0x7] }
  0x1d   : > { %4319 = vmatprep.subr.msk.mxu0 %vm484_vm1, %v478_v32  ;;  %4464 = vmatpush3.msk.msra.mxu1 %vm484_vm1, %v479_v35  ;;  %v676_v51 = vrot.slane %v668_v45, %v4708_v6  ;;  %v669_v52 = vcombine.high %v668_v45, %v668_v45  ;;  %v1463_v59 = vrot.slane %v1455_v42, %v4708_v6  ;;  %v3224_v40 = vld [vmem:[%s4788_s19 + $0x3] sm:$0x7]  ;;  %v3421_v45 = vld [vmem:[%s4788_s19] sm:$0x7] }
  0x1e   : > { %4320 = vmatpush1.msk.msra.mxu0 %vm484_vm1, %v471_v29  ;;  %877 = vrot.lane.b32.xlu0 %v873_v33, %s4622_s10  ;;  %v1654_v60 = vrot.slane %v1647_v48, %v4708_v6  ;;  %v1470_v61 = vrot.slane %v1456_v50, %v4708_v6  ;;  %v1846_v62 = vcombine.low %v1842_v53, %v1843_v54  ;;  %v3025_v29 = vld [vmem:[%s4788_s19] sm:$0x7]  ;;  %v3422_v46 = vld [vmem:[%s4788_s19 + $0x3] sm:$0x7] }
  0x1f   : > { %1074 = vrot.lane.b32.xlu1 %v1065_v30, %s4623_s13  ;;  %4321 = vmatmul.mubr.msk.f32.vlgmr.msra.gmra.mrb[0].mxu0 %vm480_vm2, %v449_v38  ;;  %v684_v55 = vcombine.high %v676_v51, %v676_v51  ;;  %v683_v56 = vrot.slane %v669_v52, %v4708_v6  ;;  %v1471_v63 = vcombine.high %v1463_v59, %v1463_v59  ;;  %v3026_v30 = vld [vmem:[%s4788_s19 + $0x3] sm:$0x7] }
  0x20   : > { %4466 = vmatmul.mubr.msk.f32.vlgmr.msra.gmra.mrb[0].mxu1 %vm480_vm2, %v449_v38  ;;  %4468 = vmatprep.subr.mxu1 %v4619_v3  ;;  %v1655_v1 = vcombine.high %v1654_v60, %v1654_v60  ;;  %v1662_v2 = vrot.slane %v1654_v60, %v4708_v6  ;;  %v1853_v5 = vrot.slane %v1846_v62, %v4708_v6  ;;  %v3818_v62 = vld [vmem:[%s4788_s19 + $0x3] sm:$0x7] }
  0x21   : > { %4470 = vmatprep.mubr.msk.f32.mxu1 %vm4620_vm0, %v4619_v3  ;;  %758 = vmatprep.mubr.f32.mxu0 %v4619_v3  ;;  %v2045_v10 = vcombine.low %v2041_v7, %v2042_v8  ;;  %v2633_v18 = vcombine.low %v2629_v13, %v2630_v14  ;;  %v2831_v26 = vcombine.low %v2827_v23, %v2828_v24 }
  0x22   : > { %879 = vrot.lane.b32.xlu0 %v874_v39, %s4622_s10  ;;  %4469 = vmatpush3.msk.msra.mxu1 %vm484_vm1, %v684_v55  ;;  %v1669_v9 = vrot.slane %v1655_v1, %v4708_v6  ;;  %v1670_v11 = vcombine.high %v1662_v2, %v1662_v2  ;;  %v1854_v12 = vcombine.high %v1853_v5, %v1853_v5  ;;  %v3223_v39 = vld [vmem:[%s4788_s19] sm:$0x7] }
  0x23   : > { %1076 = vrot.lane.b32.xlu1 %v1072_v41, %s4623_s13  ;;  %4325 = vmatprep.subr.msk.mxu0 %vm484_vm1, %v683_v56  ;;  %v1861_v15 = vrot.slane %v1853_v5, %v4708_v6  ;;  %v2052_v16 = vrot.slane %v2045_v10, %v4708_v6  ;;  %v2640_v22 = vrot.slane %v2633_v18, %v4708_v6  ;;  %v3619_v55 = vld [vmem:[%s4788_s19] sm:$0x7]  ;;  %v3620_v56 = vld [vmem:[%s4788_s19 + $0x3] sm:$0x7] }
  0x24   : > { %4471 = vmatmul.mubr.msk.f32.vlgmr.msra.gmra.mrb[2].mxu1 %vm480_vm2, %v4324_v57  ;;  %4473 = vmatprep.subr.mxu1 %v4619_v3  ;;  %v1868_v17 = vrot.slane %v1854_v12, %v4708_v6  ;;  %v2838_v32 = vrot.slane %v2831_v26, %v4708_v6  ;;  %v3029_v34 = vcombine.low %v3025_v29, %v3026_v30 }
  0x25   : > { %4326 = vmatpush1.msk.msra.mxu0 %vm484_vm1, %v676_v51  ;;  %4475 = vmatprep.mubr.msk.f32.mxu1 %vm4620_vm0, %v4619_v3  ;;  %v1869_v19 = vcombine.high %v1861_v15, %v1861_v15  ;;  %v2053_v20 = vcombine.high %v2052_v16, %v2052_v16  ;;  %v2060_v21 = vrot.slane %v2052_v16, %v4708_v6 }
  0x26   : > { %1078 = vrot.lane.b32.xlu0 %v1073_v47, %s4623_s13  ;;  %4327 = vmatmul.mubr.msk.f32.vlgmr.msra.gmra.mrb[2].mxu0 %vm480_vm2, %v4324_v57  ;;  %v2641_v28 = vcombine.high %v2640_v22, %v2640_v22  ;;  %v2648_v31 = vrot.slane %v2640_v22, %v4708_v6  ;;  %v2839_v36 = vcombine.high %v2838_v32, %v2838_v32 }
  0x27   : > { %1277 = vrot.lane.b32.xlu1 %v1272_v49, %s4621_s9  ;;  %957 = vmatprep.mubr.f32.mxu0 %v4619_v3  ;;  %v2067_v25 = vrot.slane %v2053_v20, %v4708_v6  ;;  %v2068_v27 = vcombine.high %v2060_v21, %v2060_v21  ;;  %v2846_v37 = vrot.slane %v2838_v32, %v4708_v6  ;;  %v4342_v32 = vld [vmem:[%s5195_s2 + $0x10] sm:$0xf] }
  0x28   : > { %v2655_v33 = vrot.slane %v2641_v28, %v4708_v6  ;;  %v2656_v35 = vcombine.high %v2648_v31, %v2648_v31  ;;  %v3036_v38 = vrot.slane %v3029_v34, %v4708_v6  ;;  %v2853_v41 = vrot.slane %v2839_v36, %v4708_v6 }
  0x29   : > { %v3227_v42 = vcombine.low %v3223_v39, %v3224_v40  ;;  %v2854_v43 = vcombine.high %v2846_v37, %v2846_v37  ;;  %v3425_v50 = vcombine.low %v3421_v45, %v3422_v46  ;;  %v4348_v39 = vld [vmem:[%s5195_s2 + $0x14] sm:$0xf]  ;;  %v2439_v46 = vld [vmem:[%s4788_s19] sm:$0x7] }
  0x2a   : > { %1275 = vrot.lane.b32.xlu0 %v1271_v58, %s4621_s9  ;;  %v3037_v44 = vcombine.high %v3036_v38, %v3036_v38  ;;  %v3044_v47 = vrot.slane %v3036_v38, %v4708_v6  ;;  %v3623_v58 = vcombine.low %v3619_v55, %v3620_v56 }
  0x2b   : > { %1474 = vrot.lane.b32.xlu1 %v1470_v61, %s4624_s16  ;;  %v3234_v48 = vrot.slane %v3227_v42, %v4708_v6  ;;  %v3432_v54 = vrot.slane %v3425_v50, %v4708_v6  ;;  %v3817_v61 = vld [vmem:[%s4788_s19] sm:$0x7] }
  0x2c   : > { %v3051_v49 = vrot.slane %v3037_v44, %v4708_v6  ;;  %v3052_v51 = vcombine.high %v3044_v47, %v3044_v47  ;;  %v3630_v1 = vrot.slane %v3623_v58, %v4708_v6  ;;  %v3821_v5 = vcombine.low %v3817_v61, %v3818_v62  ;;  %v2240_v42 = vld [vmem:[%s4788_s19] sm:$0x7]  ;;  %v4360_v58 = vld [vmem:[%s5195_s2 + $0x1c] sm:$0xf] }
  0x2d   : > { %v3235_v52 = vcombine.high %v3234_v48, %v3234_v48  ;;  %v3242_v53 = vrot.slane %v3234_v48, %v4708_v6  ;;  %v3433_v60 = vcombine.high %v3432_v54, %v3432_v54  ;;  %v4354_v48 = vld [vmem:[%s5195_s2 + $0x18] sm:$0xf] }
  0x2e   : > { %1476 = vrot.lane.b32.xlu0 %v1471_v63, %s4624_s16  ;;  %v3440_v63 = vrot.slane %v3432_v54, %v4708_v6  ;;  %v3631_v8 = vcombine.high %v3630_v1, %v3630_v1  ;;  %v3828_v10 = vrot.slane %v3821_v5, %v4708_v6 }
  0x2f   : > { %1472 = vrot.lane.b32.xlu1 %v1463_v59, %s4624_s16  ;;  %v3249_v57 = vrot.slane %v3235_v52, %v4708_v6  ;;  %v3250_v59 = vcombine.high %v3242_v53, %v3242_v53 }
  0x30   : > { %v3448_v7 = vcombine.high %v3440_v63, %v3440_v63  ;;  %v3829_v13 = vcombine.high %v3828_v10, %v3828_v10  ;;  %v3836_v14 = vrot.slane %v3828_v10, %v4708_v6 }
  0x32   : > { %1673 = vrot.lane.b32.xlu0 %v1669_v9, %s4625_s20  ;;  %v3638_v9 = vrot.slane %v3630_v1, %v4708_v6  ;;  %v3844_v16 = vcombine.high %v3836_v14, %v3836_v14 }
  0x33   : > { %1675 = vrot.lane.b32.xlu1 %v1670_v11, %s4625_s20  ;;  %v3645_v11 = vrot.slane %v3631_v8, %v4708_v6  ;;  %v4366_v8 = vld [vmem:[%s5195_s2 + $0x20] sm:$0xf] }
  0x34   : > { %v3646_v12 = vcombine.high %v3638_v9, %v3638_v9 }
  0x36   : > { %1671 = vrot.lane.b32.xlu0 %v1662_v2, %s4625_s20  ;;  %v3447_v2 = vrot.slane %v3433_v60, %v4708_v6 }
  0x37   : > { %1872 = vrot.lane.b32.xlu1 %v1868_v17, %s4626_s21 }
  0x3a   : > { %1874 = vrot.lane.b32.xlu0 %v1869_v19, %s4626_s21 }
  0x3b   : > { %1870 = vrot.lane.b32.xlu1 %v1861_v15, %s4626_s21  ;;  %v3843_v15 = vrot.slane %v3829_v13, %v4708_v6 }
  0x3e   : > { %2071 = vrot.lane.b32.xlu0 %v2067_v25, %s4627_s22 }
  0x3f   : > { %2073 = vrot.lane.b32.xlu1 %v2068_v27, %s4627_s22  ;;  %v4336_v27 = vld [vmem:[%s5195_s2 + $0xc] sm:$0xf] }
  0x42   : > { %2069 = vrot.lane.b32.xlu0 %v2060_v21, %s4627_s22  ;;  %v4330_v21 = vld [vmem:[%s5195_s2 + $0x8] sm:$0xf] }
  0x43   : > { %2659 = vrot.lane.b32.xlu1 %v2655_v33, %s4622_s10 }
  0x46   : > { %2661 = vrot.lane.b32.xlu0 %v2656_v35, %s4622_s10 }
  0x47   : > { %2657 = vrot.lane.b32.xlu1 %v2648_v31, %s4622_s10 }
  0x4a   : > { %2857 = vrot.lane.b32.xlu0 %v2853_v41, %s4623_s13 }
  0x4b   : > { %2859 = vrot.lane.b32.xlu1 %v2854_v43, %s4623_s13  ;;  %v2241_v43 = vld [vmem:[%s4788_s19 + $0x3] sm:$0x7] }
  0x4e   : > { %2855 = vrot.lane.b32.xlu0 %v2846_v37, %s4623_s13 }
  0x4f   : > { %3055 = vrot.lane.b32.xlu1 %v3051_v49, %s4621_s9  ;;  %v2244_v49 = vcombine.low %v2240_v42, %v2241_v43 }
  0x51   : > { %v2251_v54 = vrot.slane %v2244_v49, %v4708_v6 }
  0x52   : > { %3057 = vrot.lane.b32.xlu0 %v3052_v51, %s4621_s9 }
  0x53   : > { %3053 = vrot.lane.b32.xlu1 %v3044_v47, %s4621_s9  ;;  %v2440_v47 = vld [vmem:[%s4788_s19 + $0x3] sm:$0x7]  ;;  %v2252_v61 = vcombine.high %v2251_v54, %v2251_v54  ;;  %v2259_v62 = vrot.slane %v2251_v54, %v4708_v6 }
  0x56   : > { %3253 = vrot.lane.b32.xlu0 %v3249_v57, %s4624_s16 }
  0x57   : > { %3255 = vrot.lane.b32.xlu1 %v3250_v59, %s4624_s16 }
  0x5a   : > { %3251 = vrot.lane.b32.xlu0 %v3242_v53, %s4624_s16  ;;  %v2443_v53 = vcombine.low %v2439_v46, %v2440_v47 }
  0x5b   : > { %3451 = vrot.lane.b32.xlu1 %v3447_v2, %s4625_s20  ;;  %v2267_v2 = vcombine.high %v2259_v62, %v2259_v62 }
  0x5c   : > { %v2450_v59 = vrot.slane %v2443_v53, %v4708_v6 }
  0x5e   : > { %3453 = vrot.lane.b32.xlu0 %v3448_v7, %s4625_s20  ;;  %v2451_v5 = vcombine.high %v2450_v59, %v2450_v59 }
  0x5f   : > { %3449 = vrot.lane.b32.xlu1 %v3440_v63, %s4625_s20 }
  0x60   : > { %v2465_v13 = vrot.slane %v2451_v5, %v4708_v6 }
  0x62   : > { %3649 = vrot.lane.b32.xlu0 %v3645_v11, %s4626_s21  ;;  %v2458_v11 = vrot.slane %v2450_v59, %v4708_v6 }
  0x63   : > { %3651 = vrot.lane.b32.xlu1 %v3646_v12, %s4626_s21 }
  0x66   : > { %3647 = vrot.lane.b32.xlu0 %v3638_v9, %s4626_s21  ;;  %v2266_v9 = vrot.slane %v2252_v61, %v4708_v6 }
  0x67   : > { %3847 = vrot.lane.b32.xlu1 %v3843_v15, %s4627_s22  ;;  %v2466_v15 = vcombine.high %v2458_v11, %v2458_v11 }
  0x6a   : > { %3849 = vrot.lane.b32.xlu0 %v3844_v16, %s4627_s22  ;;  %v2237_v16 = vld [vmem:[%s5196_s3] sm:$0xf] }
  0x6b   : > { %3845 = vrot.lane.b32.xlu1 %v3836_v14, %s4627_s22 }
  0x8b   : > { %v1274_v17 = vpop.permute.xlu0 %1273 }
  0x8c   : > { %v876_v18 = vpop.permute.xlu1 %875 }
  0x90   : > { %v878_v19 = vpop.permute.xlu0 %877 }
  0x91   : > { %v1075_v20 = vpop.permute.xlu1 %1074  ;;  %v882_v25 = vsel %vm881_vm3, %v876_v18, %v878_v19 }
  0x94   : > { %v880_v22 = vpop.permute.xlu0 %879 }
  0x95   : > { %v1077_v23 = vpop.permute.xlu1 %1076  ;;  %v883_v24 = vsel %vm881_vm3, %v878_v19, %v880_v22  ;;  %4474 = vmatpush3.msk.msra.mxu1 %vm484_vm1, %v880_v22 }
  0x96   : > { %4331 = vmatprep.subr.msk.mxu0 %vm484_vm1, %v883_v24  ;;  %4476 = vmatmul.mubr.msk.f32.vlgmr.msra.gmra.mrb[4].mxu1 %vm480_vm2, %v4330_v21  ;;  %v1081_v30 = vsel %vm1080_vm4, %v1075_v20, %v1077_v23  ;;  %v4377_v20 = vld [vmem:[%s5196_s3 + $0x4] sm:$0xf] }
  0x97   : > { %4332 = vmatpush1.msk.msra.mxu0 %vm484_vm1, %v882_v25  ;;  %4478 = vmatprep.subr.mxu1 %v4619_v3  ;;  %v4383_v25 = vld [vmem:[%s5196_s3 + $0x8] sm:$0xf] }
  0x98   : > { %v1079_v26 = vpop.permute.xlu0 %1078  ;;  %4333 = vmatmul.mubr.msk.f32.vlgmr.msra.gmra.mrb[4].mxu0 %vm480_vm2, %v4330_v21  ;;  %4480 = vmatprep.mubr.msk.f32.mxu1 %vm4620_vm0, %v4619_v3 }
  0x99   : > { %v1278_v28 = vpop.permute.xlu1 %1277  ;;  %v1082_v29 = vsel %vm1080_vm4, %v1077_v23, %v1079_v26  ;;  %4479 = vmatpush3.msk.msra.mxu1 %vm484_vm1, %v1079_v26  ;;  %1156 = vmatprep.mubr.f32.mxu0 %v4619_v3 }
  0x9a   : > { %4337 = vmatprep.subr.msk.mxu0 %vm484_vm1, %v1082_v29  ;;  %4483 = vmatprep.subr.mxu1 %v4619_v3 }
  0x9b   : > { %4338 = vmatpush1.msk.msra.mxu0 %vm484_vm1, %v1081_v30  ;;  %4481 = vmatmul.mubr.msk.f32.vlgmr.msra.gmra.mrb[6].mxu1 %vm480_vm2, %v4336_v27  ;;  %v4389_v30 = vld [vmem:[%s5196_s3 + $0xc] sm:$0xf] }
  0x9c   : > { %v1276_v31 = vpop.permute.xlu0 %1275  ;;  %4484 = vmatpush3.msk.msra.mxu1 %vm484_vm1, %v1278_v28  ;;  %4339 = vmatmul.mubr.msk.f32.vlgmr.msra.gmra.mrb[6].mxu0 %vm480_vm2, %v4336_v27 }
  0x9d   : > { %v1475_v33 = vpop.permute.xlu1 %1474  ;;  %v1280_v34 = vsel %vm1279_vm5, %v1274_v17, %v1276_v31  ;;  %v1281_v35 = vsel %vm1279_vm5, %v1276_v31, %v1278_v28  ;;  %4485 = vmatprep.mubr.msk.f32.mxu1 %vm4620_vm0, %v4619_v3  ;;  %4488 = vmatprep.subr.mxu1 %v4619_v3 }
  0x9e   : > { %4343 = vmatprep.subr.msk.mxu0 %vm484_vm1, %v1281_v35  ;;  %1355 = vmatprep.mubr.f32.mxu0 %v4619_v3  ;;  %v4395_v35 = vld [vmem:[%s5196_s3 + $0x10] sm:$0xf] }
  0x9f   : > { %4344 = vmatpush1.msk.msra.mxu0 %vm484_vm1, %v1280_v34  ;;  %4486 = vmatmul.mubr.msk.f32.vlgmr.msra.gmra.mrb[8].mxu1 %vm480_vm2, %v4342_v32 }
  0xa0   : > { %v1477_v36 = vpop.permute.xlu0 %1476  ;;  %4345 = vmatmul.mubr.msk.f32.vlgmr.msra.gmra.mrb[8].mxu0 %vm480_vm2, %v4342_v32  ;;  %4490 = vmatprep.mubr.msk.f32.mxu1 %vm4620_vm0, %v4619_v3 }
  0xa1   : > { %v1473_v37 = vpop.permute.xlu1 %1472  ;;  %v1480_v38 = vsel %vm1478_vm6, %v1475_v33, %v1477_v36  ;;  %4489 = vmatpush3.msk.msra.mxu1 %vm484_vm1, %v1477_v36  ;;  %1554 = vmatprep.mubr.f32.mxu0 %v4619_v3 }
  0xa2   : > { %v1479_v40 = vsel %vm1478_vm6, %v1473_v37, %v1475_v33  ;;  %4349 = vmatprep.subr.msk.mxu0 %vm484_vm1, %v1480_v38  ;;  %4493 = vmatprep.subr.mxu1 %v4619_v3 }
  0xa3   : > { %4350 = vmatpush1.msk.msra.mxu0 %vm484_vm1, %v1479_v40  ;;  %4491 = vmatmul.mubr.msk.f32.vlgmr.msra.gmra.mrb[10].mxu1 %vm480_vm2, %v4348_v39 }
  0xa4   : > { %v1674_v41 = vpop.permute.xlu0 %1673  ;;  %4351 = vmatmul.mubr.msk.f32.vlgmr.msra.gmra.mrb[10].mxu0 %vm480_vm2, %v4348_v39  ;;  %4495 = vmatprep.mubr.msk.f32.mxu1 %vm4620_vm0, %v4619_v3  ;;  %v4401_v39 = vld [vmem:[%s5196_s3 + $0x14] sm:$0xf] }
  0xa5   : > { %v1676_v44 = vpop.permute.xlu1 %1675  ;;  %1753 = vmatprep.mubr.f32.mxu0 %v4619_v3 }
  0xa6   : > { %v1679_v45 = vsel %vm1677_vm7, %v1674_v41, %v1676_v44  ;;  %4494 = vmatpush3.msk.msra.mxu1 %vm484_vm1, %v1676_v44 }
  0xa7   : > { %4355 = vmatprep.subr.msk.mxu0 %vm484_vm1, %v1679_v45  ;;  %4498 = vmatprep.subr.mxu1 %v4619_v3  ;;  %v4407_v45 = vld [vmem:[%s5196_s3 + $0x18] sm:$0xf] }
  0xa8   : > { %v1672_v50 = vpop.permute.xlu0 %1671  ;;  %4496 = vmatmul.mubr.msk.f32.vlgmr.msra.gmra.mrb[12].mxu1 %vm480_vm2, %v4354_v48 }
  0xa9   : > { %v1873_v51 = vpop.permute.xlu1 %1872  ;;  %v1678_v52 = vsel %vm1677_vm7, %v1672_v50, %v1674_v41  ;;  %4500 = vmatprep.mubr.msk.f32.mxu1 %vm4620_vm0, %v4619_v3  ;;  %v4413_v50 = vld [vmem:[%s5196_s3 + $0x1c] sm:$0xf] }
  0xaa   : > { %4356 = vmatpush1.msk.msra.mxu0 %vm484_vm1, %v1678_v52 }
  0xab   : > { %4357 = vmatmul.mubr.msk.f32.vlgmr.msra.gmra.mrb[12].mxu0 %vm480_vm2, %v4354_v48 }
  0xac   : > { %v1875_v55 = vpop.permute.xlu0 %1874  ;;  %1952 = vmatprep.mubr.f32.mxu0 %v4619_v3 }
  0xad   : > { %v1871_v56 = vpop.permute.xlu1 %1870  ;;  %v1878_v57 = vsel %vm1876_vm8, %v1873_v51, %v1875_v55  ;;  %4499 = vmatpush3.msk.msra.mxu1 %vm484_vm1, %v1875_v55 }
  0xae   : > { %v1877_v60 = vsel %vm1876_vm8, %v1871_v56, %v1873_v51  ;;  %4361 = vmatprep.subr.msk.mxu0 %vm484_vm1, %v1878_v57  ;;  %4503 = vmatprep.subr.mxu1 %v4619_v3  ;;  %v4419_v57 = vld [vmem:[%s5196_s3 + $0x20] sm:$0xf] }
  0xaf   : > { %4362 = vmatpush1.msk.msra.mxu0 %vm484_vm1, %v1877_v60  ;;  %4501 = vmatmul.mubr.msk.f32.vlgmr.msra.gmra.mrb[14].mxu1 %vm480_vm2, %v4360_v58 }
  0xb0   : > { %v2072_v63 = vpop.permute.xlu0 %2071  ;;  %4363 = vmatmul.mubr.msk.f32.vlgmr.msra.gmra.mrb[14].mxu0 %vm480_vm2, %v4360_v58  ;;  %4505 = vmatprep.mubr.msk.f32.mxu1 %vm4620_vm0, %v4619_v3 }
  0xb1   : > { %v2074_v1 = vpop.permute.xlu1 %2073  ;;  %2151 = vmatprep.mubr.f32.mxu0 %v4619_v3 }
  0xb2   : > { %v2077_v7 = vsel %vm2075_vm9, %v2072_v63, %v2074_v1  ;;  %4504 = vmatpush3.msk.msra.mxu1 %vm484_vm1, %v2074_v1 }
  0xb3   : > { %4367 = vmatprep.subr.msk.mxu0 %vm484_vm1, %v2077_v7  ;;  %4506 = vmatmul.mubr.msk.f32.vlgmr.msra.gmra.mrb[16].mxu1 %vm480_vm2, %v4366_v8 }
  0xb4   : > { %v2070_v10 = vpop.permute.xlu0 %2069  ;;  %4508 = vmatprep.subr.mxu1 %v4619_v3  ;;  %4510 = vmatprep.mubr.msk.f32.mxu1 %vm4620_vm0, %v4619_v3 }
  0xb5   : > { %v2076_v12 = vsel %vm2075_vm9, %v2070_v10, %v2072_v63  ;;  %4509 = vmatpush3.msk.msra.mxu1 %vm484_vm1, %v2267_v2  ;;  %v2660_v14 = vpop.permute.xlu1 %2659 }
  0xb6   : > { %4368 = vmatpush1.msk.msra.mxu0 %vm484_vm1, %v2076_v12  ;;  %4513 = vmatprep.subr.mxu1 %v4619_v3  ;;  %v451_v12 = vld [vmem:[#allocation2 + $0x8] sm:$0xf] }
  0xb7   : > { %4369 = vmatmul.mubr.msk.f32.vlgmr.msra.gmra.mrb[16].mxu0 %vm480_vm2, %v4366_v8  ;;  %4372 = vmatprep.subr.msk.mxu0 %vm484_vm1, %v2266_v9  ;;  %v4629_v9 = vmov 0  }
  0xb8   : > { %4373 = vmatpush1.msk.msra.mxu0 %vm484_vm1, %v2259_v62  ;;  %2341 = vmatprep.mubr.f32.mxu0 %v4619_v3  ;;  %v2662_v17 = vpop.permute.xlu0 %2661 }
  0xb9   : > { %4511 = vmatmul.mubr.msk.f32.vlgmr.msra.gmra.mrb[18].mxu1 %vm480_vm2, %v2237_v16  ;;  %4378 = vmatprep.subr.msk.mxu0 %vm484_vm1, %v2465_v13  ;;  %v2658_v18 = vpop.permute.xlu1 %2657  ;;  %v2664_v19 = vsel %vm881_vm3, %v2660_v14, %v2662_v17 }
  0xba   : > { %4514 = vmatpush3.msk.msra.mxu1 %vm484_vm1, %v2466_v15  ;;  %4515 = vmatprep.mubr.msk.f32.mxu1 %vm4620_vm0, %v4619_v3  ;;  %v2663_v22 = vsel %vm881_vm3, %v2658_v18, %v2660_v14 }
  0xbb   : > { %4374 = vmatmul.mubr.msk.f32.vlgmr.msra.gmra.mrb[18].mxu0 %vm480_vm2, %v2237_v16  ;;  %4518 = vmatprep.subr.mxu1 %v4619_v3 }
  0xbc   : > { %4379 = vmatpush1.msk.msra.mxu0 %vm484_vm1, %v2458_v11  ;;  %2540 = vmatprep.mubr.f32.mxu0 %v4619_v3  ;;  %v2858_v21 = vpop.permute.xlu0 %2857 }
  0xbd   : > { %4516 = vmatmul.mubr.msk.f32.vlgmr.msra.gmra.mrb[20].mxu1 %vm480_vm2, %v4377_v20  ;;  %4384 = vmatprep.subr.msk.mxu0 %vm484_vm1, %v2664_v19  ;;  %v2860_v23 = vpop.permute.xlu1 %2859 }
  0xbe   : > { %4519 = vmatpush3.msk.msra.mxu1 %vm484_vm1, %v2662_v17  ;;  %v2862_v24 = vsel %vm1080_vm4, %v2858_v21, %v2860_v23  ;;  %4520 = vmatprep.mubr.msk.f32.mxu1 %vm4620_vm0, %v4619_v3 }
  0xbf   : > { %4380 = vmatmul.mubr.msk.f32.vlgmr.msra.gmra.mrb[20].mxu0 %vm480_vm2, %v4377_v20  ;;  %4523 = vmatprep.subr.mxu1 %v4619_v3 }
  0xc0   : > { %4385 = vmatpush1.msk.msra.mxu0 %vm484_vm1, %v2663_v22  ;;  %2738 = vmatprep.mubr.f32.mxu0 %v4619_v3  ;;  %v2856_v26 = vpop.permute.xlu0 %2855 }
  0xc1   : > { %v2861_v27 = vsel %vm1080_vm4, %v2856_v26, %v2858_v21  ;;  %4521 = vmatmul.mubr.msk.f32.vlgmr.msra.gmra.mrb[22].mxu1 %vm480_vm2, %v4383_v25  ;;  %v3056_v28 = vpop.permute.xlu1 %3055  ;;  %4390 = vmatprep.subr.msk.mxu0 %vm484_vm1, %v2862_v24 }
  0xc2   : > { %4524 = vmatpush3.msk.msra.mxu1 %vm484_vm1, %v2860_v23  ;;  %4525 = vmatprep.mubr.msk.f32.mxu1 %vm4620_vm0, %v4619_v3 }
  0xc3   : > { %4386 = vmatmul.mubr.msk.f32.vlgmr.msra.gmra.mrb[22].mxu0 %vm480_vm2, %v4383_v25  ;;  %4528 = vmatprep.subr.mxu1 %v4619_v3 }
  0xc4   : > { %4391 = vmatpush1.msk.msra.mxu0 %vm484_vm1, %v2861_v27  ;;  %v3058_v29 = vpop.permute.xlu0 %3057  ;;  %2936 = vmatprep.mubr.f32.mxu0 %v4619_v3 }
  0xc5   : > { %v3060_v31 = vsel %vm1279_vm5, %v3056_v28, %v3058_v29  ;;  %v3054_v32 = vpop.permute.xlu1 %3053  ;;  %4526 = vmatmul.mubr.msk.f32.vlgmr.msra.gmra.mrb[24].mxu1 %vm480_vm2, %v4389_v30  ;;  %4592 = vset.pattern.permute.xlu0 %v4629_v9 }
  0xc6   : > { %v3059_v33 = vsel %vm1279_vm5, %v3054_v32, %v3056_v28  ;;  %4396 = vmatprep.subr.msk.mxu0 %vm484_vm1, %v3060_v31  ;;  %4529 = vmatpush3.msk.msra.mxu1 %vm484_vm1, %v3058_v29 }
  0xc7   : > { %4392 = vmatmul.mubr.msk.f32.vlgmr.msra.gmra.mrb[24].mxu0 %vm480_vm2, %v4389_v30  ;;  %4530 = vmatprep.mubr.msk.f32.mxu1 %vm4620_vm0, %v4619_v3 }
  0xc8   : > { %v3254_v34 = vpop.permute.xlu0 %3253  ;;  %4397 = vmatpush1.msk.msra.mxu0 %vm484_vm1, %v3059_v33  ;;  %3134 = vmatprep.mubr.f32.mxu0 %v4619_v3 }
  0xc9   : > { %v3256_v36 = vpop.permute.xlu1 %3255  ;;  %4531 = vmatmul.mubr.msk.f32.vlgmr.msra.gmra.mrb[26].mxu1 %vm480_vm2, %v4395_v35  ;;  %4533 = vmatprep.subr.mxu1 %v4619_v3 }
  0xca   : > { %v3258_v37 = vsel %vm1478_vm6, %v3254_v34, %v3256_v36  ;;  %4534 = vmatpush3.msk.msra.mxu1 %vm484_vm1, %v3256_v36  ;;  %4535 = vmatprep.mubr.msk.f32.mxu1 %vm4620_vm0, %v4619_v3 }
  0xcb   : > { %4398 = vmatmul.mubr.msk.f32.vlgmr.msra.gmra.mrb[26].mxu0 %vm480_vm2, %v4395_v35  ;;  %4402 = vmatprep.subr.msk.mxu0 %vm484_vm1, %v3258_v37 }
  0xcc   : > { %v3252_v38 = vpop.permute.xlu0 %3251  ;;  %3332 = vmatprep.mubr.f32.mxu0 %v4619_v3  ;;  %4538 = vmatprep.subr.mxu1 %v4619_v3 }
  0xcd   : > { %v3257_v40 = vsel %vm1478_vm6, %v3252_v38, %v3254_v34  ;;  %v3452_v41 = vpop.permute.xlu1 %3451  ;;  %4536 = vmatmul.mubr.msk.f32.vlgmr.msra.gmra.mrb[28].mxu1 %vm480_vm2, %v4401_v39  ;;  %4593 = vset.pattern.permute.xlu1 %v4629_v9 }
  0xce   : > { %4403 = vmatpush1.msk.msra.mxu0 %vm484_vm1, %v3257_v40  ;;  %4540 = vmatprep.mubr.msk.f32.mxu1 %vm4620_vm0, %v4619_v3 }
  0xcf   : > { %4404 = vmatmul.mubr.msk.f32.vlgmr.msra.gmra.mrb[28].mxu0 %vm480_vm2, %v4401_v39 }
  0xd0   : > { %v3454_v42 = vpop.permute.xlu0 %3453  ;;  %3530 = vmatprep.mubr.f32.mxu0 %v4619_v3 }
  0xd1   : > { %v3456_v43 = vsel %vm1677_vm7, %v3452_v41, %v3454_v42  ;;  %v3450_v44 = vpop.permute.xlu1 %3449  ;;  %4539 = vmatpush3.msk.msra.mxu1 %vm484_vm1, %v3454_v42 }
  0xd2   : > { %v3455_v46 = vsel %vm1677_vm7, %v3450_v44, %v3452_v41  ;;  %4408 = vmatprep.subr.msk.mxu0 %vm484_vm1, %v3456_v43  ;;  %4541 = vmatmul.mubr.msk.f32.vlgmr.msra.gmra.mrb[30].mxu1 %vm480_vm2, %v4407_v45 }
  0xd3   : > { %4409 = vmatpush1.msk.msra.mxu0 %vm484_vm1, %v3455_v46  ;;  %4543 = vmatprep.subr.mxu1 %v4619_v3 }
  0xd4   : > { %v3650_v47 = vpop.permute.xlu0 %3649  ;;  %4410 = vmatmul.mubr.msk.f32.vlgmr.msra.gmra.mrb[30].mxu0 %vm480_vm2, %v4407_v45  ;;  %4545 = vmatprep.mubr.msk.f32.mxu1 %vm4620_vm0, %v4619_v3 }
  0xd5   : > { %v3652_v48 = vpop.permute.xlu1 %3651  ;;  %3728 = vmatprep.mubr.f32.mxu0 %v4619_v3 }
  0xd6   : > { %v3654_v49 = vsel %vm1876_vm8, %v3650_v47, %v3652_v48  ;;  %4544 = vmatpush3.msk.msra.mxu1 %vm484_vm1, %v3652_v48 }
  0xd7   : > { %4414 = vmatprep.subr.msk.mxu0 %vm484_vm1, %v3654_v49  ;;  %4546 = vmatmul.mubr.msk.f32.vlgmr.msra.gmra.mrb[32].mxu1 %vm480_vm2, %v4413_v50 }
  0xd8   : > { %v3648_v51 = vpop.permute.xlu0 %3647  ;;  %4548 = vmatprep.subr.mxu1 %v4619_v3  ;;  %4550 = vmatprep.mubr.msk.f32.mxu1 %vm4620_vm0, %v4619_v3  ;;  %vm4104_vm0 = vcmp.lt.s32.totalorder %v460_v0, 324 }
  0xd9   : > { %v3653_v52 = vsel %vm1876_vm8, %v3648_v51, %v3650_v47  ;;  %v3848_v53 = vpop.permute.xlu1 %3847 }
  0xda   : > { %4415 = vmatpush1.msk.msra.mxu0 %vm484_vm1, %v3653_v52 }
  0xdb   : > { %4416 = vmatmul.mubr.msk.f32.vlgmr.msra.gmra.mrb[32].mxu0 %vm480_vm2, %v4413_v50 }
  0xdc   : > { %v3850_v54 = vpop.permute.xlu0 %3849  ;;  %3926 = vmatprep.mubr.f32.mxu0 %v4619_v3 }
  0xdd   : > { %v3852_v55 = vsel %vm2075_vm9, %v3848_v53, %v3850_v54  ;;  %v3846_v56 = vpop.permute.xlu1 %3845  ;;  %4549 = vmatpush3.msk.msra.mxu1 %vm484_vm1, %v3850_v54 }
  0xde   : > { %v3851_v58 = vsel %vm2075_vm9, %v3846_v56, %v3848_v53  ;;  %4420 = vmatprep.subr.msk.mxu0 %vm484_vm1, %v3852_v55  ;;  %4551 = vmatmul.mubr.msk.f32.vlgmr.msra.gmra.mrb[34].mxu1 %vm480_vm2, %v4419_v57 }
  0xdf   : > { %4421 = vmatpush1.msk.msra.mxu0 %vm484_vm1, %v3851_v58 }
  0xe0   : > { %4422 = vmatmul.mubr.msk.f32.vlgmr.msra.gmra.mrb[34].mxu0 %vm480_vm2, %v4419_v57 }
  0xf2   : > { %v557_v59 = vpop.f32.mrb[0].mxu0 }
  0xf3   : > { %v559_v60 = vpop.f32.mrb[1].mxu0  ;;  %v628_v61 = vpop.f32.mrb[0].mxu1 }
  0xf4   : > { %v635_v62 = vcombine.low %v557_v59, %v559_v60  ;;  %638 = vrot.lane.b32.xlu1 %v628_v61, %s4628_s17  ;;  %v4467_v63 = vpop.f32.mrb[1].mxu1 }
  0xf6   : > { %636 = vrot.lane.b32.xlu0 %v635_v62, %s4628_s17 }
  0xf7   : > { %v831_v1 = vpop.f32.mrb[2].mxu1 }
  0xf8   : > { %v4472_v2 = vpop.f32.mrb[3].mxu1 }
  0xf9   : > { %v760_v5 = vpop.f32.mrb[2].mxu0 }
  0xfa   : > { %v762_v7 = vpop.f32.mrb[3].mxu0 }
  0xfb   : > { %v837_v8 = vcombine.low %v760_v5, %v762_v7 }
 0x166   : > { %v639_v10 = vpop.permute.xlu1 %638 }
 0x168   : > { %v637_v3 = vpop.permute.xlu0 %636 }
 0x169   : > { %v640_v11 = vrot.slane %v637_v3, 4  ;;  %v1030_v13 = vpop.f32.mrb[4].mxu1 }
 0x16a   : > { %v4477_v14 = vpop.f32.mrb[5].mxu1 }
 0x16b   : > { %v642_v16 = vsel %vm641_vm11, %v640_v11, %v637_v3  ;;  %v643_v17 = vsel %vm641_vm11, %v640_v11, %v639_v10  ;;  %v959_v18 = vpop.f32.mrb[4].mxu0  ;;  %v4028_v3 = vld [vmem:[%s5198_s5] sm:$0xf] }
 0x16c   : > { %v647_v19 = vadd.f32 %v643_v17, %v451_v12  ;;  %v961_v20 = vpop.f32.mrb[5].mxu0  ;;  %651 = vst.msk [vmem:[#allocation2] sm:$0xff] %vm5093_vm14, %v642_v16  ;;  %v4013_v17 = vld [vmem:[%s5197_s4] sm:$0xf] }
 0x16d   : > { %v1036_v21 = vcombine.low %v959_v18, %v961_v20 }
 0x16e   : > { %652 = vst.msk [vmem:[#allocation2 + $0x8] sm:$0xf] %vm447_vm10, %v647_v19  ;;  %v1229_v22 = vpop.f32.mrb[6].mxu1 }
 0x16f   : > { %v1158_v23 = vpop.f32.mrb[6].mxu0  ;;  %v4482_v24 = vpop.f32.mrb[7].mxu1 }
 0x170   : > { %v1160_v25 = vpop.f32.mrb[7].mxu0 }
 0x171   : > { %v1235_v26 = vcombine.low %v1158_v23, %v1160_v25 }
 0x172   : > { %v1428_v27 = vpop.f32.mrb[8].mxu1 }
 0x173   : > { %v1357_v28 = vpop.f32.mrb[8].mxu0  ;;  %v4487_v29 = vpop.f32.mrb[9].mxu1  ;;  %v655_v32 = vld [vmem:[#allocation2] sm:$0xff] }
 0x174   : > { %v1359_v30 = vpop.f32.mrb[9].mxu0  ;;  %v839_v34 = vadd.f32 %v837_v8, %v655_v32 }
 0x175   : > { %v656_v31 = vld [vmem:[#allocation2 + $0x8] sm:$0xf]  ;;  %v1434_v33 = vcombine.low %v1357_v28, %v1359_v30 }
 0x176   : > { %v840_v35 = vadd.f32 %v831_v1, %v656_v31  ;;  %v5102_v36 = vpop.f32.mrb[10].mxu1  ;;  %v1038_v39 = vadd.f32 %v1036_v21, %v839_v34 }
 0x177   : > { %v1556_v37 = vpop.f32.mrb[10].mxu0  ;;  %v4492_v38 = vpop.f32.mrb[11].mxu1 }
 0x178   : > { %842 = vst.msk [vmem:[#allocation2 + $0x8] sm:$0xf] %vm447_vm10, %v840_v35  ;;  %v1558_v40 = vpop.f32.mrb[11].mxu0  ;;  %v1237_v42 = vadd.f32 %v1235_v26, %v1038_v39 }
 0x179   : > { %v1633_v41 = vcombine.low %v1556_v37, %v1558_v40 }
 0x17a   : > { %v1436_v44 = vadd.f32 %v1434_v33, %v1237_v42 }
 0x17b   : > { %v5105_v43 = vpop.f32.mrb[12].mxu1 }
 0x17c   : > { %v4497_v45 = vpop.f32.mrb[13].mxu1  ;;  %v1635_v46 = vadd.f32 %v1633_v41, %v1436_v44 }
 0x17e   : > { %v1755_v47 = vpop.f32.mrb[12].mxu0 }
 0x17f   : > { %v846_v48 = vld [vmem:[#allocation2 + $0x8] sm:$0xf]  ;;  %v1757_v49 = vpop.f32.mrb[13].mxu0 }
 0x180   : > { %v1039_v50 = vadd.f32 %v1030_v13, %v846_v48  ;;  %v1832_v51 = vcombine.low %v1755_v47, %v1757_v49 }
 0x182   : > { %1041 = vst.msk [vmem:[#allocation2 + $0x8] sm:$0xf] %vm447_vm10, %v1039_v50  ;;  %v1834_v52 = vadd.f32 %v1832_v51, %v1635_v46  ;;  %v5108_v53 = vpop.f32.mrb[14].mxu1 }
 0x183   : > { %v1954_v54 = vpop.f32.mrb[14].mxu0  ;;  %v4502_v55 = vpop.f32.mrb[15].mxu1 }
 0x184   : > { %v1956_v56 = vpop.f32.mrb[15].mxu0 }
 0x185   : > { %v2031_v57 = vcombine.low %v1954_v54, %v1956_v56 }
 0x186   : > { %v5110_v58 = vpop.f32.mrb[16].mxu1 }
 0x187   : > { %v2033_v59 = vadd.f32 %v2031_v57, %v1834_v52  ;;  %v4507_v60 = vpop.f32.mrb[17].mxu1 }
 0x189   : > { %v1045_v61 = vld [vmem:[#allocation2 + $0x8] sm:$0xf] }
 0x18a   : > { %v1238_v62 = vadd.f32 %v1229_v22, %v1045_v61  ;;  %v2153_v63 = vpop.f32.mrb[16].mxu0 }
 0x18b   : > { %v2155_v1 = vpop.f32.mrb[17].mxu0 }
 0x18c   : > { %1240 = vst.msk [vmem:[#allocation2 + $0x8] sm:$0xf] %vm447_vm10, %v1238_v62  ;;  %v2230_v2 = vcombine.low %v2153_v63, %v2155_v1  ;;  %v2414_v5 = vpop.f32.mrb[18].mxu1 }
 0x18d   : > { %2424 = vrot.lane.b32.xlu1 %v2414_v5, %s4628_s17  ;;  %v4512_v7 = vpop.f32.mrb[19].mxu1 }
 0x18e   : > { %v5114_v8 = vadd.f32 %v2230_v2, %v2033_v59  ;;  %v2343_v9 = vpop.f32.mrb[18].mxu0 }
 0x18f   : > { %v2345_v10 = vpop.f32.mrb[19].mxu0 }
 0x190   : > { %2234 = vst [vmem:[#allocation2] sm:$0xff] %v5114_v8  ;;  %v2421_v11 = vcombine.low %v2343_v9, %v2345_v10  ;;  %v5120_v12 = vpop.f32.mrb[20].mxu1 }
 0x191   : > { %4031 = vperm.xlu1 %4593, %v4028_v3   ;;  %v4517_v14 = vpop.f32.mrb[21].mxu1 }
 0x192   : > { %2422 = vrot.lane.b32.xlu0 %v2421_v11, %s4628_s17  ;;  %v5123_v13 = vpop.f32.mrb[20].mxu0 }
 0x193   : > { %v1244_v16 = vld [vmem:[#allocation2 + $0x8] sm:$0xf]  ;;  %v5128_v18 = vpop.f32.mrb[21].mxu0 }
 0x194   : > { %v1437_v19 = vadd.f32 %v1428_v27, %v1244_v16  ;;  %v2619_v20 = vcombine.low %v5123_v13, %v5128_v18  ;;  %v5139_v25 = vpop.f32.mrb[22].mxu1 }
 0x195   : > { %v4522_v28 = vpop.f32.mrb[23].mxu1 }
 0x196   : > { %1439 = vst.msk [vmem:[#allocation2 + $0x8] sm:$0xf] %vm447_vm10, %v1437_v19  ;;  %4016 = vperm.xlu0 %4592, %v4013_v17   ;;  %v5133_v21 = vpop.f32.mrb[22].mxu0 }
 0x197   : > { %v5135_v22 = vpop.f32.mrb[23].mxu0 }
 0x198   : > { %v2817_v23 = vcombine.low %v5133_v21, %v5135_v22  ;;  %v3009_v38 = vpop.f32.mrb[24].mxu1 }
 0x199   : > { %v4527_v39 = vpop.f32.mrb[25].mxu1 }
 0x19a   : > { %v2938_v24 = vpop.f32.mrb[24].mxu0 }
 0x19b   : > { %v2940_v26 = vpop.f32.mrb[25].mxu0 }
 0x19c   : > { %v3015_v29 = vcombine.low %v2938_v24, %v2940_v26 }
 0x19d   : > { %v1443_v27 = vld [vmem:[#allocation2 + $0x8] sm:$0xf] }
 0x19e   : > { %v1636_v30 = vadd.f32 %v5102_v36, %v1443_v27  ;;  %v3136_v31 = vpop.f32.mrb[26].mxu0  ;;  %v3207_v36 = vpop.f32.mrb[26].mxu1 }
 0x19f   : > { %v3138_v32 = vpop.f32.mrb[27].mxu0  ;;  %v4532_v48 = vpop.f32.mrb[27].mxu1 }
 0x1a0   : > { %1638 = vst.msk [vmem:[#allocation2 + $0x8] sm:$0xf] %vm447_vm10, %v1636_v30  ;;  %v3213_v33 = vcombine.low %v3136_v31, %v3138_v32  ;;  %v3405_v56 = vpop.f32.mrb[28].mxu1  ;;  %v4630_v32 = vmov 839922192  }
 0x1a1   : > { %v4537_v57 = vpop.f32.mrb[29].mxu1  ;;  %v4045_v48 = vld [vmem:[%s5199_s6] sm:$0x7] }
 0x1a2   : > { %v3334_v34 = vpop.f32.mrb[28].mxu0 }
 0x1a3   : > { %v3336_v35 = vpop.f32.mrb[29].mxu0 }
 0x1a4   : > { %v3411_v37 = vcombine.low %v3334_v34, %v3336_v35 }
 0x1a5   : > { %v3603_v60 = vpop.f32.mrb[30].mxu1 }
 0x1a6   : > { %v4542_v61 = vpop.f32.mrb[31].mxu1 }
 0x1a7   : > { %v1642_v40 = vld [vmem:[#allocation2 + $0x8] sm:$0xf]  ;;  %v3532_v41 = vpop.f32.mrb[30].mxu0 }
 0x1a8   : > { %v1835_v42 = vadd.f32 %v5105_v43, %v1642_v40  ;;  %v3534_v44 = vpop.f32.mrb[31].mxu0 }
 0x1a9   : > { %v3609_v45 = vcombine.low %v3532_v41, %v3534_v44 }
 0x1aa   : > { %1837 = vst.msk [vmem:[#allocation2 + $0x8] sm:$0xf] %vm447_vm10, %v1835_v42  ;;  %v3801_v62 = vpop.f32.mrb[32].mxu1 }
 0x1ab   : > { %v4547_v63 = vpop.f32.mrb[33].mxu1 }
 0x1ae   : > { %v3730_v46 = vpop.f32.mrb[32].mxu0 }
 0x1af   : > { %v3732_v47 = vpop.f32.mrb[33].mxu0 }
 0x1b0   : > { %v3807_v49 = vcombine.low %v3730_v46, %v3732_v47  ;;  %v4049_v46 = vsub.s32 0, %v4695_v4 }
 0x1b1   : > { %v1841_v50 = vld [vmem:[#allocation2 + $0x8] sm:$0xf]  ;;  %v3999_v1 = vpop.f32.mrb[34].mxu1 }
 0x1b2   : > { %v2034_v51 = vadd.f32 %v5108_v53, %v1841_v50  ;;  %v4552_v2 = vpop.f32.mrb[35].mxu1 }
 0x1b3   : > { %v3928_v52 = vpop.f32.mrb[34].mxu0 }
 0x1b4   : > { %2036 = vst.msk [vmem:[#allocation2 + $0x8] sm:$0xf] %vm447_vm10, %v2034_v51  ;;  %v3930_v54 = vpop.f32.mrb[35].mxu0 }
 0x1b5   : > { %v4005_v55 = vcombine.low %v3928_v52, %v3930_v54  ;;  %v4057_v52 = vsub.s32 2, %v4695_v4 }
 0x1bb   : > { %v2040_v43 = vld [vmem:[#allocation2 + $0x8] sm:$0xf] }
 0x1bc   : > { %v2233_v59 = vadd.f32 %v5110_v58, %v2040_v43  ;;  %v4058_v43 = vrot.slane %v4045_v48, %v4057_v52 }
 0x1be   : > { %2236 = vst.msk [vmem:[#allocation2 + $0x8] sm:$0xf] %vm2235_vm15, %v2233_v59 }
 0x1c5   : > { %v2239_v3 = vld [vmem:[#allocation2 + $0x8] sm:$0xf] }
 0x1ff   : > { %v2425_v5 = vpop.permute.xlu1 %2424 }
 0x204   : > { %v2423_v53 = vpop.permute.xlu0 %2422 }
 0x205   : > { %v2426_v7 = vrot.slane %v2423_v53, 4 }
 0x207   : > { %v2427_v9 = vsel %vm641_vm11, %v2426_v7, %v2423_v53  ;;  %v2428_v10 = vsel %vm641_vm11, %v2426_v7, %v2425_v5 }
 0x208   : > { %v2431_v11 = vadd.f32 %v2427_v9, %v5114_v8  ;;  %v2432_v14 = vadd.f32 %v2428_v10, %v2239_v3 }
 0x20a   : > { %2433 = vst.msk [vmem:[#allocation2] sm:$0xff] %vm5093_vm14, %v2431_v11 }
 0x20b   : > { %2434 = vst.msk [vmem:[#allocation2 + $0x8] sm:$0xf] %vm447_vm10, %v2432_v14 }
 0x210   : > { %v4032_v42 = vpop.permute.xlu1 %4031 }
 0x211   : > { %v2437_v58 = vld [vmem:[#allocation2] sm:$0xff] }
 0x212   : > { %v2438_v16 = vld [vmem:[#allocation2 + $0x8] sm:$0xf]  ;;  %v2621_v17 = vadd.f32 %v2619_v20, %v2437_v58 }
 0x213   : > { %v2622_v19 = vadd.f32 %v5120_v12, %v2438_v16 }
 0x214   : > { %v2819_v21 = vadd.f32 %v2817_v23, %v2621_v17 }
 0x215   : > { %2624 = vst.msk [vmem:[#allocation2 + $0x8] sm:$0xf] %vm447_vm10, %v2622_v19  ;;  %v4017_v39 = vpop.permute.xlu0 %4016 }
 0x216   : > { %v3017_v22 = vadd.f32 %v3015_v29, %v2819_v21 }
 0x218   : > { %v3215_v24 = vadd.f32 %v3213_v33, %v3017_v22  ;;  %v4019_v33 = vunpack.c.l.s4 %v4630_v32 }
 0x21a   : > { %v3413_v8 = vadd.f32 %v3411_v37, %v3215_v24  ;;  %v4020_v37 = vunpack.c.0.s8 %v4019_v33 }
 0x21c   : > { %v2628_v26 = vld [vmem:[#allocation2 + $0x8] sm:$0xf]  ;;  %v3611_v28 = vadd.f32 %v3609_v45, %v3413_v8 }
 0x21d   : > { %v2820_v15 = vadd.f32 %v5139_v25, %v2628_v26 }
 0x21e   : > { %v3809_v27 = vadd.f32 %v3807_v49, %v3611_v28  ;;  %v4050_v49 = vrot.slane %v4045_v48, %v4049_v46 }
 0x21f   : > { %2822 = vst.msk [vmem:[#allocation2 + $0x8] sm:$0xf] %vm447_vm10, %v2820_v15 }
 0x220   : > { %v4007_v30 = vadd.f32 %v4005_v55, %v3809_v27 }
 0x222   : > { %4009 = vst [vmem:[#allocation2] sm:$0xff] %v4007_v30 }
 0x226   : > { %v2826_v31 = vld [vmem:[#allocation2 + $0x8] sm:$0xf] }
 0x227   : > { %v3018_v13 = vadd.f32 %v3009_v38, %v2826_v31  ;;  %v4023_v38 = vsub.s32 %v4020_v37, %v4695_v4 }
 0x229   : > { %3020 = vst.msk [vmem:[#allocation2 + $0x8] sm:$0xf] %vm447_vm10, %v3018_v13  ;;  %v4024_v40 = vrot.slane %v4017_v39, %v4023_v38  ;;  %v4039_v47 = vrot.slane %v4032_v42, %v4023_v38 }
 0x22b   : > { %v4026_v45 = vmul.f32 %v4024_v40, %v4007_v30 }
 0x22d   : > { %v4041_v51 = vadd.f32 %v4039_v47, %v4026_v45 }
 0x22f   : > { %v4043_v57 = vmax.f32 %v4041_v51, 0.0 }
 0x230   : > { %v3024_v12 = vld [vmem:[#allocation2 + $0x8] sm:$0xf] }
 0x231   : > { %v3216_v18 = vadd.f32 %v3207_v36, %v3024_v12  ;;  %v4053_v36 = vsub.s32 1, %v4695_v4 }
 0x233   : > { %3218 = vst.msk [vmem:[#allocation2 + $0x8] sm:$0xf] %vm447_vm10, %v3216_v18  ;;  %v4054_v50 = vrot.slane %v4045_v48, %v4053_v36 }
 0x23a   : > { %v3222_v20 = vld [vmem:[#allocation2 + $0x8] sm:$0xf] }
 0x23b   : > { %v3414_v23 = vadd.f32 %v3405_v56, %v3222_v20  ;;  %v4060_v56 = vcombine.low %v4050_v49, %v4054_v50 }
 0x23d   : > { %3416 = vst.msk [vmem:[#allocation2 + $0x8] sm:$0xf] %vm447_vm10, %v3414_v23  ;;  %v4062_v61 = vmul.f32 %v4060_v56, %v4043_v57 }
 0x23f   : > { %v4072_v63 = vrot.slane %v4062_v61, %v4708_v6 }
 0x244   : > { %v3420_v29 = vld [vmem:[#allocation2 + $0x8] sm:$0xf] }
 0x245   : > { %v3612_v25 = vadd.f32 %v3603_v60, %v3420_v29 }
 0x247   : > { %3614 = vst.msk [vmem:[#allocation2 + $0x8] sm:$0xf] %vm447_vm10, %v3612_v25 }
 0x24e   : > { %v3618_v34 = vld [vmem:[#allocation2 + $0x8] sm:$0xf] }
 0x24f   : > { %v3810_v35 = vadd.f32 %v3801_v62, %v3618_v34 }
 0x251   : > { %3812 = vst.msk [vmem:[#allocation2 + $0x8] sm:$0xf] %vm447_vm10, %v3810_v35 }
 0x258   : > { %v3816_v41 = vld [vmem:[#allocation2 + $0x8] sm:$0xf] }
 0x259   : > { %v4008_v44 = vadd.f32 %v3999_v1, %v3816_v41 }
 0x25b   : > { %4010 = vst.msk [vmem:[#allocation2 + $0x8] sm:$0xf] %vm2235_vm15, %v4008_v44 }
 0x262   : > { %v4012_v54 = vld [vmem:[#allocation2 + $0x8] sm:$0xf] }
 0x263   : > { %v4027_v55 = vmul.f32 %v4024_v40, %v4012_v54 }
 0x265   : > { %v4042_v59 = vadd.f32 %v4039_v47, %v4027_v55 }
 0x267   : > { %v4044_v60 = vmax.f32 %v4042_v59, 0.0 }
 0x269   : > { %v4063_v62 = vmul.f32 %v4058_v43, %v4044_v60 }
 0x26b   : > { %v4079_v1 = vrot.slane %v4063_v62, %v4708_v6 }
 0x26d   : > { %v4080_v2 = vcombine.low %v4072_v63, %v4079_v1  ;;  %v4081_v53 = vcombine.high %v4072_v63, %v4079_v1 }
 0x26f   : > { %v4088_v4 = vrot.slane %v4080_v2, %v4708_v6  ;;  %v4095_v5 = vrot.slane %v4081_v53, %v4708_v6 }
 0x271   : > { %v4096_v7 = vcombine.high %v4088_v4, %v4088_v4  ;;  %v4097_v9 = vcombine.high %v4095_v5, %v4095_v5  ;;  %4106 = vst.msk [vmem:[%s444_s8] sm:$0x7] %vm4104_vm0, %v4088_v4  ;;  %4107 = vst.msk [vmem:[%s444_s8 + $0x3] sm:$0x7] %vm4104_vm0, %v4095_v5 }
 0x273   : > { %4108 = vst.msk [vmem:[%s444_s8 + $0x6] sm:$0x7] %vm4104_vm0, %v4096_v7  ;;  %4109 = vst.msk [vmem:[%s444_s8 + $0x9] sm:$0x7] %vm4104_vm0, %v4097_v9 }
 0x274 PF: > { %s17_s26 = sadd.s32 1, %s4616_s26   ;;  %s5203_s24 = smov %s4612_s25 }
 0x275   : > { %p14_p5 = scmp.ge.s32.totalorder %s17_s26, 4   ;;  %s5204_s25 = smov %s5206_s27 }
 0x277   :  { %16 = sbr.rel (!%p14_p5) target bundleno = 2 (0x2), region = 112 }

</bundles_post_ra>
